<compile_context>
chip_gen: v7x
topology: tpu7x:2x2x1
jax: 0.10.0
libtpu: 0.0.40
codegen_flags: <defaults>
</compile_context>

<pallas_src>
import functools
import math

import jax
import jax.numpy as jnp
from jax import lax
from jax.experimental import pallas as pl
from jax.experimental.pallas import tpu as pltpu

_LANE = 128
_SUBLANE = 8
_BN_EPS = 1e-5
_VMEM_LIMIT = 48 * 1024 * 1024
_NEG_BIG = -1e30

CONV1_SPEC = dict(kh=41, kw=11, stride=(2, 2), padding=(20, 5), cout=32)
CONV2_SPEC = dict(kh=21, kw=11, stride=(2, 1), padding=(10, 5), cout=32)


# -----------------------------------------------------------------------------
# Small helpers (static shape math / padding glue)
# -----------------------------------------------------------------------------
def _round_up(x, m):
    return (x + m - 1) // m * m


def _row_tiling(m, max_tile=512):
    """Pick a row tile (multiple of 8) and the padded row count."""
    if m <= max_tile:
        tile = _round_up(m, _SUBLANE)
        return tile, tile
    return max_tile, _round_up(m, max_tile)


def _pad_axis(x, axis, new_size):
    pad = new_size - x.shape[axis]
    if pad <= 0:
        return x
    widths = [(0, 0)] * x.ndim
    widths[axis] = (0, pad)
    return jnp.pad(x, widths)


def _compiler_params():
    return pltpu.CompilerParams(dimension_semantics=("parallel",),
                                vmem_limit_bytes=_VMEM_LIMIT)


# -----------------------------------------------------------------------------
# Pallas kernels
# -----------------------------------------------------------------------------
def conv_bn_htanh_kernel(p_ref, w_ref, scale_ref, shift_ref, mask_ref, o_ref):
    """im2col-matmul + folded BatchNorm affine + Hardtanh(0,20) + fused time mask.

    p_ref:(TM,Kp) bf16  w_ref:(Kp,Cp) bf16  scale/shift:(1,Cp) f32
    mask_ref:(TM,1) f32  o_ref:(TM,Cp) bf16
    """
    acc = jnp.dot(p_ref[...], w_ref[...], preferred_element_type=jnp.float32)
    y = acc * scale_ref[...] + shift_ref[...]
    y = jnp.clip(y, 0.0, 20.0) * mask_ref[...]
    o_ref[...] = y.astype(o_ref.dtype)


def matmul_bias_kernel(x_ref, w_ref, b_ref, o_ref):
    """(rows, F) @ (F, G) + bias -- the hoisted GRU input projection (both dirs)."""
    acc = jnp.dot(x_ref[...].astype(jnp.bfloat16), w_ref[...],
                  preferred_element_type=jnp.float32)
    o_ref[...] = acc + b_ref[...]


def gru_rec_kernel(gi_ref, whh_ref, bhh_ref, o_ref, h_ref,
                   *, hidden_pad, reverse, unroll):
    """GRU recurrence over axis 0 of gi_ref (input projection precomputed).

    gi_ref:  (S, TN, 3*Hp) f32   per-step input pre-activations, gates [r|z|n]
    whh_ref: (Hp, 3*Hp)    bf16  recurrent weights (gate-separated, 128-padded)
    bhh_ref: (1, 3*Hp)     f32
    o_ref:   (S, TN, Hp)   f32
    h_ref:   (TN, Hp)      f32 VMEM scratch (hidden-state carry)
    """
    S = gi_ref.shape[0]
    H = hidden_pad
    h_ref[...] = jnp.zeros_like(h_ref)

    def step(s, carry):
        t = (S - 1 - s) if reverse else s
        gi = gi_ref[t]                                  # (TN, 3Hp)
        h_prev = h_ref[...]                             # (TN, Hp)
        gh = jnp.dot(h_prev.astype(jnp.bfloat16), whh_ref[...],
                     preferred_element_type=jnp.float32) + bhh_ref[...]
        r = jax.nn.sigmoid(gi[:, 0:H] + gh[:, 0:H])
        z = jax.nn.sigmoid(gi[:, H:2 * H] + gh[:, H:2 * H])
        n = jnp.tanh(gi[:, 2 * H:3 * H] + r * gh[:, 2 * H:3 * H])
        h = (1.0 - z) * n + z * h_prev
        h_ref[...] = h
        o_ref[t] = h
        return carry

    lax.fori_loop(0, S, step, 0, unroll=unroll)


def fc_logsoftmax_kernel(x_ref, scale_ref, shift_ref, w_ref, cb_ref, o_ref):
    """BatchNorm1d (eval affine) + Linear(no bias) + log_softmax.

    cb_ref holds 0 for real vocab columns and -1e30 for padded columns, so the
    padded lanes never leak into the max / logsumexp reductions.
    """
    xn = x_ref[...] * scale_ref[...] + shift_ref[...]
    y = jnp.dot(xn.astype(jnp.bfloat16), w_ref[...],
                preferred_element_type=jnp.float32) + cb_ref[...]
    m = jnp.max(y, axis=-1, keepdims=True)
    lse = m + jnp.log(jnp.sum(jnp.exp(y - m), axis=-1, keepdims=True))
    o_ref[...] = y - lse


# -----------------------------------------------------------------------------
# pallas_call wrappers (row-tiled grids)
# -----------------------------------------------------------------------------
def conv_matmul(patches, wmat, scale, shift, mask, tile_m):
    m_pad, k_pad = patches.shape
    c_pad = wmat.shape[1]
    return pl.pallas_call(
        conv_bn_htanh_kernel,
        out_shape=jax.ShapeDtypeStruct((m_pad, c_pad), jnp.bfloat16),
        grid=(m_pad // tile_m,),
        in_specs=[
            pl.BlockSpec((tile_m, k_pad), lambda i: (i, 0)),
            pl.BlockSpec((k_pad, c_pad), lambda i: (0, 0)),
            pl.BlockSpec((1, c_pad), lambda i: (0, 0)),
            pl.BlockSpec((1, c_pad), lambda i: (0, 0)),
            pl.BlockSpec((tile_m, 1), lambda i: (i, 0)),
        ],
        out_specs=pl.BlockSpec((tile_m, c_pad), lambda i: (i, 0)),
        compiler_params=_compiler_params(),
    )(patches, wmat, scale, shift, mask)


def conv_block(x, prep, spec, lengths):
    """Conv2d + BN + Hardtanh + time mask, NHWC in/out, via im2col + fused matmul."""
    B, D, T, Cin = x.shape
    KH, KW = spec['kh'], spec['kw']
    sh, sw = spec['stride']
    ph, pw = spec['padding']
    Cout = spec['cout']
    OH = (D + 2 * ph - KH) // sh + 1
    OW = (T + 2 * pw - KW) // sw + 1
    K = KH * KW * Cin
    M = B * OH * OW

    # im2col gather (XLA glue), K order = (KH, KW, Cin) matching the prepared weights.
    # TODO(synk): patches are still materialized in HBM; generating them in-kernel
    #             via windowed DMA would cut conv-path HBM traffic further.
    xp = jnp.pad(x, ((0, 0), (ph, ph), (pw, pw), (0, 0)))
    d_idx = (jnp.arange(OH) * sh)[:, None] + jnp.arange(KH)[None, :]     # (OH, KH)
    t_idx = (jnp.arange(OW) * sw)[:, None] + jnp.arange(KW)[None, :]     # (OW, KW)
    patches = xp[:, d_idx[:, None, :, None], t_idx[None, :, None, :], :]  # (B,OH,OW,KH,KW,Cin)
    patches = patches.reshape(M, K).astype(jnp.bfloat16)
    patches = _pad_axis(patches, 1, prep['wmat'].shape[0])               # K -> K_pad

    # MaskConv: zero output rows whose time index ow >= lengths[b] (fused in kernel).
    keep = (jnp.arange(OW)[None, :] < lengths[:, None]).astype(jnp.float32)   # (B, OW)
    mask = jnp.broadcast_to(keep[:, None, :], (B, OH, OW)).reshape(M, 1)

    tile_m, m_pad = _row_tiling(M)
    patches = _pad_axis(patches, 0, m_pad)
    mask = _pad_axis(mask, 0, m_pad)

    out = conv_matmul(patches, prep['wmat'], prep['scale'], prep['shift'], mask, tile_m)
    return out[:M, :Cout].reshape(B, OH, OW, Cout)                        # NHWC, bf16


def gi_projection(x_flat, wih, bih, tile_m):
    m_pad, f = x_flat.shape
    g = wih.shape[1]
    return pl.pallas_call(
        matmul_bias_kernel,
        out_shape=jax.ShapeDtypeStruct((m_pad, g), jnp.float32),
        grid=(m_pad // tile_m,),
        in_specs=[
            pl.BlockSpec((tile_m, f), lambda i: (i, 0)),
            pl.BlockSpec((f, g), lambda i: (0, 0)),
            pl.BlockSpec((1, g), lambda i: (0, 0)),
        ],
        out_specs=pl.BlockSpec((tile_m, g), lambda i: (i, 0)),
        compiler_params=_compiler_params(),
    )(x_flat, wih, bih)


def gru_direction(gi, whh, bhh, hp, reverse, tile_n):
    """One GRU direction; recurrence over axis 0, tiled over the batch axis (axis 1)."""
    S, n_pad, G = gi.shape
    kernel = functools.partial(gru_rec_kernel, hidden_pad=hp, reverse=reverse,
                               unroll=bool(S <= 16))
    return pl.pallas_call(
        kernel,
        out_shape=jax.ShapeDtypeStruct((S, n_pad, hp), jnp.float32),
        grid=(n_pad // tile_n,),
        in_specs=[
            pl.BlockSpec((S, tile_n, G), lambda i: (0, i, 0)),
            pl.BlockSpec((hp, G), lambda i: (0, 0)),
            pl.BlockSpec((1, G), lambda i: (0, 0)),
        ],
        out_specs=pl.BlockSpec((S, tile_n, hp), lambda i: (0, i, 0)),
        scratch_shapes=[pltpu.VMEM((tile_n, hp), jnp.float32)],
        compiler_params=_compiler_params(),
    )(gi, whh, bhh)


def bigru_layer(x, layer, hp, tile_n):
    """Bidirectional GRU layer; x: (S, N_pad, F) -> (S, N_pad, 2*Hp)."""
    S, n_pad, F = x.shape
    G = 3 * hp

    # Hoisted input projection for both directions in one tiled matmul.
    x_flat = x.reshape(S * n_pad, F)
    tile_m, m_pad = _row_tiling(S * n_pad)
    x_flat = _pad_axis(x_flat, 0, m_pad)
    gi = gi_projection(x_flat, layer['wih'], layer['bih'], tile_m)
    gi = gi[:S * n_pad].reshape(S, n_pad, 2 * G)

    # TODO(synk): on v7x the fwd/bwd directions could map to the two TensorCores.
    fwd = gru_direction(gi[..., :G], layer['whh_f'], layer['bhh_f'], hp, False, tile_n)
    bwd = gru_direction(gi[..., G:], layer['whh_b'], layer['bhh_b'], hp, True, tile_n)
    return jnp.concatenate([fwd, bwd], axis=-1)


def fc_logsoftmax(x_flat, scale, shift, w, cb, tile_m):
    m_pad, f = x_flat.shape
    v_pad = w.shape[1]
    return pl.pallas_call(
        fc_logsoftmax_kernel,
        out_shape=jax.ShapeDtypeStruct((m_pad, v_pad), jnp.float32),
        grid=(m_pad // tile_m,),
        in_specs=[
            pl.BlockSpec((tile_m, f), lambda i: (i, 0)),
            pl.BlockSpec((1, f), lambda i: (0, 0)),
            pl.BlockSpec((1, f), lambda i: (0, 0)),
            pl.BlockSpec((f, v_pad), lambda i: (0, 0)),
            pl.BlockSpec((1, v_pad), lambda i: (0, 0)),
        ],
        out_specs=pl.BlockSpec((tile_m, v_pad), lambda i: (i, 0)),
        compiler_params=_compiler_params(),
    )(x_flat, scale, shift, w, cb)


# -----------------------------------------------------------------------------
# Forward pass
# -----------------------------------------------------------------------------
def get_seq_lens(seq_len):
    """Time-axis length transform of the two Conv2d layers (float div, then .int())."""
    s = seq_len.astype(jnp.float32)
    s = (s + 2 * 5 - 1 * (11 - 1) - 1) / 2.0 + 1.0   # conv1: pad 5, k 11, stride 2 (time)
    s = (s + 2 * 5 - 1 * (11 - 1) - 1) / 1.0 + 1.0   # conv2: pad 5, k 11, stride 1 (time)
    return s.astype(jnp.int32)


def deepspeech2_forward(prep, x, seq_len, *, vocab):
    seq_len_out = get_seq_lens(seq_len)

    # MaskConv conv stack (time mask fused into the conv kernels).  NCHW -> NHWC.
    h = jnp.transpose(x, (0, 2, 3, 1)).astype(jnp.bfloat16)
    h = conv_block(h, prep['conv1'], CONV1_SPEC, seq_len_out)
    h = conv_block(h, prep['conv2'], CONV2_SPEC, seq_len_out)

    # (B, D', T', C) -> (B, T', C*D')  (channel-major feature order, as in reference).
    B, Dp, Tp, C = h.shape
    h = jnp.transpose(h, (0, 2, 3, 1)).reshape(B, Tp, C * Dp)

    # RNN stack.  Axis 0 (= B) is the scan axis, axis 1 (= T') is the GRU "batch",
    # matching the reference module's batch_first quirk.
    hp = prep['rnns'][0]['whh_f'].shape[0]                       # H padded to 128
    h = _pad_axis(h, 2, prep['rnns'][0]['wih'].shape[0])         # pad feature dim
    S, N = B, Tp
    tile_n, n_pad = _row_tiling(N, max_tile=64)
    h = _pad_axis(h, 1, n_pad)
    for layer in prep['rnns']:
        h = bigru_layer(h, layer, hp, tile_n)
    h = h[:, :N]                                                 # (B, T', 2*Hp) f32

    # SequenceWise(BatchNorm1d + Linear) + log_softmax, fused & row-tiled.
    M = S * N
    flat = h.reshape(M, 2 * hp)
    tile_m, m_pad = _row_tiling(M)
    flat = _pad_axis(flat, 0, m_pad)
    out = fc_logsoftmax(flat, prep['fc_scale'], prep['fc_shift'],
                        prep['fc_w'], prep['fc_cb'], tile_m)
    out = out[:M, :vocab].reshape(B, Tp, vocab)
    return out, seq_len_out


# -----------------------------------------------------------------------------
# Parameter folding / padding (done once, outside the jit'd per-call path)
# -----------------------------------------------------------------------------
def prepare_params(params, hidden, vocab):
    H = hidden
    Hp = _round_up(H, _LANE)

    def prep_conv(w, b, g, beta):
        Cout, Cin, KH, KW = w.shape
        K = KH * KW * Cin
        Kp = _round_up(K, _LANE)
        Cp = _round_up(Cout, _LANE)
        wmat = jnp.transpose(w, (2, 3, 1, 0)).reshape(K, Cout)          # (KH,KW,Cin) order
        wmat = jnp.pad(wmat, ((0, Kp - K), (0, Cp - Cout))).astype(jnp.bfloat16)
        s = g / jnp.sqrt(1.0 + _BN_EPS)                                  # running_var = 1
        scale = jnp.pad(s, (0, Cp - Cout)).reshape(1, Cp)
        shift = jnp.pad(b * s + beta, (0, Cp - Cout)).reshape(1, Cp)     # running_mean = 0
        return dict(wmat=wmat, scale=scale, shift=shift)

    def gate_cols(w_t):   # (Fin, 3H) -> (Fin, 3Hp), gate-separated 128-aligned slabs
        return jnp.concatenate(
            [jnp.pad(w_t[:, g * H:(g + 1) * H], ((0, 0), (0, Hp - H))) for g in range(3)],
            axis=1)

    def gate_vec(b):      # (3H,) -> (1, 3Hp)
        return jnp.concatenate(
            [jnp.pad(b[g * H:(g + 1) * H], (0, Hp - H)) for g in range(3)]).reshape(1, 3 * Hp)

    def embed_rows(w, first, fin_pad):   # map real input rows into the padded layout
        if first:
            return jnp.pad(w, ((0, fin_pad - w.shape[0]), (0, 0)))
        # input = concat(fwd H, bwd H) -> rows [0:H] and [Hp:Hp+H] of the 2*Hp layout
        return jnp.concatenate([jnp.pad(w[:H], ((0, Hp - H), (0, 0))),
                                jnp.pad(w[H:], ((0, Hp - H), (0, 0)))], axis=0)

    prep = {
        'conv1': prep_conv(params['conv1_w'], params['conv1_b'],
                           params['bn1_g'], params['bn1_b']),
        'conv2': prep_conv(params['conv2_w'], params['conv2_b'],
                           params['bn2_g'], params['bn2_b']),
        'rnns': [],
    }

    for li, layer in enumerate(params['rnns']):
        first = (li == 0)
        fin = layer['wih_f'].shape[1]
        fin_pad = _round_up(fin, _LANE) if first else 2 * Hp
        wih = jnp.concatenate(
            [embed_rows(gate_cols(layer[f'wih_{d}'].T), first, fin_pad) for d in ('f', 'b')],
            axis=1).astype(jnp.bfloat16)                                  # (Fp, 6Hp)
        bih = jnp.concatenate([gate_vec(layer[f'bih_{d}']) for d in ('f', 'b')], axis=1)
        lp = {'wih': wih, 'bih': bih}
        for d in ('f', 'b'):
            whh = jnp.pad(gate_cols(layer[f'whh_{d}'].T), ((0, Hp - H), (0, 0)))
            lp[f'whh_{d}'] = whh.astype(jnp.bfloat16)                     # (Hp, 3Hp)
            lp[f'bhh_{d}'] = gate_vec(layer[f'bhh_{d}'])                  # (1, 3Hp)
        prep['rnns'].append(lp)

    # SequenceWise(BatchNorm1d + Linear(2H, V, bias=False)) in the padded 2*Hp layout.
    s = params['fc_bn_g'] / jnp.sqrt(1.0 + _BN_EPS)

    def embed_feat(v):    # (2H,) -> (1, 2Hp) at positions [0:H] and [Hp:Hp+H]
        return jnp.concatenate([jnp.pad(v[:H], (0, Hp - H)),
                                jnp.pad(v[H:], (0, Hp - H))]).reshape(1, 2 * Hp)

    prep['fc_scale'] = embed_feat(s)
    prep['fc_shift'] = embed_feat(params['fc_bn_b'])
    Vp = _round_up(vocab, _LANE)
    fcw = embed_rows(params['fc_w'].T, False, 2 * Hp)                     # (2Hp, V)
    prep['fc_w'] = jnp.pad(fcw, ((0, 0), (0, Vp - vocab))).astype(jnp.bfloat16)
    prep['fc_cb'] = jnp.where(jnp.arange(Vp) < vocab, 0.0, _NEG_BIG
                              ).reshape(1, Vp).astype(jnp.float32)
    return prep


# -----------------------------------------------------------------------------
# Deterministic parameter init (shapes from DeepSpeech2.__init__, PyTorch layout)
# -----------------------------------------------------------------------------
def init_params(key, hidden, vocab, rnn_input_size):
    keys = jax.random.split(key, 64)
    it = iter(keys)

    def nrm(shape, scale=0.05):
        return scale * jax.random.normal(next(it), shape, dtype=jnp.float32)

    params = {
        'conv1_w': nrm((32, 1, 41, 11)),  'conv1_b': nrm((32,)),
        'bn1_g': 1.0 + nrm((32,)),        'bn1_b': nrm((32,)),
        'conv2_w': nrm((32, 32, 21, 11), 0.02), 'conv2_b': nrm((32,)),
        'bn2_g': 1.0 + nrm((32,)),        'bn2_b': nrm((32,)),
        'fc_bn_g': 1.0 + nrm((2 * hidden,)), 'fc_bn_b': nrm((2 * hidden,)),
        'fc_w': nrm((vocab, 2 * hidden)),  # Linear(2H, V, bias=False) weight (V, 2H)
        'rnns': [],
    }
    in_sizes = [rnn_input_size] + [2 * hidden] * 4
    for fin in in_sizes:
        layer = {}
        for d in ('f', 'b'):
            layer[f'wih_{d}'] = nrm((3 * hidden, fin))     # PyTorch weight_ih (3H, F)
            layer[f'whh_{d}'] = nrm((3 * hidden, hidden))  # PyTorch weight_hh (3H, H)
            layer[f'bih_{d}'] = nrm((3 * hidden,))
            layer[f'bhh_{d}'] = nrm((3 * hidden,))
        params['rnns'].append(layer)
    return params


# -----------------------------------------------------------------------------
# Main
# -----------------------------------------------------------------------------
if __name__ == "__main__":
    # Small configuration: DeepSpeech2(sample_rate=1600, window_size=0.01,
    # rnn_hidden_size=32, vocab_len=29)  =>  spectrogram D = floor(16/2)+1 = 9,
    # rnn_input_size = 3 * 32 = 96.
    sample_rate, window_size = 1600, 0.01
    hidden, vocab = 32, 29
    D = int(math.floor(sample_rate * window_size / 2) + 1)                 # 9
    rin = int(math.floor(D + 2 * 20 - 41) / 2 + 1)                          # 5
    rin = int(math.floor(rin + 2 * 10 - 21) / 2 + 1)                        # 3
    rnn_input_size = rin * 32                                               # 96

    B, T = 2, 16
    x = jax.random.normal(jax.random.PRNGKey(0), (B, 1, D, T), dtype=jnp.float32)  # NCHW
    seq_len = jnp.array([16, 12], dtype=jnp.int32)

    params = init_params(jax.random.PRNGKey(1), hidden, vocab, rnn_input_size)
    prep = prepare_params(params, hidden, vocab)     # fold/pad/transpose once, outside jit

    fwd = jax.jit(functools.partial(deepspeech2_forward, vocab=vocab))
    out, out_lens = fwd(prep, x, seq_len)
    jax.block_until_ready(out)
    jax.block_until_ready(out_lens)

    assert out.shape == (B, 8, vocab), out.shape
    assert out_lens.shape == (B,), out_lens.shape
    print("KERNEL_OK")
</pallas_src>

<mosaic_0001>
module attributes {stable_mosaic.version = 11 : i64} {
  func.func @conv_bn_htanh_kernel(%arg0: i32, %arg1: memref<80x512xbf16, #tpu.memory_space<vmem>>, %arg2: memref<512x128xbf16, #tpu.memory_space<vmem>>, %arg3: memref<1x128xf32, #tpu.memory_space<vmem>>, %arg4: memref<1x128xf32, #tpu.memory_space<vmem>>, %arg5: memref<80x1xf32, #tpu.memory_space<vmem>>, %arg6: memref<80x128xbf16, #tpu.memory_space<vmem>>) attributes {dimension_semantics = [#tpu.dimension_semantics<parallel>], iteration_bounds = array<i64: 1>, scalar_prefetch = 0 : i64, scratch_operands = 0 : i64, tpu.core_type = #tpu.core_type<tc>, window_params = [{transform_indices = @transform_0, window_bounds = array<i64: 80, 512>}, {pipeline_mode = #tpu.pipeline_mode<synchronous>, transform_indices = @transform_1, window_bounds = array<i64: 512, 128>}, {pipeline_mode = #tpu.pipeline_mode<synchronous>, transform_indices = @transform_2, window_bounds = array<i64: 1, 128>}, {pipeline_mode = #tpu.pipeline_mode<synchronous>, transform_indices = @transform_3, window_bounds = array<i64: 1, 128>}, {transform_indices = @transform_4, window_bounds = array<i64: 80, 1>}, {transform_indices = @transform_5, window_bounds = array<i64: 80, 128>}]} {
    %c0 = arith.constant 0 : index
    %c0_0 = arith.constant 0 : index
    %0 = vector.load %arg1[%c0, %c0_0] : memref<80x512xbf16, #tpu.memory_space<vmem>>, vector<80x512xbf16>
    %c0_1 = arith.constant 0 : index
    %c0_2 = arith.constant 0 : index
    %1 = vector.load %arg2[%c0_1, %c0_2] : memref<512x128xbf16, #tpu.memory_space<vmem>>, vector<512x128xbf16>
    %cst = arith.constant dense<0.000000e+00> : vector<80x128xf32>
    %2 = tpu.matmul %0, %1, %cst {dimension_numbers = #tpu.dot_dimension_numbers<[1], [0], [0], [1], [0, 0, 1, 1], [], []>} : vector<80x512xbf16>, vector<512x128xbf16>, vector<80x128xf32> -> vector<80x128xf32>
    %c0_3 = arith.constant 0 : index
    %c0_4 = arith.constant 0 : index
    %3 = vector.load %arg3[%c0_3, %c0_4] : memref<1x128xf32, #tpu.memory_space<vmem>>, vector<1x128xf32>
    %4 = vector.broadcast %3 : vector<1x128xf32> to vector<80x128xf32>
    %5 = arith.mulf %2, %4 : vector<80x128xf32>
    %c0_5 = arith.constant 0 : index
    %c0_6 = arith.constant 0 : index
    %6 = vector.load %arg4[%c0_5, %c0_6] : memref<1x128xf32, #tpu.memory_space<vmem>>, vector<1x128xf32>
    %7 = vector.broadcast %6 : vector<1x128xf32> to vector<80x128xf32>
    %8 = arith.addf %5, %7 : vector<80x128xf32>
    %cst_7 = arith.constant 0.000000e+00 : f32
    %cst_8 = arith.constant 2.000000e+01 : f32
    %9 = vector.broadcast %cst_7 : f32 to vector<80x128xf32>
    %10 = arith.maximumf %9, %8 : vector<80x128xf32>
    %11 = vector.broadcast %cst_8 : f32 to vector<80x128xf32>
    %12 = arith.minimumf %11, %10 : vector<80x128xf32>
    %c0_9 = arith.constant 0 : index
    %c0_10 = arith.constant 0 : index
    %13 = vector.load %arg5[%c0_9, %c0_10] : memref<80x1xf32, #tpu.memory_space<vmem>>, vector<80x1xf32>
    %14 = vector.broadcast %13 : vector<80x1xf32> to vector<80x128xf32>
    %15 = arith.mulf %12, %14 : vector<80x128xf32>
    %16 = arith.truncf %15 : vector<80x128xf32> to vector<80x128xbf16>
    %c0_11 = arith.constant 0 : index
    %c0_12 = arith.constant 0 : index
    %17 = vector.load %arg6[%c0_11, %c0_12] : memref<80x128xbf16, #tpu.memory_space<vmem>>, vector<80x128xbf16>
    tpu.vector_store %arg6[%c0_11, %c0_12], %16 {strides = array<i32>} : memref<80x128xbf16, #tpu.memory_space<vmem>>, vector<80x128xbf16>,
    return
  }
  func.func @transform_0(%arg0: i32) -> (i32, i32) {
    %c0_i32 = arith.constant 0 : i32
    %c0_i32_0 = arith.constant 0 : i32
    return %arg0, %c0_i32 : i32, i32
  }
  func.func @transform_1(%arg0: i32) -> (i32, i32) {
    %c0_i32 = arith.constant 0 : i32
    %c0_i32_0 = arith.constant 0 : i32
    %c0_i32_1 = arith.constant 0 : i32
    return %c0_i32, %c0_i32_0 : i32, i32
  }
  func.func @transform_2(%arg0: i32) -> (i32, i32) {
    %c0_i32 = arith.constant 0 : i32
    %c0_i32_0 = arith.constant 0 : i32
    %c0_i32_1 = arith.constant 0 : i32
    return %c0_i32, %c0_i32_0 : i32, i32
  }
  func.func @transform_3(%arg0: i32) -> (i32, i32) {
    %c0_i32 = arith.constant 0 : i32
    %c0_i32_0 = arith.constant 0 : i32
    %c0_i32_1 = arith.constant 0 : i32
    return %c0_i32, %c0_i32_0 : i32, i32
  }
  func.func @transform_4(%arg0: i32) -> (i32, i32) {
    %c0_i32 = arith.constant 0 : i32
    %c0_i32_0 = arith.constant 0 : i32
    return %arg0, %c0_i32 : i32, i32
  }
  func.func @transform_5(%arg0: i32) -> (i32, i32) {
    %c0_i32 = arith.constant 0 : i32
    %c0_i32_0 = arith.constant 0 : i32
    return %arg0, %c0_i32 : i32, i32
  }
}

module attributes {stable_mosaic.version = 11 : i64} {
  func.func @conv_bn_htanh_kernel(%arg0: i32, %arg1: memref<48x7424xbf16, #tpu.memory_space<vmem>>, %arg2: memref<7424x128xbf16, #tpu.memory_space<vmem>>, %arg3: memref<1x128xf32, #tpu.memory_space<vmem>>, %arg4: memref<1x128xf32, #tpu.memory_space<vmem>>, %arg5: memref<48x1xf32, #tpu.memory_space<vmem>>, %arg6: memref<48x128xbf16, #tpu.memory_space<vmem>>) attributes {dimension_semantics = [#tpu.dimension_semantics<parallel>], iteration_bounds = array<i64: 1>, scalar_prefetch = 0 : i64, scratch_operands = 0 : i64, tpu.core_type = #tpu.core_type<tc>, window_params = [{transform_indices = @transform_0, window_bounds = array<i64: 48, 7424>}, {pipeline_mode = #tpu.pipeline_mode<synchronous>, transform_indices = @transform_1, window_bounds = array<i64: 7424, 128>}, {pipeline_mode = #tpu.pipeline_mode<synchronous>, transform_indices = @transform_2, window_bounds = array<i64: 1, 128>}, {pipeline_mode = #tpu.pipeline_mode<synchronous>, transform_indices = @transform_3, window_bounds = array<i64: 1, 128>}, {transform_indices = @transform_4, window_bounds = array<i64: 48, 1>}, {transform_indices = @transform_5, window_bounds = array<i64: 48, 128>}]} {
    %c0 = arith.constant 0 : index
    %c0_0 = arith.constant 0 : index
    %0 = vector.load %arg1[%c0, %c0_0] : memref<48x7424xbf16, #tpu.memory_space<vmem>>, vector<48x7424xbf16>
    %c0_1 = arith.constant 0 : index
    %c0_2 = arith.constant 0 : index
    %1 = vector.load %arg2[%c0_1, %c0_2] : memref<7424x128xbf16, #tpu.memory_space<vmem>>, vector<7424x128xbf16>
    %cst = arith.constant dense<0.000000e+00> : vector<48x128xf32>
    %2 = tpu.matmul %0, %1, %cst {dimension_numbers = #tpu.dot_dimension_numbers<[1], [0], [0], [1], [0, 0, 1, 1], [], []>} : vector<48x7424xbf16>, vector<7424x128xbf16>, vector<48x128xf32> -> vector<48x128xf32>
    %c0_3 = arith.constant 0 : index
    %c0_4 = arith.constant 0 : index
    %3 = vector.load %arg3[%c0_3, %c0_4] : memref<1x128xf32, #tpu.memory_space<vmem>>, vector<1x128xf32>
    %4 = vector.broadcast %3 : vector<1x128xf32> to vector<48x128xf32>
    %5 = arith.mulf %2, %4 : vector<48x128xf32>
    %c0_5 = arith.constant 0 : index
    %c0_6 = arith.constant 0 : index
    %6 = vector.load %arg4[%c0_5, %c0_6] : memref<1x128xf32, #tpu.memory_space<vmem>>, vector<1x128xf32>
    %7 = vector.broadcast %6 : vector<1x128xf32> to vector<48x128xf32>
    %8 = arith.addf %5, %7 : vector<48x128xf32>
    %cst_7 = arith.constant 0.000000e+00 : f32
    %cst_8 = arith.constant 2.000000e+01 : f32
    %9 = vector.broadcast %cst_7 : f32 to vector<48x128xf32>
    %10 = arith.maximumf %9, %8 : vector<48x128xf32>
    %11 = vector.broadcast %cst_8 : f32 to vector<48x128xf32>
    %12 = arith.minimumf %11, %10 : vector<48x128xf32>
    %c0_9 = arith.constant 0 : index
    %c0_10 = arith.constant 0 : index
    %13 = vector.load %arg5[%c0_9, %c0_10] : memref<48x1xf32, #tpu.memory_space<vmem>>, vector<48x1xf32>
    %14 = vector.broadcast %13 : vector<48x1xf32> to vector<48x128xf32>
    %15 = arith.mulf %12, %14 : vector<48x128xf32>
    %16 = arith.truncf %15 : vector<48x128xf32> to vector<48x128xbf16>
    %c0_11 = arith.constant 0 : index
    %c0_12 = arith.constant 0 : index
    %17 = vector.load %arg6[%c0_11, %c0_12] : memref<48x128xbf16, #tpu.memory_space<vmem>>, vector<48x128xbf16>
    tpu.vector_store %arg6[%c0_11, %c0_12], %16 {strides = array<i32>} : memref<48x128xbf16, #tpu.memory_space<vmem>>, vector<48x128xbf16>,
    return
  }
  func.func @transform_0(%arg0: i32) -> (i32, i32) {
    %c0_i32 = arith.constant 0 : i32
    %c0_i32_0 = arith.constant 0 : i32
    return %arg0, %c0_i32 : i32, i32
  }
  func.func @transform_1(%arg0: i32) -> (i32, i32) {
    %c0_i32 = arith.constant 0 : i32
    %c0_i32_0 = arith.constant 0 : i32
    %c0_i32_1 = arith.constant 0 : i32
    return %c0_i32, %c0_i32_0 : i32, i32
  }
  func.func @transform_2(%arg0: i32) -> (i32, i32) {
    %c0_i32 = arith.constant 0 : i32
    %c0_i32_0 = arith.constant 0 : i32
    %c0_i32_1 = arith.constant 0 : i32
    return %c0_i32, %c0_i32_0 : i32, i32
  }
  func.func @transform_3(%arg0: i32) -> (i32, i32) {
    %c0_i32 = arith.constant 0 : i32
    %c0_i32_0 = arith.constant 0 : i32
    %c0_i32_1 = arith.constant 0 : i32
    return %c0_i32, %c0_i32_0 : i32, i32
  }
  func.func @transform_4(%arg0: i32) -> (i32, i32) {
    %c0_i32 = arith.constant 0 : i32
    %c0_i32_0 = arith.constant 0 : i32
    return %arg0, %c0_i32 : i32, i32
  }
  func.func @transform_5(%arg0: i32) -> (i32, i32) {
    %c0_i32 = arith.constant 0 : i32
    %c0_i32_0 = arith.constant 0 : i32
    return %arg0, %c0_i32 : i32, i32
  }
}

module attributes {stable_mosaic.version = 11 : i64} {
  func.func @matmul_bias_kernel(%arg0: i32, %arg1: memref<16x128xbf16, #tpu.memory_space<vmem>>, %arg2: memref<128x768xbf16, #tpu.memory_space<vmem>>, %arg3: memref<1x768xf32, #tpu.memory_space<vmem>>, %arg4: memref<16x768xf32, #tpu.memory_space<vmem>>) attributes {dimension_semantics = [#tpu.dimension_semantics<parallel>], iteration_bounds = array<i64: 1>, scalar_prefetch = 0 : i64, scratch_operands = 0 : i64, tpu.core_type = #tpu.core_type<tc>, window_params = [{transform_indices = @transform_0, window_bounds = array<i64: 16, 128>}, {pipeline_mode = #tpu.pipeline_mode<synchronous>, transform_indices = @transform_1, window_bounds = array<i64: 128, 768>}, {pipeline_mode = #tpu.pipeline_mode<synchronous>, transform_indices = @transform_2, window_bounds = array<i64: 1, 768>}, {transform_indices = @transform_3, window_bounds = array<i64: 16, 768>}]} {
    %c0 = arith.constant 0 : index
    %c0_0 = arith.constant 0 : index
    %0 = vector.load %arg1[%c0, %c0_0] : memref<16x128xbf16, #tpu.memory_space<vmem>>, vector<16x128xbf16>
    %c0_1 = arith.constant 0 : index
    %c0_2 = arith.constant 0 : index
    %1 = vector.load %arg2[%c0_1, %c0_2] : memref<128x768xbf16, #tpu.memory_space<vmem>>, vector<128x768xbf16>
    %cst = arith.constant dense<0.000000e+00> : vector<16x768xf32>
    %2 = tpu.matmul %0, %1, %cst {dimension_numbers = #tpu.dot_dimension_numbers<[1], [0], [0], [1], [0, 0, 1, 1], [], []>} : vector<16x128xbf16>, vector<128x768xbf16>, vector<16x768xf32> -> vector<16x768xf32>
    %c0_3 = arith.constant 0 : index
    %c0_4 = arith.constant 0 : index
    %3 = vector.load %arg3[%c0_3, %c0_4] : memref<1x768xf32, #tpu.memory_space<vmem>>, vector<1x768xf32>
    %4 = vector.broadcast %3 : vector<1x768xf32> to vector<16x768xf32>
    %5 = arith.addf %2, %4 : vector<16x768xf32>
    %c0_5 = arith.constant 0 : index
    %c0_6 = arith.constant 0 : index
    %6 = vector.load %arg4[%c0_5, %c0_6] : memref<16x768xf32, #tpu.memory_space<vmem>>, vector<16x768xf32>
    tpu.vector_store %arg4[%c0_5, %c0_6], %5 {strides = array<i32>} : memref<16x768xf32, #tpu.memory_space<vmem>>, vector<16x768xf32>,
    return
  }
  func.func @transform_0(%arg0: i32) -> (i32, i32) {
    %c0_i32 = arith.constant 0 : i32
    %c0_i32_0 = arith.constant 0 : i32
    return %arg0, %c0_i32 : i32, i32
  }
  func.func @transform_1(%arg0: i32) -> (i32, i32) {
    %c0_i32 = arith.constant 0 : i32
    %c0_i32_0 = arith.constant 0 : i32
    %c0_i32_1 = arith.constant 0 : i32
    return %c0_i32, %c0_i32_0 : i32, i32
  }
  func.func @transform_2(%arg0: i32) -> (i32, i32) {
    %c0_i32 = arith.constant 0 : i32
    %c0_i32_0 = arith.constant 0 : i32
    %c0_i32_1 = arith.constant 0 : i32
    return %c0_i32, %c0_i32_0 : i32, i32
  }
  func.func @transform_3(%arg0: i32) -> (i32, i32) {
    %c0_i32 = arith.constant 0 : i32
    %c0_i32_0 = arith.constant 0 : i32
    return %arg0, %c0_i32 : i32, i32
  }
}

module attributes {stable_mosaic.version = 11 : i64} {
  func.func @gru_rec_kernel(%arg0: i32, %arg1: memref<2x8x384xf32, #tpu.memory_space<vmem>>, %arg2: memref<128x384xbf16, #tpu.memory_space<vmem>>, %arg3: memref<1x384xf32, #tpu.memory_space<vmem>>, %arg4: memref<2x8x128xf32, #tpu.memory_space<vmem>>, %arg5: memref<8x128xf32, #tpu.memory_space<vmem>>) attributes {dimension_semantics = [#tpu.dimension_semantics<parallel>], iteration_bounds = array<i64: 1>, scalar_prefetch = 0 : i64, scratch_operands = 1 : i64, tpu.core_type = #tpu.core_type<tc>, window_params = [{transform_indices = @transform_0, window_bounds = array<i64: 2, 8, 384>}, {pipeline_mode = #tpu.pipeline_mode<synchronous>, transform_indices = @transform_1, window_bounds = array<i64: 128, 384>}, {pipeline_mode = #tpu.pipeline_mode<synchronous>, transform_indices = @transform_2, window_bounds = array<i64: 1, 384>}, {transform_indices = @transform_3, window_bounds = array<i64: 2, 8, 128>}]} {
    %cst = arith.constant 0.000000e+00 : f32
    %0 = vector.broadcast %cst : f32 to vector<8x128xf32>
    %c0 = arith.constant 0 : index
    %c0_0 = arith.constant 0 : index
    %1 = vector.load %arg5[%c0, %c0_0] : memref<8x128xf32, #tpu.memory_space<vmem>>, vector<8x128xf32>
    tpu.vector_store %arg5[%c0, %c0_0], %0 {strides = array<i32>} : memref<8x128xf32, #tpu.memory_space<vmem>>, vector<8x128xf32>,
    %c0_i32 = arith.constant 0 : i32
    %2 = arith.index_cast %c0_i32 : i32 to index
    %c0_1 = arith.constant 0 : index
    %c0_2 = arith.constant 0 : index
    %3 = vector.load %arg1[%2, %c0_1, %c0_2] : memref<2x8x384xf32, #tpu.memory_space<vmem>>, vector<1x8x384xf32>
    %4 = vector.shape_cast %3 : vector<1x8x384xf32> to vector<8x384xf32>
    %c0_3 = arith.constant 0 : index
    %c0_4 = arith.constant 0 : index
    %5 = vector.load %arg5[%c0_3, %c0_4] : memref<8x128xf32, #tpu.memory_space<vmem>>, vector<8x128xf32>
    %6 = arith.truncf %5 : vector<8x128xf32> to vector<8x128xbf16>
    %c0_5 = arith.constant 0 : index
    %c0_6 = arith.constant 0 : index
    %7 = vector.load %arg2[%c0_5, %c0_6] : memref<128x384xbf16, #tpu.memory_space<vmem>>, vector<128x384xbf16>
    %cst_7 = arith.constant dense<0.000000e+00> : vector<8x384xf32>
    %8 = tpu.matmul %6, %7, %cst_7 {dimension_numbers = #tpu.dot_dimension_numbers<[1], [0], [0], [1], [0, 0, 1, 1], [], []>} : vector<8x128xbf16>, vector<128x384xbf16>, vector<8x384xf32> -> vector<8x384xf32>
    %c0_8 = arith.constant 0 : index
    %c0_9 = arith.constant 0 : index
    %9 = vector.load %arg3[%c0_8, %c0_9] : memref<1x384xf32, #tpu.memory_space<vmem>>, vector<1x384xf32>
    %10 = vector.broadcast %9 : vector<1x384xf32> to vector<8x384xf32>
    %11 = arith.addf %8, %10 : vector<8x384xf32>
    %12 = vector.extract_strided_slice %4 {offsets = [0, 0], sizes = [8, 128], strides = [1, 1]} : vector<8x384xf32> to vector<8x128xf32>
    %13 = vector.extract_strided_slice %11 {offsets = [0, 0], sizes = [8, 128], strides = [1, 1]} : vector<8x384xf32> to vector<8x128xf32>
    %14 = arith.addf %12, %13 : vector<8x128xf32>
    %15 = arith.negf %14 : vector<8x128xf32>
    %16 = math.exp %15 : vector<8x128xf32>
    %cst_10 = arith.constant 1.000000e+00 : f32
    %17 = vector.broadcast %cst_10 : f32 to vector<8x128xf32>
    %18 = arith.addf %17, %16 : vector<8x128xf32>
    %19 = arith.divf %17, %18 : vector<8x128xf32>
    %20 = vector.extract_strided_slice %4 {offsets = [0, 128], sizes = [8, 128], strides = [1, 1]} : vector<8x384xf32> to vector<8x128xf32>
    %21 = vector.extract_strided_slice %11 {offsets = [0, 128], sizes = [8, 128], strides = [1, 1]} : vector<8x384xf32> to vector<8x128xf32>
    %22 = arith.addf %20, %21 : vector<8x128xf32>
    %23 = arith.negf %22 : vector<8x128xf32>
    %24 = math.exp %23 : vector<8x128xf32>
    %cst_11 = arith.constant 1.000000e+00 : f32
    %25 = vector.broadcast %cst_11 : f32 to vector<8x128xf32>
    %26 = arith.addf %25, %24 : vector<8x128xf32>
    %27 = arith.divf %25, %26 : vector<8x128xf32>
    %28 = vector.extract_strided_slice %4 {offsets = [0, 256], sizes = [8, 128], strides = [1, 1]} : vector<8x384xf32> to vector<8x128xf32>
    %29 = vector.extract_strided_slice %11 {offsets = [0, 256], sizes = [8, 128], strides = [1, 1]} : vector<8x384xf32> to vector<8x128xf32>
    %30 = arith.mulf %19, %29 : vector<8x128xf32>
    %31 = arith.addf %28, %30 : vector<8x128xf32>
    %32 = math.tanh %31 : vector<8x128xf32>
    %cst_12 = arith.constant 1.000000e+00 : f32
    %33 = vector.broadcast %cst_12 : f32 to vector<8x128xf32>
    %34 = arith.subf %33, %27 : vector<8x128xf32>
    %35 = arith.mulf %34, %32 : vector<8x128xf32>
    %36 = arith.mulf %27, %5 : vector<8x128xf32>
    %37 = arith.addf %35, %36 : vector<8x128xf32>
    %c0_13 = arith.constant 0 : index
    %c0_14 = arith.constant 0 : index
    %38 = vector.load %arg5[%c0_13, %c0_14] : memref<8x128xf32, #tpu.memory_space<vmem>>, vector<8x128xf32>
    tpu.vector_store %arg5[%c0_13, %c0_14], %37 {strides = array<i32>} : memref<8x128xf32, #tpu.memory_space<vmem>>, vector<8x128xf32>,
    %39 = arith.index_cast %c0_i32 : i32 to index
    %c0_15 = arith.constant 0 : index
    %c0_16 = arith.constant 0 : index
    %40 = vector.load %arg4[%39, %c0_15, %c0_16] : memref<2x8x128xf32, #tpu.memory_space<vmem>>, vector<1x8x128xf32>
    %41 = vector.shape_cast %40 : vector<1x8x128xf32> to vector<8x128xf32>
    %42 = vector.shape_cast %37 : vector<8x128xf32> to vector<1x8x128xf32>
    tpu.vector_store %arg4[%39, %c0_15, %c0_16], %42 {strides = array<i32>} : memref<2x8x128xf32, #tpu.memory_space<vmem>>, vector<1x8x128xf32>,
    %c1_i32 = arith.constant 1 : i32
    %43 = arith.index_cast %c1_i32 : i32 to index
    %c0_17 = arith.constant 0 : index
    %c0_18 = arith.constant 0 : index
    %44 = vector.load %arg1[%43, %c0_17, %c0_18] : memref<2x8x384xf32, #tpu.memory_space<vmem>>, vector<1x8x384xf32>
    %45 = vector.shape_cast %44 : vector<1x8x384xf32> to vector<8x384xf32>
    %c0_19 = arith.constant 0 : index
    %c0_20 = arith.constant 0 : index
    %46 = vector.load %arg5[%c0_19, %c0_20] : memref<8x128xf32, #tpu.memory_space<vmem>>, vector<8x128xf32>
    %47 = arith.truncf %46 : vector<8x128xf32> to vector<8x128xbf16>
    %c0_21 = arith.constant 0 : index
    %c0_22 = arith.constant 0 : index
    %48 = vector.load %arg2[%c0_21, %c0_22] : memref<128x384xbf16, #tpu.memory_space<vmem>>, vector<128x384xbf16>
    %cst_23 = arith.constant dense<0.000000e+00> : vector<8x384xf32>
    %49 = tpu.matmul %47, %48, %cst_23 {dimension_numbers = #tpu.dot_dimension_numbers<[1], [0], [0], [1], [0, 0, 1, 1], [], []>} : vector<8x128xbf16>, vector<128x384xbf16>, vector<8x384xf32> -> vector<8x384xf32>
    %c0_24 = arith.constant 0 : index
    %c0_25 = arith.constant 0 : index
    %50 = vector.load %arg3[%c0_24, %c0_25] : memref<1x384xf32, #tpu.memory_space<vmem>>, vector<1x384xf32>
    %51 = vector.broadcast %50 : vector<1x384xf32> to vector<8x384xf32>
    %52 = arith.addf %49, %51 : vector<8x384xf32>
    %53 = vector.extract_strided_slice %45 {offsets = [0, 0], sizes = [8, 128], strides = [1, 1]} : vector<8x384xf32> to vector<8x128xf32>
    %54 = vector.extract_strided_slice %52 {offsets = [0, 0], sizes = [8, 128], strides = [1, 1]} : vector<8x384xf32> to vector<8x128xf32>
    %55 = arith.addf %53, %54 : vector<8x128xf32>
    %56 = arith.negf %55 : vector<8x128xf32>
    %57 = math.exp %56 : vector<8x128xf32>
    %cst_26 = arith.constant 1.000000e+00 : f32
    %58 = vector.broadcast %cst_26 : f32 to vector<8x128xf32>
    %59 = arith.addf %58, %57 : vector<8x128xf32>
    %60 = arith.divf %58, %59 : vector<8x128xf32>
    %61 = vector.extract_strided_slice %45 {offsets = [0, 128], sizes = [8, 128], strides = [1, 1]} : vector<8x384xf32> to vector<8x128xf32>
    %62 = vector.extract_strided_slice %52 {offsets = [0, 128], sizes = [8, 128], strides = [1, 1]} : vector<8x384xf32> to vector<8x128xf32>
    %63 = arith.addf %61, %62 : vector<8x128xf32>
    %64 = arith.negf %63 : vector<8x128xf32>
    %65 = math.exp %64 : vector<8x128xf32>
    %cst_27 = arith.constant 1.000000e+00 : f32
    %66 = vector.broadcast %cst_27 : f32 to vector<8x128xf32>
    %67 = arith.addf %66, %65 : vector<8x128xf32>
    %68 = arith.divf %66, %67 : vector<8x128xf32>
    %69 = vector.extract_strided_slice %45 {offsets = [0, 256], sizes = [8, 128], strides = [1, 1]} : vector<8x384xf32> to vector<8x128xf32>
    %70 = vector.extract_strided_slice %52 {offsets = [0, 256], sizes = [8, 128], strides = [1, 1]} : vector<8x384xf32> to vector<8x128xf32>
    %71 = arith.mulf %60, %70 : vector<8x128xf32>
    %72 = arith.addf %69, %71 : vector<8x128xf32>
    %73 = math.tanh %72 : vector<8x128xf32>
    %cst_28 = arith.constant 1.000000e+00 : f32
    %74 = vector.broadcast %cst_28 : f32 to vector<8x128xf32>
    %75 = arith.subf %74, %68 : vector<8x128xf32>
    %76 = arith.mulf %75, %73 : vector<8x128xf32>
    %77 = arith.mulf %68, %46 : vector<8x128xf32>
    %78 = arith.addf %76, %77 : vector<8x128xf32>
    %c0_29 = arith.constant 0 : index
    %c0_30 = arith.constant 0 : index
    %79 = vector.load %arg5[%c0_29, %c0_30] : memref<8x128xf32, #tpu.memory_space<vmem>>, vector<8x128xf32>
    tpu.vector_store %arg5[%c0_29, %c0_30], %78 {strides = array<i32>} : memref<8x128xf32, #tpu.memory_space<vmem>>, vector<8x128xf32>,
    %80 = arith.index_cast %c1_i32 : i32 to index
    %c0_31 = arith.constant 0 : index
    %c0_32 = arith.constant 0 : index
    %81 = vector.load %arg4[%80, %c0_31, %c0_32] : memref<2x8x128xf32, #tpu.memory_space<vmem>>, vector<1x8x128xf32>
    %82 = vector.shape_cast %81 : vector<1x8x128xf32> to vector<8x128xf32>
    %83 = vector.shape_cast %78 : vector<8x128xf32> to vector<1x8x128xf32>
    tpu.vector_store %arg4[%80, %c0_31, %c0_32], %83 {strides = array<i32>} : memref<2x8x128xf32, #tpu.memory_space<vmem>>, vector<1x8x128xf32>,
    %c2_i32 = arith.constant 2 : i32
    return
  }
  func.func @transform_0(%arg0: i32) -> (i32, i32, i32) {
    %c0_i32 = arith.constant 0 : i32
    %c0_i32_0 = arith.constant 0 : i32
    %c0_i32_1 = arith.constant 0 : i32
    return %c0_i32, %arg0, %c0_i32_0 : i32, i32, i32
  }
  func.func @transform_1(%arg0: i32) -> (i32, i32) {
    %c0_i32 = arith.constant 0 : i32
    %c0_i32_0 = arith.constant 0 : i32
    %c0_i32_1 = arith.constant 0 : i32
    return %c0_i32, %c0_i32_0 : i32, i32
  }
  func.func @transform_2(%arg0: i32) -> (i32, i32) {
    %c0_i32 = arith.constant 0 : i32
    %c0_i32_0 = arith.constant 0 : i32
    %c0_i32_1 = arith.constant 0 : i32
    return %c0_i32, %c0_i32_0 : i32, i32
  }
  func.func @transform_3(%arg0: i32) -> (i32, i32, i32) {
    %c0_i32 = arith.constant 0 : i32
    %c0_i32_0 = arith.constant 0 : i32
    %c0_i32_1 = arith.constant 0 : i32
    return %c0_i32, %arg0, %c0_i32_0 : i32, i32, i32
  }
}

module attributes {stable_mosaic.version = 11 : i64} {
  func.func @gru_rec_kernel(%arg0: i32, %arg1: memref<2x8x384xf32, #tpu.memory_space<vmem>>, %arg2: memref<128x384xbf16, #tpu.memory_space<vmem>>, %arg3: memref<1x384xf32, #tpu.memory_space<vmem>>, %arg4: memref<2x8x128xf32, #tpu.memory_space<vmem>>, %arg5: memref<8x128xf32, #tpu.memory_space<vmem>>) attributes {dimension_semantics = [#tpu.dimension_semantics<parallel>], iteration_bounds = array<i64: 1>, scalar_prefetch = 0 : i64, scratch_operands = 1 : i64, tpu.core_type = #tpu.core_type<tc>, window_params = [{transform_indices = @transform_0, window_bounds = array<i64: 2, 8, 384>}, {pipeline_mode = #tpu.pipeline_mode<synchronous>, transform_indices = @transform_1, window_bounds = array<i64: 128, 384>}, {pipeline_mode = #tpu.pipeline_mode<synchronous>, transform_indices = @transform_2, window_bounds = array<i64: 1, 384>}, {transform_indices = @transform_3, window_bounds = array<i64: 2, 8, 128>}]} {
    %cst = arith.constant 0.000000e+00 : f32
    %0 = vector.broadcast %cst : f32 to vector<8x128xf32>
    %c0 = arith.constant 0 : index
    %c0_0 = arith.constant 0 : index
    %1 = vector.load %arg5[%c0, %c0_0] : memref<8x128xf32, #tpu.memory_space<vmem>>, vector<8x128xf32>
    tpu.vector_store %arg5[%c0, %c0_0], %0 {strides = array<i32>} : memref<8x128xf32, #tpu.memory_space<vmem>>, vector<8x128xf32>,
    %c0_i32 = arith.constant 0 : i32
    %c1_i32 = arith.constant 1 : i32
    %2 = arith.subi %c1_i32, %c0_i32 : i32
    %3 = arith.index_cast %2 : i32 to index
    %c0_1 = arith.constant 0 : index
    %c0_2 = arith.constant 0 : index
    %4 = vector.load %arg1[%3, %c0_1, %c0_2] : memref<2x8x384xf32, #tpu.memory_space<vmem>>, vector<1x8x384xf32>
    %5 = vector.shape_cast %4 : vector<1x8x384xf32> to vector<8x384xf32>
    %c0_3 = arith.constant 0 : index
    %c0_4 = arith.constant 0 : index
    %6 = vector.load %arg5[%c0_3, %c0_4] : memref<8x128xf32, #tpu.memory_space<vmem>>, vector<8x128xf32>
    %7 = arith.truncf %6 : vector<8x128xf32> to vector<8x128xbf16>
    %c0_5 = arith.constant 0 : index
    %c0_6 = arith.constant 0 : index
    %8 = vector.load %arg2[%c0_5, %c0_6] : memref<128x384xbf16, #tpu.memory_space<vmem>>, vector<128x384xbf16>
    %cst_7 = arith.constant dense<0.000000e+00> : vector<8x384xf32>
    %9 = tpu.matmul %7, %8, %cst_7 {dimension_numbers = #tpu.dot_dimension_numbers<[1], [0], [0], [1], [0, 0, 1, 1], [], []>} : vector<8x128xbf16>, vector<128x384xbf16>, vector<8x384xf32> -> vector<8x384xf32>
    %c0_8 = arith.constant 0 : index
    %c0_9 = arith.constant 0 : index
    %10 = vector.load %arg3[%c0_8, %c0_9] : memref<1x384xf32, #tpu.memory_space<vmem>>, vector<1x384xf32>
    %11 = vector.broadcast %10 : vector<1x384xf32> to vector<8x384xf32>
    %12 = arith.addf %9, %11 : vector<8x384xf32>
    %13 = vector.extract_strided_slice %5 {offsets = [0, 0], sizes = [8, 128], strides = [1, 1]} : vector<8x384xf32> to vector<8x128xf32>
    %14 = vector.extract_strided_slice %12 {offsets = [0, 0], sizes = [8, 128], strides = [1, 1]} : vector<8x384xf32> to vector<8x128xf32>
    %15 = arith.addf %13, %14 : vector<8x128xf32>
    %16 = arith.negf %15 : vector<8x128xf32>
    %17 = math.exp %16 : vector<8x128xf32>
    %cst_10 = arith.constant 1.000000e+00 : f32
    %18 = vector.broadcast %cst_10 : f32 to vector<8x128xf32>
    %19 = arith.addf %18, %17 : vector<8x128xf32>
    %20 = arith.divf %18, %19 : vector<8x128xf32>
    %21 = vector.extract_strided_slice %5 {offsets = [0, 128], sizes = [8, 128], strides = [1, 1]} : vector<8x384xf32> to vector<8x128xf32>
    %22 = vector.extract_strided_slice %12 {offsets = [0, 128], sizes = [8, 128], strides = [1, 1]} : vector<8x384xf32> to vector<8x128xf32>
    %23 = arith.addf %21, %22 : vector<8x128xf32>
    %24 = arith.negf %23 : vector<8x128xf32>
    %25 = math.exp %24 : vector<8x128xf32>
    %cst_11 = arith.constant 1.000000e+00 : f32
    %26 = vector.broadcast %cst_11 : f32 to vector<8x128xf32>
    %27 = arith.addf %26, %25 : vector<8x128xf32>
    %28 = arith.divf %26, %27 : vector<8x128xf32>
    %29 = vector.extract_strided_slice %5 {offsets = [0, 256], sizes = [8, 128], strides = [1, 1]} : vector<8x384xf32> to vector<8x128xf32>
    %30 = vector.extract_strided_slice %12 {offsets = [0, 256], sizes = [8, 128], strides = [1, 1]} : vector<8x384xf32> to vector<8x128xf32>
    %31 = arith.mulf %20, %30 : vector<8x128xf32>
    %32 = arith.addf %29, %31 : vector<8x128xf32>
    %33 = math.tanh %32 : vector<8x128xf32>
    %cst_12 = arith.constant 1.000000e+00 : f32
    %34 = vector.broadcast %cst_12 : f32 to vector<8x128xf32>
    %35 = arith.subf %34, %28 : vector<8x128xf32>
    %36 = arith.mulf %35, %33 : vector<8x128xf32>
    %37 = arith.mulf %28, %6 : vector<8x128xf32>
    %38 = arith.addf %36, %37 : vector<8x128xf32>
    %c0_13 = arith.constant 0 : index
    %c0_14 = arith.constant 0 : index
    %39 = vector.load %arg5[%c0_13, %c0_14] : memref<8x128xf32, #tpu.memory_space<vmem>>, vector<8x128xf32>
    tpu.vector_store %arg5[%c0_13, %c0_14], %38 {strides = array<i32>} : memref<8x128xf32, #tpu.memory_space<vmem>>, vector<8x128xf32>,
    %40 = arith.index_cast %2 : i32 to index
    %c0_15 = arith.constant 0 : index
    %c0_16 = arith.constant 0 : index
    %41 = vector.load %arg4[%40, %c0_15, %c0_16] : memref<2x8x128xf32, #tpu.memory_space<vmem>>, vector<1x8x128xf32>
    %42 = vector.shape_cast %41 : vector<1x8x128xf32> to vector<8x128xf32>
    %43 = vector.shape_cast %38 : vector<8x128xf32> to vector<1x8x128xf32>
    tpu.vector_store %arg4[%40, %c0_15, %c0_16], %43 {strides = array<i32>} : memref<2x8x128xf32, #tpu.memory_space<vmem>>, vector<1x8x128xf32>,
    %c1_i32_17 = arith.constant 1 : i32
    %c1_i32_18 = arith.constant 1 : i32
    %44 = arith.subi %c1_i32_18, %c1_i32_17 : i32
    %45 = arith.index_cast %44 : i32 to index
    %c0_19 = arith.constant 0 : index
    %c0_20 = arith.constant 0 : index
    %46 = vector.load %arg1[%45, %c0_19, %c0_20] : memref<2x8x384xf32, #tpu.memory_space<vmem>>, vector<1x8x384xf32>
    %47 = vector.shape_cast %46 : vector<1x8x384xf32> to vector<8x384xf32>
    %c0_21 = arith.constant 0 : index
    %c0_22 = arith.constant 0 : index
    %48 = vector.load %arg5[%c0_21, %c0_22] : memref<8x128xf32, #tpu.memory_space<vmem>>, vector<8x128xf32>
    %49 = arith.truncf %48 : vector<8x128xf32> to vector<8x128xbf16>
    %c0_23 = arith.constant 0 : index
    %c0_24 = arith.constant 0 : index
    %50 = vector.load %arg2[%c0_23, %c0_24] : memref<128x384xbf16, #tpu.memory_space<vmem>>, vector<128x384xbf16>
    %cst_25 = arith.constant dense<0.000000e+00> : vector<8x384xf32>
    %51 = tpu.matmul %49, %50, %cst_25 {dimension_numbers = #tpu.dot_dimension_numbers<[1], [0], [0], [1], [0, 0, 1, 1], [], []>} : vector<8x128xbf16>, vector<128x384xbf16>, vector<8x384xf32> -> vector<8x384xf32>
    %c0_26 = arith.constant 0 : index
    %c0_27 = arith.constant 0 : index
    %52 = vector.load %arg3[%c0_26, %c0_27] : memref<1x384xf32, #tpu.memory_space<vmem>>, vector<1x384xf32>
    %53 = vector.broadcast %52 : vector<1x384xf32> to vector<8x384xf32>
    %54 = arith.addf %51, %53 : vector<8x384xf32>
    %55 = vector.extract_strided_slice %47 {offsets = [0, 0], sizes = [8, 128], strides = [1, 1]} : vector<8x384xf32> to vector<8x128xf32>
    %56 = vector.extract_strided_slice %54 {offsets = [0, 0], sizes = [8, 128], strides = [1, 1]} : vector<8x384xf32> to vector<8x128xf32>
    %57 = arith.addf %55, %56 : vector<8x128xf32>
    %58 = arith.negf %57 : vector<8x128xf32>
    %59 = math.exp %58 : vector<8x128xf32>
    %cst_28 = arith.constant 1.000000e+00 : f32
    %60 = vector.broadcast %cst_28 : f32 to vector<8x128xf32>
    %61 = arith.addf %60, %59 : vector<8x128xf32>
    %62 = arith.divf %60, %61 : vector<8x128xf32>
    %63 = vector.extract_strided_slice %47 {offsets = [0, 128], sizes = [8, 128], strides = [1, 1]} : vector<8x384xf32> to vector<8x128xf32>
    %64 = vector.extract_strided_slice %54 {offsets = [0, 128], sizes = [8, 128], strides = [1, 1]} : vector<8x384xf32> to vector<8x128xf32>
    %65 = arith.addf %63, %64 : vector<8x128xf32>
    %66 = arith.negf %65 : vector<8x128xf32>
    %67 = math.exp %66 : vector<8x128xf32>
    %cst_29 = arith.constant 1.000000e+00 : f32
    %68 = vector.broadcast %cst_29 : f32 to vector<8x128xf32>
    %69 = arith.addf %68, %67 : vector<8x128xf32>
    %70 = arith.divf %68, %69 : vector<8x128xf32>
    %71 = vector.extract_strided_slice %47 {offsets = [0, 256], sizes = [8, 128], strides = [1, 1]} : vector<8x384xf32> to vector<8x128xf32>
    %72 = vector.extract_strided_slice %54 {offsets = [0, 256], sizes = [8, 128], strides = [1, 1]} : vector<8x384xf32> to vector<8x128xf32>
    %73 = arith.mulf %62, %72 : vector<8x128xf32>
    %74 = arith.addf %71, %73 : vector<8x128xf32>
    %75 = math.tanh %74 : vector<8x128xf32>
    %cst_30 = arith.constant 1.000000e+00 : f32
    %76 = vector.broadcast %cst_30 : f32 to vector<8x128xf32>
    %77 = arith.subf %76, %70 : vector<8x128xf32>
    %78 = arith.mulf %77, %75 : vector<8x128xf32>
    %79 = arith.mulf %70, %48 : vector<8x128xf32>
    %80 = arith.addf %78, %79 : vector<8x128xf32>
    %c0_31 = arith.constant 0 : index
    %c0_32 = arith.constant 0 : index
    %81 = vector.load %arg5[%c0_31, %c0_32] : memref<8x128xf32, #tpu.memory_space<vmem>>, vector<8x128xf32>
    tpu.vector_store %arg5[%c0_31, %c0_32], %80 {strides = array<i32>} : memref<8x128xf32, #tpu.memory_space<vmem>>, vector<8x128xf32>,
    %82 = arith.index_cast %44 : i32 to index
    %c0_33 = arith.constant 0 : index
    %c0_34 = arith.constant 0 : index
    %83 = vector.load %arg4[%82, %c0_33, %c0_34] : memref<2x8x128xf32, #tpu.memory_space<vmem>>, vector<1x8x128xf32>
    %84 = vector.shape_cast %83 : vector<1x8x128xf32> to vector<8x128xf32>
    %85 = vector.shape_cast %80 : vector<8x128xf32> to vector<1x8x128xf32>
    tpu.vector_store %arg4[%82, %c0_33, %c0_34], %85 {strides = array<i32>} : memref<2x8x128xf32, #tpu.memory_space<vmem>>, vector<1x8x128xf32>,
    %c2_i32 = arith.constant 2 : i32
    return
  }
  func.func @transform_0(%arg0: i32) -> (i32, i32, i32) {
    %c0_i32 = arith.constant 0 : i32
    %c0_i32_0 = arith.constant 0 : i32
    %c0_i32_1 = arith.constant 0 : i32
    return %c0_i32, %arg0, %c0_i32_0 : i32, i32, i32
  }
  func.func @transform_1(%arg0: i32) -> (i32, i32) {
    %c0_i32 = arith.constant 0 : i32
    %c0_i32_0 = arith.constant 0 : i32
    %c0_i32_1 = arith.constant 0 : i32
    return %c0_i32, %c0_i32_0 : i32, i32
  }
  func.func @transform_2(%arg0: i32) -> (i32, i32) {
    %c0_i32 = arith.constant 0 : i32
    %c0_i32_0 = arith.constant 0 : i32
    %c0_i32_1 = arith.constant 0 : i32
    return %c0_i32, %c0_i32_0 : i32, i32
  }
  func.func @transform_3(%arg0: i32) -> (i32, i32, i32) {
    %c0_i32 = arith.constant 0 : i32
    %c0_i32_0 = arith.constant 0 : i32
    %c0_i32_1 = arith.constant 0 : i32
    return %c0_i32, %arg0, %c0_i32_0 : i32, i32, i32
  }
}

module attributes {stable_mosaic.version = 11 : i64} {
  func.func @matmul_bias_kernel(%arg0: i32, %arg1: memref<16x256xf32, #tpu.memory_space<vmem>>, %arg2: memref<256x768xbf16, #tpu.memory_space<vmem>>, %arg3: memref<1x768xf32, #tpu.memory_space<vmem>>, %arg4: memref<16x768xf32, #tpu.memory_space<vmem>>) attributes {dimension_semantics = [#tpu.dimension_semantics<parallel>], iteration_bounds = array<i64: 1>, scalar_prefetch = 0 : i64, scratch_operands = 0 : i64, tpu.core_type = #tpu.core_type<tc>, window_params = [{transform_indices = @transform_0, window_bounds = array<i64: 16, 256>}, {pipeline_mode = #tpu.pipeline_mode<synchronous>, transform_indices = @transform_1, window_bounds = array<i64: 256, 768>}, {pipeline_mode = #tpu.pipeline_mode<synchronous>, transform_indices = @transform_2, window_bounds = array<i64: 1, 768>}, {transform_indices = @transform_3, window_bounds = array<i64: 16, 768>}]} {
    %c0 = arith.constant 0 : index
    %c0_0 = arith.constant 0 : index
    %0 = vector.load %arg1[%c0, %c0_0] : memref<16x256xf32, #tpu.memory_space<vmem>>, vector<16x256xf32>
    %1 = arith.truncf %0 : vector<16x256xf32> to vector<16x256xbf16>
    %c0_1 = arith.constant 0 : index
    %c0_2 = arith.constant 0 : index
    %2 = vector.load %arg2[%c0_1, %c0_2] : memref<256x768xbf16, #tpu.memory_space<vmem>>, vector<256x768xbf16>
    %cst = arith.constant dense<0.000000e+00> : vector<16x768xf32>
    %3 = tpu.matmul %1, %2, %cst {dimension_numbers = #tpu.dot_dimension_numbers<[1], [0], [0], [1], [0, 0, 1, 1], [], []>} : vector<16x256xbf16>, vector<256x768xbf16>, vector<16x768xf32> -> vector<16x768xf32>
    %c0_3 = arith.constant 0 : index
    %c0_4 = arith.constant 0 : index
    %4 = vector.load %arg3[%c0_3, %c0_4] : memref<1x768xf32, #tpu.memory_space<vmem>>, vector<1x768xf32>
    %5 = vector.broadcast %4 : vector<1x768xf32> to vector<16x768xf32>
    %6 = arith.addf %3, %5 : vector<16x768xf32>
    %c0_5 = arith.constant 0 : index
    %c0_6 = arith.constant 0 : index
    %7 = vector.load %arg4[%c0_5, %c0_6] : memref<16x768xf32, #tpu.memory_space<vmem>>, vector<16x768xf32>
    tpu.vector_store %arg4[%c0_5, %c0_6], %6 {strides = array<i32>} : memref<16x768xf32, #tpu.memory_space<vmem>>, vector<16x768xf32>,
    return
  }
  func.func @transform_0(%arg0: i32) -> (i32, i32) {
    %c0_i32 = arith.constant 0 : i32
    %c0_i32_0 = arith.constant 0 : i32
    return %arg0, %c0_i32 : i32, i32
  }
  func.func @transform_1(%arg0: i32) -> (i32, i32) {
    %c0_i32 = arith.constant 0 : i32
    %c0_i32_0 = arith.constant 0 : i32
    %c0_i32_1 = arith.constant 0 : i32
    return %c0_i32, %c0_i32_0 : i32, i32
  }
  func.func @transform_2(%arg0: i32) -> (i32, i32) {
    %c0_i32 = arith.constant 0 : i32
    %c0_i32_0 = arith.constant 0 : i32
    %c0_i32_1 = arith.constant 0 : i32
    return %c0_i32, %c0_i32_0 : i32, i32
  }
  func.func @transform_3(%arg0: i32) -> (i32, i32) {
    %c0_i32 = arith.constant 0 : i32
    %c0_i32_0 = arith.constant 0 : i32
    return %arg0, %c0_i32 : i32, i32
  }
}

module attributes {stable_mosaic.version = 11 : i64} {
  func.func @fc_logsoftmax_kernel(%arg0: i32, %arg1: memref<16x256xf32, #tpu.memory_space<vmem>>, %arg2: memref<1x256xf32, #tpu.memory_space<vmem>>, %arg3: memref<1x256xf32, #tpu.memory_space<vmem>>, %arg4: memref<256x128xbf16, #tpu.memory_space<vmem>>, %arg5: memref<1x128xf32, #tpu.memory_space<vmem>>, %arg6: memref<16x128xf32, #tpu.memory_space<vmem>>) attributes {dimension_semantics = [#tpu.dimension_semantics<parallel>], iteration_bounds = array<i64: 1>, scalar_prefetch = 0 : i64, scratch_operands = 0 : i64, tpu.core_type = #tpu.core_type<tc>, window_params = [{transform_indices = @transform_0, window_bounds = array<i64: 16, 256>}, {pipeline_mode = #tpu.pipeline_mode<synchronous>, transform_indices = @transform_1, window_bounds = array<i64: 1, 256>}, {pipeline_mode = #tpu.pipeline_mode<synchronous>, transform_indices = @transform_2, window_bounds = array<i64: 1, 256>}, {pipeline_mode = #tpu.pipeline_mode<synchronous>, transform_indices = @transform_3, window_bounds = array<i64: 256, 128>}, {pipeline_mode = #tpu.pipeline_mode<synchronous>, transform_indices = @transform_4, window_bounds = array<i64: 1, 128>}, {transform_indices = @transform_5, window_bounds = array<i64: 16, 128>}]} {
    %c0 = arith.constant 0 : index
    %c0_0 = arith.constant 0 : index
    %0 = vector.load %arg1[%c0, %c0_0] : memref<16x256xf32, #tpu.memory_space<vmem>>, vector<16x256xf32>
    %c0_1 = arith.constant 0 : index
    %c0_2 = arith.constant 0 : index
    %1 = vector.load %arg2[%c0_1, %c0_2] : memref<1x256xf32, #tpu.memory_space<vmem>>, vector<1x256xf32>
    %2 = vector.broadcast %1 : vector<1x256xf32> to vector<16x256xf32>
    %3 = arith.mulf %0, %2 : vector<16x256xf32>
    %c0_3 = arith.constant 0 : index
    %c0_4 = arith.constant 0 : index
    %4 = vector.load %arg3[%c0_3, %c0_4] : memref<1x256xf32, #tpu.memory_space<vmem>>, vector<1x256xf32>
    %5 = vector.broadcast %4 : vector<1x256xf32> to vector<16x256xf32>
    %6 = arith.addf %3, %5 : vector<16x256xf32>
    %7 = arith.truncf %6 : vector<16x256xf32> to vector<16x256xbf16>
    %c0_5 = arith.constant 0 : index
    %c0_6 = arith.constant 0 : index
    %8 = vector.load %arg4[%c0_5, %c0_6] : memref<256x128xbf16, #tpu.memory_space<vmem>>, vector<256x128xbf16>
    %cst = arith.constant dense<0.000000e+00> : vector<16x128xf32>
    %9 = tpu.matmul %7, %8, %cst {dimension_numbers = #tpu.dot_dimension_numbers<[1], [0], [0], [1], [0, 0, 1, 1], [], []>} : vector<16x256xbf16>, vector<256x128xbf16>, vector<16x128xf32> -> vector<16x128xf32>
    %c0_7 = arith.constant 0 : index
    %c0_8 = arith.constant 0 : index
    %10 = vector.load %arg5[%c0_7, %c0_8] : memref<1x128xf32, #tpu.memory_space<vmem>>, vector<1x128xf32>
    %11 = vector.broadcast %10 : vector<1x128xf32> to vector<16x128xf32>
    %12 = arith.addf %9, %11 : vector<16x128xf32>
    %cst_9 = arith.constant dense<0xFF800000> : vector<16xf32>
    %13 = vector.multi_reduction <maximumf>, %12, %cst_9 [1] : vector<16x128xf32> to vector<16xf32>
    %14 = vector.shape_cast %13 : vector<16xf32> to vector<16x1xf32>
    %15 = vector.broadcast %14 : vector<16x1xf32> to vector<16x128xf32>
    %16 = arith.subf %12, %15 : vector<16x128xf32>
    %17 = math.exp %16 : vector<16x128xf32>
    %cst_10 = arith.constant dense<0.000000e+00> : vector<16xf32>
    %18 = vector.multi_reduction <add>, %17, %cst_10 [1] : vector<16x128xf32> to vector<16xf32>
    %19 = vector.shape_cast %18 : vector<16xf32> to vector<16x1xf32>
    %20 = math.log %19 : vector<16x1xf32>
    %21 = arith.addf %14, %20 : vector<16x1xf32>
    %22 = vector.broadcast %21 : vector<16x1xf32> to vector<16x128xf32>
    %23 = arith.subf %12, %22 : vector<16x128xf32>
    %c0_11 = arith.constant 0 : index
    %c0_12 = arith.constant 0 : index
    %24 = vector.load %arg6[%c0_11, %c0_12] : memref<16x128xf32, #tpu.memory_space<vmem>>, vector<16x128xf32>
    tpu.vector_store %arg6[%c0_11, %c0_12], %23 {strides = array<i32>} : memref<16x128xf32, #tpu.memory_space<vmem>>, vector<16x128xf32>,
    return
  }
  func.func @transform_0(%arg0: i32) -> (i32, i32) {
    %c0_i32 = arith.constant 0 : i32
    %c0_i32_0 = arith.constant 0 : i32
    return %arg0, %c0_i32 : i32, i32
  }
  func.func @transform_1(%arg0: i32) -> (i32, i32) {
    %c0_i32 = arith.constant 0 : i32
    %c0_i32_0 = arith.constant 0 : i32
    %c0_i32_1 = arith.constant 0 : i32
    return %c0_i32, %c0_i32_0 : i32, i32
  }
  func.func @transform_2(%arg0: i32) -> (i32, i32) {
    %c0_i32 = arith.constant 0 : i32
    %c0_i32_0 = arith.constant 0 : i32
    %c0_i32_1 = arith.constant 0 : i32
    return %c0_i32, %c0_i32_0 : i32, i32
  }
  func.func @transform_3(%arg0: i32) -> (i32, i32) {
    %c0_i32 = arith.constant 0 : i32
    %c0_i32_0 = arith.constant 0 : i32
    %c0_i32_1 = arith.constant 0 : i32
    return %c0_i32, %c0_i32_0 : i32, i32
  }
  func.func @transform_4(%arg0: i32) -> (i32, i32) {
    %c0_i32 = arith.constant 0 : i32
    %c0_i32_0 = arith.constant 0 : i32
    %c0_i32_1 = arith.constant 0 : i32
    return %c0_i32, %c0_i32_0 : i32, i32
  }
  func.func @transform_5(%arg0: i32) -> (i32, i32) {
    %c0_i32 = arith.constant 0 : i32
    %c0_i32_0 = arith.constant 0 : i32
    return %arg0, %c0_i32 : i32, i32
  }
}

</mosaic_0001>

<bundles_post_ra>
// kernel: deepspeech2_forward.18
= control target key start
LH: loop header
LB: loop body
LE: loop exit
PB: predicated region body
PF: predicated region fallthrough
CT: control target
= control target key end

     0   :  { %v981_v1 = vmov 0   ;;  %s1243_s1 = inlined_call_operand.vmem [shape: bf16[512,128], index: 1, kind: input, shape index: {}]   ;;  %s1244_s0 = inlined_call_operand.vmem [shape: bf16[80,512], index: 0, kind: input, shape index: {}]   ;;  %s1245_s4 = inlined_call_operand.vmem [shape: f32[80,1], index: 4, kind: input, shape index: {}]   ;;  %s1246_s2 = inlined_call_operand.vmem [shape: f32[1,128], index: 2, kind: input, shape index: {}]   ;;  %s1247_s3 = inlined_call_operand.vmem [shape: f32[1,128], index: 3, kind: input, shape index: {}]   ;;  %s1248_s5 = inlined_call_operand.vmem [shape: bf16[80,128], index: 5, kind: output, shape index: {}]  }
   0x1   :  { %v919_v0 = vld [vmem:[%s1243_s1 + $0x40] sm:$0xff]   ;;  %917 = vset.pattern.permute.xlu0 %v981_v1  ;;  %918 = vset.pattern.permute.xlu1 %v981_v1  ;;  %v923_v5 = vld [vmem:[%s1243_s1 + $0x48] sm:$0xff]   ;;  %v927_v9 = vld [vmem:[%s1243_s1 + $0x50] sm:$0xff]  }
   0x2   :  { %v920_v2 = vld [vmem:[%s1243_s1 + $0xc0] sm:$0xff]   ;;  %824 = vmatprep.subr.bf16.mxu0 %v919_v0  ;;  %v924_v6 = vld [vmem:[%s1243_s1 + $0xc8] sm:$0xff]   ;;  %v928_v10 = vld [vmem:[%s1243_s1 + $0xd0] sm:$0xff]  }
   0x3   :  { %v921_v3 = vld [vmem:[%s1243_s1] sm:$0xff]   ;;  %870 = vmatprep.subr.bf16.mxu1 %v920_v2  ;;  %v925_v7 = vld [vmem:[%s1243_s1 + $0x8] sm:$0xff]   ;;  %v929_v11 = vld [vmem:[%s1243_s1 + $0x10] sm:$0xff]  }
   0x4   :  { %v922_v4 = vld [vmem:[%s1243_s1 + $0x80] sm:$0xff]   ;;  %825 = vmatpush3.bf16.msra.mxu0 %v921_v3  ;;  %v926_v8 = vld [vmem:[%s1243_s1 + $0x88] sm:$0xff]   ;;  %v930_v12 = vld [vmem:[%s1243_s1 + $0x90] sm:$0xff]  }
   0x5   :  { %871 = vmatpush3.bf16.msra.mxu1 %v922_v4  ;;  %826 = vmatprep.subr.bf16.mxu0 %v923_v5  ;;  %v931_v13 = vld [vmem:[%s1243_s1 + $0x58] sm:$0xff]   ;;  %v935_v17 = vld [vmem:[%s1243_s1 + $0x60] sm:$0xff]   ;;  %v939_v21 = vld [vmem:[%s1243_s1 + $0x68] sm:$0xff]  }
   0x6   :  { %872 = vmatprep.subr.bf16.mxu1 %v924_v6  ;;  %v932_v14 = vld [vmem:[%s1243_s1 + $0xd8] sm:$0xff]   ;;  %v936_v18 = vld [vmem:[%s1243_s1 + $0xe0] sm:$0xff]   ;;  %v940_v22 = vld [vmem:[%s1243_s1 + $0xe8] sm:$0xff]  }
   0x7   :  { %v933_v15 = vld [vmem:[%s1243_s1 + $0x18] sm:$0xff]   ;;  %v937_v19 = vld [vmem:[%s1243_s1 + $0x20] sm:$0xff]   ;;  %v941_v23 = vld [vmem:[%s1243_s1 + $0x28] sm:$0xff]  }
   0x8   :  { %827 = vmatpush3.bf16.msra.mxu0 %v925_v7  ;;  %v934_v16 = vld [vmem:[%s1243_s1 + $0x98] sm:$0xff]   ;;  %v938_v20 = vld [vmem:[%s1243_s1 + $0xa0] sm:$0xff]   ;;  %v942_v24 = vld [vmem:[%s1243_s1 + $0xa8] sm:$0xff]  }
   0x9   :  { %873 = vmatpush3.bf16.msra.mxu1 %v926_v8  ;;  %828 = vmatprep.subr.bf16.mxu0 %v927_v9  ;;  %v943_v25 = vld [vmem:[%s1243_s1 + $0x70] sm:$0xff]   ;;  %v947_v29 = vld [vmem:[%s1243_s1 + $0x78] sm:$0xff]   ;;  %v597_v43 = vld [vmem:[%s1245_s4] sm:$0xff] }
   0xa   :  { %874 = vmatprep.subr.bf16.mxu1 %v928_v10  ;;  %v944_v26 = vld [vmem:[%s1243_s1 + $0xf0] sm:$0xff]   ;;  %v948_v30 = vld [vmem:[%s1243_s1 + $0xf8] sm:$0xff]   ;;  %609 = vperm.xlu0 %917, %v597_v43   ;;  %v598_v45 = vld [vmem:[%s1245_s4 + $0x8] sm:$0xff] }
   0xb   :  { %v945_v27 = vld [vmem:[%s1243_s1 + $0x30] sm:$0xff]   ;;  %v949_v31 = vld [vmem:[%s1243_s1 + $0x38] sm:$0xff]   ;;  %v601_v51 = vld [vmem:[%s1245_s4 + $0x20] sm:$0xff] }
   0xc   :  { %829 = vmatpush3.bf16.msra.mxu0 %v929_v11  ;;  %v946_v28 = vld [vmem:[%s1243_s1 + $0xb0] sm:$0xff]   ;;  %v950_v32 = vld [vmem:[%s1243_s1 + $0xb8] sm:$0xff]   ;;  %v602_v52 = vld [vmem:[%s1245_s4 + $0x28] sm:$0xff] }
   0xd   :  { %875 = vmatpush3.bf16.msra.mxu1 %v930_v12  ;;  %830 = vmatprep.subr.bf16.mxu0 %v931_v13  ;;  %v951_v33 = vld [vmem:[%s1244_s0] ss:$16 sps:$4 sm:$0xff]   ;;  %v953_v34 = vld [vmem:[%s1244_s0 + $0x4] ss:$16 sps:$4 sm:$0xff]   ;;  %v954_v35 = vld [vmem:[%s1244_s0 + $0x8] ss:$16 sps:$4 sm:$0xff]  }
   0xe   :  { %876 = vmatprep.subr.bf16.mxu1 %v932_v14  ;;  %v956_v36 = vld [vmem:[%s1244_s0 + $0xc] ss:$16 sps:$4 sm:$0xff]   ;;  %429 = vmatprep.mubr.bf16.mxu0 %v953_v34  ;;  %v957_v37 = vld [vmem:[%s1244_s0 + $0x24] ss:$16 sps:$4 sm:$0xff]   ;;  %v961_v39 = vld [vmem:[%s1244_s0 + $0x20] ss:$16 sps:$4 sm:$0xff]  }
   0xf   :  { %502 = vmatprep.mubr.bf16.mxu1 %v956_v36  ;;  %v959_v38 = vld [vmem:[%s1244_s0 + $0x2c] ss:$16 sps:$4 sm:$0xff]   ;;  %v962_v40 = vld [vmem:[%s1244_s0 + $0x28] ss:$16 sps:$4 sm:$0xff]   ;;  %v963_v41 = vld [vmem:[%s1244_s0 + $0x44] ss:$16 sps:$4 sm:$0xff]   ;;  %614 = vperm.xlu0 %917, %v598_v45  }
  0x10   :  { %831 = vmatpush3.bf16.msra.mxu0 %v933_v15  ;;  %v965_v42 = vld [vmem:[%s1244_s0 + $0x4c] ss:$16 sps:$4 sm:$0xff]   ;;  %v599_v44 = vld [vmem:[%s1245_s4 + $0x10] sm:$0xff]  ;;  %v968_v48 = vld [vmem:[%s1244_s0 + $0x48] ss:$16 sps:$4 sm:$0xff]  }
  0x11   :  { %877 = vmatpush3.bf16.msra.mxu1 %v934_v16  ;;  %832 = vmatprep.subr.bf16.mxu0 %v935_v17  ;;  %v967_v46 = vld [vmem:[%s1244_s0 + $0x40] ss:$16 sps:$4 sm:$0xff]   ;;  %v600_v47 = vld [vmem:[%s1245_s4 + $0x18] sm:$0xff]  ;;  %v969_v49 = vld [vmem:[%s1244_s0 + $0x64] ss:$16 sps:$4 sm:$0xff]  }
  0x12   :  { %878 = vmatprep.subr.bf16.mxu1 %v936_v18  ;;  %619 = vperm.xlu1 %918, %v599_v44   ;;  %v971_v50 = vld [vmem:[%s1244_s0 + $0x6c] ss:$16 sps:$4 sm:$0xff]   ;;  %v603_v53 = vld [vmem:[%s1245_s4 + $0x30] sm:$0xff]  ;;  %v974_v56 = vld [vmem:[%s1244_s0 + $0x68] ss:$16 sps:$4 sm:$0xff]  }
  0x13   :  { %629 = vperm.xlu0 %917, %v601_v51   ;;  %v973_v54 = vld [vmem:[%s1244_s0 + $0x60] ss:$16 sps:$4 sm:$0xff]   ;;  %v604_v55 = vld [vmem:[%s1245_s4 + $0x38] sm:$0xff]  ;;  %v975_v57 = vld [vmem:[%s1244_s0 + $0x84] ss:$16 sps:$4 sm:$0xff]  }
  0x14   :  { %833 = vmatpush3.bf16.msra.mxu0 %v937_v19  ;;  %v977_v58 = vld [vmem:[%s1244_s0 + $0x8c] ss:$16 sps:$4 sm:$0xff]   ;;  %v605_v59 = vld [vmem:[%s1245_s4 + $0x40] sm:$0xff]  ;;  %v980_v62 = vld [vmem:[%s1244_s0 + $0x88] ss:$16 sps:$4 sm:$0xff]  }
  0x15   :  { %879 = vmatpush3.bf16.msra.mxu1 %v938_v20  ;;  %834 = vmatprep.subr.bf16.mxu0 %v939_v21  ;;  %v606_v60 = vld [vmem:[%s1245_s4 + $0x48] sm:$0xff]  ;;  %v979_v61 = vld [vmem:[%s1244_s0 + $0x80] ss:$16 sps:$4 sm:$0xff]  }
  0x16   :  { %880 = vmatprep.subr.bf16.mxu1 %v940_v22  ;;  %624 = vperm.xlu1 %918, %v600_v47   ;;  %v1201_v8 = vld [vmem:[%s1246_s2] ss:$0 sm:$0xff] }
  0x17   :  { %639 = vperm.xlu0 %917, %v603_v53   ;;  %v1206_v13 = vld [vmem:[%s1247_s3] ss:$0 sm:$0xff] }
  0x18   :  { %835 = vmatpush3.bf16.msra.mxu0 %v941_v23 }
  0x19   :  { %881 = vmatpush3.bf16.msra.mxu1 %v942_v24  ;;  %836 = vmatprep.subr.bf16.mxu0 %v943_v25 }
  0x1a   :  { %882 = vmatprep.subr.bf16.mxu1 %v944_v26  ;;  %634 = vperm.xlu1 %918, %v602_v52  }
  0x1b   :  { %649 = vperm.xlu0 %917, %v605_v59  }
  0x1c   :  { %837 = vmatpush3.bf16.msra.mxu0 %v945_v27 }
  0x1d   :  { %883 = vmatpush3.bf16.msra.mxu1 %v946_v28  ;;  %838 = vmatprep.subr.bf16.mxu0 %v947_v29 }
  0x1e   :  { %884 = vmatprep.subr.bf16.mxu1 %v948_v30  ;;  %644 = vperm.xlu1 %918, %v604_v55  }
  0x20   :  { %839 = vmatpush3.bf16.msra.mxu0 %v949_v31 }
  0x21   :  { %885 = vmatpush3.bf16.msra.mxu1 %v950_v32 }
  0x22   :  { %654 = vperm.xlu1 %918, %v606_v60  }
  0x23   :  { %430 = vmatmul.mubr.bf16.vlgmr.msra.gmra.mrb[0].mxu0 %v951_v33 }
  0x24   :  { %503 = vmatmul.mubr.bf16.vlgmr.msra.gmra.mrb[0].mxu1 %v954_v35  ;;  %437 = vmatprep.mubr.bf16.mxu0 %v957_v37 }
  0x25   :  { %510 = vmatprep.mubr.bf16.mxu1 %v959_v38 }
  0x2b   :  { %438 = vmatmul.mubr.bf16.gmra.mrb[4].mxu0 %v961_v39 }
  0x2c   :  { %511 = vmatmul.mubr.bf16.gmra.mrb[4].mxu1 %v962_v40  ;;  %445 = vmatprep.mubr.bf16.mxu0 %v963_v41 }
  0x2d   :  { %518 = vmatprep.mubr.bf16.mxu1 %v965_v42 }
  0x33   :  { %446 = vmatmul.mubr.bf16.gmra.mrb[8].mxu0 %v967_v46 }
  0x34   :  { %519 = vmatmul.mubr.bf16.gmra.mrb[8].mxu1 %v968_v48  ;;  %453 = vmatprep.mubr.bf16.mxu0 %v969_v49 }
  0x35   :  { %526 = vmatprep.mubr.bf16.mxu1 %v971_v50 }
  0x3b   :  { %454 = vmatmul.mubr.bf16.gmra.mrb[12].mxu0 %v973_v54 }
  0x3c   :  { %527 = vmatmul.mubr.bf16.gmra.mrb[12].mxu1 %v974_v56  ;;  %461 = vmatprep.mubr.bf16.mxu0 %v975_v57 }
  0x3d   :  { %534 = vmatprep.mubr.bf16.mxu1 %v977_v58 }
  0x43   :  { %462 = vmatmul.mubr.bf16.gmra.mrb[16].mxu0 %v979_v61 }
  0x44   :  { %535 = vmatmul.mubr.bf16.gmra.mrb[16].mxu1 %v980_v62 }
  0x89   :  { %v610_v17 = vpop.permute.xlu0 %609 }
  0x8e   :  { %v615_v36 = vpop.permute.xlu0 %614 }
  0x91   :  { %v620_v40 = vpop.permute.xlu1 %619 }
  0xf6   :  { %v840_v63 = vpop.f32.mrb[0].mxu0 }
  0xf7   :  { %v886_v0 = vpop.f32.mrb[0].mxu1  ;;  %v841_v1 = vpop.f32.mrb[1].mxu0 }
  0xf8   :  { %v842_v2 = vadd.f32 %v841_v1, %v840_v63  ;;  %v887_v3 = vpop.f32.mrb[1].mxu1  ;;  %v843_v4 = vpop.f32.mrb[2].mxu0 }
  0xf9   :  { %v888_v5 = vadd.f32 %v887_v3, %v886_v0  ;;  %v889_v6 = vpop.f32.mrb[2].mxu1  ;;  %v844_v7 = vpop.f32.mrb[3].mxu0 }
  0xfa   :  { %v845_v9 = vadd.f32 %v844_v7, %v843_v4  ;;  %v890_v10 = vpop.f32.mrb[3].mxu1 }
  0xfb   :  { %v505_v11 = vadd.f32 %v888_v5, %v842_v2  ;;  %v891_v12 = vadd.f32 %v890_v10, %v889_v6  ;;  %v625_v2 = vpop.permute.xlu1 %624 }
  0xfd   :  { %v550_v14 = vmul.f32 %v1201_v8, %v505_v11  ;;  %v508_v15 = vadd.f32 %v891_v12, %v845_v9 }
  0xfe   :  { %v846_v16 = vpop.f32.mrb[4].mxu0 }
  0xff   :  { %v551_v18 = vmul.f32 %v1201_v8, %v508_v15  ;;  %v892_v19 = vpop.f32.mrb[4].mxu1  ;;  %v847_v20 = vpop.f32.mrb[5].mxu0  ;;  %v567_v21 = vadd.f32 %v1206_v13, %v550_v14 }
 0x100   :  { %v848_v22 = vadd.f32 %v847_v20, %v846_v16  ;;  %v893_v23 = vpop.f32.mrb[5].mxu1  ;;  %v849_v24 = vpop.f32.mrb[6].mxu0 }
 0x101   :  { %v894_v25 = vadd.f32 %v893_v23, %v892_v19  ;;  %v895_v26 = vpop.f32.mrb[6].mxu1  ;;  %v577_v27 = vmax.f32 %v567_v21, 0.0  ;;  %v850_v28 = vpop.f32.mrb[7].mxu0  ;;  %v568_v29 = vadd.f32 %v1206_v13, %v551_v18 }
 0x102   :  { %v851_v30 = vadd.f32 %v850_v28, %v849_v24  ;;  %v896_v31 = vpop.f32.mrb[7].mxu1  ;;  %v630_v28 = vpop.permute.xlu0 %629 }
 0x103   :  { %v513_v32 = vadd.f32 %v894_v25, %v848_v22  ;;  %v587_v33 = vmin.f32 %v577_v27, 20.0  ;;  %v897_v34 = vadd.f32 %v896_v31, %v895_v26  ;;  %v578_v35 = vmax.f32 %v568_v29, 0.0  ;;  %v635_v31 = vpop.permute.xlu1 %634 }
 0x105   :  { %v552_v37 = vmul.f32 %v1201_v8, %v513_v32  ;;  %v516_v38 = vadd.f32 %v897_v34, %v851_v30  ;;  %v588_v39 = vmin.f32 %v578_v35, 20.0  ;;  %v657_v42 = vmul.f32 %v610_v17, %v587_v33 }
 0x106   :  { %v852_v41 = vpop.f32.mrb[8].mxu0 }
 0x107   :  { %v553_v43 = vmul.f32 %v1201_v8, %v516_v38  ;;  %v569_v44 = vadd.f32 %v1206_v13, %v552_v37  ;;  %v658_v45 = vmul.f32 %v615_v36, %v588_v39  ;;  %v898_v46 = vpop.f32.mrb[8].mxu1  ;;  %v853_v47 = vpop.f32.mrb[9].mxu0 }
 0x108   :  { %v854_v48 = vadd.f32 %v853_v47, %v852_v41  ;;  %v899_v49 = vpop.f32.mrb[9].mxu1  ;;  %v855_v50 = vpop.f32.mrb[10].mxu0 }
 0x109   :  { %v579_v51 = vmax.f32 %v569_v44, 0.0  ;;  %v798_v52 = vpack.c.bf16 %v658_v45, %v657_v42  ;;  %v900_v53 = vadd.f32 %v899_v49, %v898_v46  ;;  %v901_v54 = vpop.f32.mrb[10].mxu1  ;;  %v570_v55 = vadd.f32 %v1206_v13, %v553_v43  ;;  %v856_v56 = vpop.f32.mrb[11].mxu0 }
 0x10a   :  { %v857_v57 = vadd.f32 %v856_v56, %v855_v50  ;;  %v902_v58 = vpop.f32.mrb[11].mxu1 }
 0x10b   :  { %v589_v59 = vmin.f32 %v579_v51, 20.0  ;;  %799 = vst [vmem:[%s1248_s5] sm:$0xff] %v798_v52   ;;  %v521_v60 = vadd.f32 %v900_v53, %v854_v48  ;;  %v580_v61 = vmax.f32 %v570_v55, 0.0  ;;  %v903_v62 = vadd.f32 %v902_v58, %v901_v54  ;;  %v640_v58 = vpop.permute.xlu0 %639 }
 0x10d   :  { %v554_v63 = vmul.f32 %v1201_v8, %v521_v60  ;;  %v590_v0 = vmin.f32 %v580_v61, 20.0  ;;  %v524_v1 = vadd.f32 %v903_v62, %v857_v57  ;;  %v659_v4 = vmul.f32 %v620_v40, %v589_v59  ;;  %v645_v57 = vpop.permute.xlu1 %644 }
 0x10e   :  { %v858_v3 = vpop.f32.mrb[12].mxu0 }
 0x10f   :  { %v660_v5 = vmul.f32 %v625_v2, %v590_v0  ;;  %v555_v6 = vmul.f32 %v1201_v8, %v524_v1  ;;  %v571_v7 = vadd.f32 %v1206_v13, %v554_v63  ;;  %v904_v9 = vpop.f32.mrb[12].mxu1  ;;  %v859_v10 = vpop.f32.mrb[13].mxu0 }
 0x110   :  { %v860_v11 = vadd.f32 %v859_v10, %v858_v3  ;;  %v905_v12 = vpop.f32.mrb[13].mxu1  ;;  %v861_v14 = vpop.f32.mrb[14].mxu0 }
 0x111   :  { %v803_v15 = vpack.c.bf16 %v660_v5, %v659_v4  ;;  %v572_v16 = vadd.f32 %v1206_v13, %v555_v6  ;;  %v581_v17 = vmax.f32 %v571_v7, 0.0  ;;  %v906_v18 = vadd.f32 %v905_v12, %v904_v9  ;;  %v907_v19 = vpop.f32.mrb[14].mxu1  ;;  %v862_v20 = vpop.f32.mrb[15].mxu0 }
 0x112   :  { %v863_v21 = vadd.f32 %v862_v20, %v861_v14  ;;  %v908_v22 = vpop.f32.mrb[15].mxu1  ;;  %v655_v5 = vpop.permute.xlu1 %654 }
 0x113   :  { %820 = vst [vmem:[%s1248_s5 + $0x8] sm:$0xff] %v803_v15   ;;  %v582_v23 = vmax.f32 %v572_v16, 0.0  ;;  %v591_v24 = vmin.f32 %v581_v17, 20.0  ;;  %v529_v25 = vadd.f32 %v906_v18, %v860_v11  ;;  %v909_v26 = vadd.f32 %v908_v22, %v907_v19  ;;  %v650_v6 = vpop.permute.xlu0 %649 }
 0x115   :  { %v592_v27 = vmin.f32 %v582_v23, 20.0  ;;  %v556_v29 = vmul.f32 %v1201_v8, %v529_v25  ;;  %v532_v30 = vadd.f32 %v909_v26, %v863_v21  ;;  %v661_v34 = vmul.f32 %v630_v28, %v591_v24 }
 0x116   :  { %v864_v32 = vpop.f32.mrb[16].mxu0 }
 0x117   :  { %v662_v33 = vmul.f32 %v635_v31, %v592_v27  ;;  %v573_v35 = vadd.f32 %v1206_v13, %v556_v29  ;;  %v557_v36 = vmul.f32 %v1201_v8, %v532_v30  ;;  %v910_v37 = vpop.f32.mrb[16].mxu1  ;;  %v865_v38 = vpop.f32.mrb[17].mxu0 }
 0x118   :  { %v866_v39 = vadd.f32 %v865_v38, %v864_v32  ;;  %v911_v40 = vpop.f32.mrb[17].mxu1  ;;  %v867_v41 = vpop.f32.mrb[18].mxu0 }
 0x119   :  { %v808_v42 = vpack.c.bf16 %v662_v33, %v661_v34  ;;  %v583_v43 = vmax.f32 %v573_v35, 0.0  ;;  %v574_v44 = vadd.f32 %v1206_v13, %v557_v36  ;;  %v912_v45 = vadd.f32 %v911_v40, %v910_v37  ;;  %v913_v46 = vpop.f32.mrb[18].mxu1  ;;  %v868_v47 = vpop.f32.mrb[19].mxu0 }
 0x11a   :  { %v869_v48 = vadd.f32 %v868_v47, %v867_v41  ;;  %v914_v49 = vpop.f32.mrb[19].mxu1 }
 0x11b   :  { %821 = vst [vmem:[%s1248_s5 + $0x10] sm:$0xff] %v808_v42   ;;  %v593_v50 = vmin.f32 %v583_v43, 20.0  ;;  %v584_v51 = vmax.f32 %v574_v44, 0.0  ;;  %v537_v52 = vadd.f32 %v912_v45, %v866_v39  ;;  %v915_v53 = vadd.f32 %v914_v49, %v913_v46 }
 0x11d   :  { %v594_v54 = vmin.f32 %v584_v51, 20.0  ;;  %v558_v55 = vmul.f32 %v1201_v8, %v537_v52  ;;  %v540_v56 = vadd.f32 %v915_v53, %v869_v48  ;;  %v663_v59 = vmul.f32 %v640_v58, %v593_v50 }
 0x11f   :  { %v664_v60 = vmul.f32 %v645_v57, %v594_v54  ;;  %v575_v61 = vadd.f32 %v1206_v13, %v558_v55  ;;  %v559_v62 = vmul.f32 %v1201_v8, %v540_v56 }
 0x121   :  { %v813_v63 = vpack.c.bf16 %v664_v60, %v663_v59  ;;  %v585_v0 = vmax.f32 %v575_v61, 0.0  ;;  %v576_v1 = vadd.f32 %v1206_v13, %v559_v62 }
 0x123   :  { %822 = vst [vmem:[%s1248_s5 + $0x18] sm:$0xff] %v813_v63   ;;  %v595_v2 = vmin.f32 %v585_v0, 20.0  ;;  %v586_v3 = vmax.f32 %v576_v1, 0.0 }
 0x125   :  { %v596_v4 = vmin.f32 %v586_v3, 20.0  ;;  %v665_v7 = vmul.f32 %v650_v6, %v595_v2 }
 0x127   :  { %v666_v9 = vmul.f32 %v655_v5, %v596_v4 }
 0x129   :  { %v818_v10 = vpack.c.bf16 %v666_v9, %v665_v7 }
 0x12b   :  { %823 = vst [vmem:[%s1248_s5 + $0x20] sm:$0xff] %v818_v10  }

// kernel: deepspeech2_forward.20
= control target key start
LH: loop header
LB: loop body
LE: loop exit
PB: predicated region body
PF: predicated region fallthrough
CT: control target
= control target key end

     0   :  { %v611_v1 = vmov 0   ;;  %v67_v50 = vlaneseq  ;;  %s821_s1 = inlined_call_operand.vmem [shape: bf16[128,768], index: 1, kind: input, shape index: {}]   ;;  %s822_s0 = inlined_call_operand.vmem [shape: bf16[16,128], index: 0, kind: input, shape index: {}]   ;;  %s823_s2 = inlined_call_operand.vmem [shape: f32[1,768], index: 2, kind: input, shape index: {}]   ;;  %s824_s3 = inlined_call_operand.vmem [shape: f32[16,768], index: 3, kind: output, shape index: {}]  }
   0x1   :  { %v538_v0 = vld [vmem:[%s821_s1 + $0x4] ss:$24 sps:$4 sm:$0xff]   ;;  %375 = vmatprep.mubr.bf16.mxu0 %v611_v1  ;;  %418 = vmatprep.mubr.bf16.mxu1 %v611_v1  ;;  %v540_v2 = vld [vmem:[%s821_s1] ss:$24 sps:$4 sm:$0xff]   ;;  %v541_v3 = vld [vmem:[%s821_s1 + $0x34] ss:$24 sps:$4 sm:$0xff]  }
   0x2   :  { %343 = vmatprep.subr.bf16.mxu0 %v538_v0  ;;  %v543_v4 = vld [vmem:[%s821_s1 + $0x30] ss:$24 sps:$4 sm:$0xff]   ;;  %v544_v5 = vld [vmem:[%s821_s1 + $0x64] ss:$24 sps:$4 sm:$0xff]   ;;  %v546_v6 = vld [vmem:[%s821_s1 + $0x60] ss:$24 sps:$4 sm:$0xff]  }
   0x3   :  { %344 = vmatpush1.bf16.msra.mxu0 %v540_v2  ;;  %v547_v7 = vld [vmem:[%s821_s1 + $0x94] ss:$24 sps:$4 sm:$0xff]   ;;  %v549_v8 = vld [vmem:[%s821_s1 + $0x90] ss:$24 sps:$4 sm:$0xff]   ;;  %v550_v11 = vld [vmem:[%s821_s1 + $0xc4] ss:$24 sps:$4 sm:$0xff]  }
   0x4   :  { %345 = vmatprep.subr.bf16.mxu0 %v541_v3  ;;  %v562_v9 = vld [vmem:[%s821_s1 + $0xc] ss:$24 sps:$4 sm:$0xff]   ;;  %v564_v10 = vld [vmem:[%s821_s1 + $0x8] ss:$24 sps:$4 sm:$0xff]   ;;  %v569_v13 = vld [vmem:[%s821_s1 + $0x3c] ss:$24 sps:$4 sm:$0xff]  }
   0x5   :  { %386 = vmatprep.subr.bf16.mxu1 %v562_v9  ;;  %v552_v12 = vld [vmem:[%s821_s1 + $0xc0] ss:$24 sps:$4 sm:$0xff]   ;;  %v553_v15 = vld [vmem:[%s821_s1 + $0xf4] ss:$24 sps:$4 sm:$0xff]   ;;  %v555_v18 = vld [vmem:[%s821_s1 + $0xf0] ss:$24 sps:$4 sm:$0xff]  }
   0x6   :  { %387 = vmatpush1.bf16.msra.mxu1 %v564_v10  ;;  %v571_v14 = vld [vmem:[%s821_s1 + $0x38] ss:$24 sps:$4 sm:$0xff]   ;;  %v575_v16 = vld [vmem:[%s821_s1 + $0x6c] ss:$24 sps:$4 sm:$0xff]   ;;  %v577_v17 = vld [vmem:[%s821_s1 + $0x68] ss:$24 sps:$4 sm:$0xff]  }
   0x7   :  { %346 = vmatpush1.bf16.msra.mxu0 %v543_v4  ;;  %388 = vmatprep.subr.bf16.mxu1 %v569_v13  ;;  %v556_v19 = vld [vmem:[%s821_s1 + $0x124] ss:$24 sps:$4 sm:$0xff]   ;;  %v583_v21 = vld [vmem:[%s821_s1 + $0x98] ss:$24 sps:$4 sm:$0xff]   ;;  %v559_v24 = vld [vmem:[%s821_s1 + $0x154] ss:$24 sps:$4 sm:$0xff]  }
   0x8   :  { %347 = vmatprep.subr.bf16.mxu0 %v544_v5  ;;  %v581_v20 = vld [vmem:[%s821_s1 + $0x9c] ss:$24 sps:$4 sm:$0xff]   ;;  %v558_v22 = vld [vmem:[%s821_s1 + $0x120] ss:$24 sps:$4 sm:$0xff]   ;;  %v587_v23 = vld [vmem:[%s821_s1 + $0xcc] ss:$24 sps:$4 sm:$0xff]  }
   0x9   :  { %v589_v25 = vld [vmem:[%s821_s1 + $0xc8] ss:$24 sps:$4 sm:$0xff]   ;;  %v593_v27 = vld [vmem:[%s821_s1 + $0xfc] ss:$24 sps:$4 sm:$0xff]   ;;  %v595_v30 = vld [vmem:[%s821_s1 + $0xf8] ss:$24 sps:$4 sm:$0xff]  }
   0xa   :  { %389 = vmatpush1.bf16.msra.mxu1 %v571_v14  ;;  %v561_v26 = vld [vmem:[%s821_s1 + $0x150] ss:$24 sps:$4 sm:$0xff]   ;;  %v568_v28 = vld [vmem:[%s821_s1 + $0x14] ss:$24 sps:$4 sm:$0xff]   ;;  %v565_v29 = vld [vmem:[%s822_s0] sm:$0xff]   ;;  %v68_v51 = vshrl.u32 %v67_v50, 7 }
   0xb   :  { %348 = vmatpush1.bf16.msra.mxu0 %v546_v6  ;;  %390 = vmatprep.subr.bf16.mxu1 %v575_v16  ;;  %v566_v31 = vld [vmem:[%s821_s1 + $0x10] ss:$24 sps:$4 sm:$0xff]   ;;  %v599_v32 = vld [vmem:[%s821_s1 + $0x12c] ss:$24 sps:$4 sm:$0xff]   ;;  %v572_v35 = vld [vmem:[%s821_s1 + $0x40] ss:$24 sps:$4 sm:$0xff]  }
   0xc   :  { %349 = vmatprep.subr.bf16.mxu0 %v547_v7  ;;  %v574_v33 = vld [vmem:[%s821_s1 + $0x44] ss:$24 sps:$4 sm:$0xff]   ;;  %v601_v34 = vld [vmem:[%s821_s1 + $0x128] ss:$24 sps:$4 sm:$0xff]   ;;  %v580_v37 = vld [vmem:[%s821_s1 + $0x74] ss:$24 sps:$4 sm:$0xff]  }
   0xd   :  { %v605_v36 = vld [vmem:[%s821_s1 + $0x15c] ss:$24 sps:$4 sm:$0xff]   ;;  %v607_v38 = vld [vmem:[%s821_s1 + $0x158] ss:$24 sps:$4 sm:$0xff]   ;;  %v69_v52 = vsub.s32 0, %v68_v51  ;;  %v73_v54 = vsub.s32 1, %v68_v51 }
   0xe   :  { %391 = vmatpush1.bf16.msra.mxu1 %v577_v17  ;;  %v578_v39 = vld [vmem:[%s821_s1 + $0x70] ss:$24 sps:$4 sm:$0xff]   ;;  %v586_v40 = vld [vmem:[%s821_s1 + $0xa4] ss:$24 sps:$4 sm:$0xff]   ;;  %v584_v41 = vld [vmem:[%s821_s1 + $0xa0] ss:$24 sps:$4 sm:$0xff]  }
   0xf   :  { %350 = vmatpush1.bf16.msra.mxu0 %v549_v8  ;;  %392 = vmatprep.subr.bf16.mxu1 %v581_v20  ;;  %v592_v42 = vld [vmem:[%s821_s1 + $0xd4] ss:$24 sps:$4 sm:$0xff]   ;;  %v590_v43 = vld [vmem:[%s821_s1 + $0xd0] ss:$24 sps:$4 sm:$0xff]   ;;  %v598_v44 = vld [vmem:[%s821_s1 + $0x104] ss:$24 sps:$4 sm:$0xff]  }
  0x10   :  { %351 = vmatprep.subr.bf16.mxu0 %v550_v11  ;;  %v596_v45 = vld [vmem:[%s821_s1 + $0x100] ss:$24 sps:$4 sm:$0xff]   ;;  %v604_v46 = vld [vmem:[%s821_s1 + $0x134] ss:$24 sps:$4 sm:$0xff]   ;;  %v602_v47 = vld [vmem:[%s821_s1 + $0x130] ss:$24 sps:$4 sm:$0xff]  }
  0x11   :  { %v610_v48 = vld [vmem:[%s821_s1 + $0x164] ss:$24 sps:$4 sm:$0xff]   ;;  %v608_v49 = vld [vmem:[%s821_s1 + $0x160] ss:$24 sps:$4 sm:$0xff]   ;;  %v81_v2 = vsub.s32 3, %v68_v51  ;;  %v85_v13 = vsub.s32 4, %v68_v51 }
  0x12   :  { %393 = vmatpush1.bf16.msra.mxu1 %v583_v21  ;;  %v65_v53 = vld [vmem:[%s823_s2] sm:$0x3f]  ;;  %v89_v14 = vsub.s32 5, %v68_v51 }
  0x13   :  { %352 = vmatpush1.bf16.msra.mxu0 %v552_v12  ;;  %394 = vmatprep.subr.bf16.mxu1 %v587_v23  ;;  %v70_v55 = vrot.slane %v65_v53, %v69_v52  ;;  %v74_v56 = vrot.slane %v65_v53, %v73_v54  ;;  %v82_v4 = vrot.slane %v65_v53, %v81_v2 }
  0x14   :  { %353 = vmatprep.subr.bf16.mxu0 %v553_v15  ;;  %v86_v15 = vrot.slane %v65_v53, %v85_v13  ;;  %v90_v16 = vrot.slane %v65_v53, %v89_v14 }
  0x16   :  { %395 = vmatpush1.bf16.msra.mxu1 %v589_v25 }
  0x17   :  { %354 = vmatpush1.bf16.msra.mxu0 %v555_v18  ;;  %396 = vmatprep.subr.bf16.mxu1 %v593_v27 }
  0x18   :  { %355 = vmatprep.subr.bf16.mxu0 %v556_v19 }
  0x1a   :  { %397 = vmatpush1.bf16.msra.mxu1 %v595_v30 }
  0x1b   :  { %356 = vmatpush1.bf16.msra.mxu0 %v558_v22  ;;  %398 = vmatprep.subr.bf16.mxu1 %v599_v32 }
  0x1c   :  { %357 = vmatprep.subr.bf16.mxu0 %v559_v24 }
  0x1e   :  { %399 = vmatpush1.bf16.msra.mxu1 %v601_v34 }
  0x1f   :  { %358 = vmatpush1.bf16.msra.mxu0 %v561_v26  ;;  %400 = vmatprep.subr.bf16.mxu1 %v605_v36 }
  0x20   :  { %429 = vmatprep.subr.bf16.mxu0 %v568_v28 }
  0x22   :  { %376 = vmatmul.mubr.bf16.vlgmr.msra.gmra.mrb[0].mxu0 %v565_v29  ;;  %401 = vmatpush1.bf16.msra.mxu1 %v607_v38 }
  0x23   :  { %430 = vmatpush1.bf16.msra.mxu0 %v566_v31  ;;  %461 = vmatprep.mubr.bf16.mxu0 %v611_v1  ;;  %v77_v1 = vsub.s32 2, %v68_v51 }
  0x24   :  { %431 = vmatprep.subr.bf16.mxu0 %v574_v33 }
  0x25   :  { %419 = vmatmul.mubr.bf16.vlgmr.msra.gmra.mrb[0].mxu1 %v565_v29  ;;  %v78_v3 = vrot.slane %v65_v53, %v77_v1 }
  0x27   :  { %432 = vmatpush1.bf16.msra.mxu0 %v572_v35 }
  0x28   :  { %433 = vmatprep.subr.bf16.mxu0 %v580_v37 }
  0x2b   :  { %434 = vmatpush1.bf16.msra.mxu0 %v578_v39 }
  0x2c   :  { %435 = vmatprep.subr.bf16.mxu0 %v586_v40 }
  0x2f   :  { %436 = vmatpush1.bf16.msra.mxu0 %v584_v41 }
  0x30   :  { %437 = vmatprep.subr.bf16.mxu0 %v592_v42 }
  0x33   :  { %438 = vmatpush1.bf16.msra.mxu0 %v590_v43 }
  0x34   :  { %439 = vmatprep.subr.bf16.mxu0 %v598_v44 }
  0x37   :  { %440 = vmatpush1.bf16.msra.mxu0 %v596_v45 }
  0x38   :  { %441 = vmatprep.subr.bf16.mxu0 %v604_v46 }
  0x3b   :  { %442 = vmatpush1.bf16.msra.mxu0 %v602_v47 }
  0x3c   :  { %443 = vmatprep.subr.bf16.mxu0 %v610_v48 }
  0x3f   :  { %444 = vmatpush1.bf16.msra.mxu0 %v608_v49 }
  0x42   :  { %462 = vmatmul.mubr.bf16.vlgmr.msra.gmra.mrb[4].mxu0 %v565_v29 }
  0xf5   :  { %v377_v57 = vpop.f32.mrb[0].mxu0 }
  0xf6   :  { %v378_v58 = vadd.f32 %v377_v57, %v70_v55  ;;  %v379_v59 = vpop.f32.mrb[1].mxu0 }
  0xf7   :  { %v380_v60 = vadd.f32 %v379_v59, %v74_v56  ;;  %v381_v61 = vpop.f32.mrb[2].mxu0 }
  0xf8   :  { %472 = vst [vmem:[%s824_s3] sm:$0xff] %v378_v58  ;;  %v382_v62 = vadd.f32 %v381_v61, %v70_v55  ;;  %v383_v63 = vpop.f32.mrb[3].mxu0  ;;  %v420_v5 = vpop.f32.mrb[0].mxu1 }
  0xf9   :  { %473 = vst [vmem:[%s824_s3 + $0x8] sm:$0xff] %v380_v60  ;;  %v384_v0 = vadd.f32 %v383_v63, %v74_v56  ;;  %v421_v6 = vadd.f32 %v420_v5, %v78_v3  ;;  %v422_v7 = vpop.f32.mrb[1].mxu1 }
  0xfa   :  { %478 = vst [vmem:[%s824_s3 + $0x30] sm:$0xff] %v382_v62  ;;  %v423_v8 = vadd.f32 %v422_v7, %v82_v4  ;;  %v424_v9 = vpop.f32.mrb[2].mxu1 }
  0xfb   :  { %479 = vst [vmem:[%s824_s3 + $0x38] sm:$0xff] %v384_v0  ;;  %474 = vst [vmem:[%s824_s3 + $0x10] sm:$0xff] %v421_v6  ;;  %v425_v10 = vadd.f32 %v424_v9, %v78_v3  ;;  %v426_v11 = vpop.f32.mrb[3].mxu1 }
  0xfc   :  { %475 = vst [vmem:[%s824_s3 + $0x18] sm:$0xff] %v423_v8  ;;  %v427_v12 = vadd.f32 %v426_v11, %v82_v4 }
  0xfd   :  { %480 = vst [vmem:[%s824_s3 + $0x40] sm:$0xff] %v425_v10 }
  0xfe   :  { %481 = vst [vmem:[%s824_s3 + $0x48] sm:$0xff] %v427_v12 }
 0x115   :  { %v463_v17 = vpop.f32.mrb[4].mxu0 }
 0x116   :  { %v464_v18 = vadd.f32 %v463_v17, %v86_v15  ;;  %v465_v19 = vpop.f32.mrb[5].mxu0 }
 0x117   :  { %v466_v20 = vadd.f32 %v465_v19, %v90_v16  ;;  %v467_v21 = vpop.f32.mrb[6].mxu0 }
 0x118   :  { %476 = vst [vmem:[%s824_s3 + $0x20] sm:$0xff] %v464_v18  ;;  %v468_v22 = vadd.f32 %v467_v21, %v86_v15  ;;  %v469_v23 = vpop.f32.mrb[7].mxu0 }
 0x119   :  { %477 = vst [vmem:[%s824_s3 + $0x28] sm:$0xff] %v466_v20  ;;  %v470_v24 = vadd.f32 %v469_v23, %v90_v16 }
 0x11a   :  { %482 = vst [vmem:[%s824_s3 + $0x50] sm:$0xff] %v468_v22 }
 0x11b   :  { %483 = vst [vmem:[%s824_s3 + $0x58] sm:$0xff] %v470_v24 }

// kernel: deepspeech2_forward.21
= control target key start
LH: loop header
LB: loop body
LE: loop exit
PB: predicated region body
PF: predicated region fallthrough
CT: control target
= control target key end

     0   :  { %v772_v1 = vmov 0.0   ;;  %v773_v2 = vmov 0   ;;  %vm774_vm0 = vmmov 0   ;;  %v775_v25 = vmov 0.0|0.0   ;;  %s947_s1 = inlined_call_operand.vmem [shape: bf16[128,384], index: 1, kind: input, shape index: {}]   ;;  %s948_s2 = inlined_call_operand.vmem [shape: f32[1,384], index: 2, kind: input, shape index: {}]   ;;  %s949_s0 = inlined_call_operand.vmem [shape: f32[2,8,384], index: 0, kind: input, shape index: {}]   ;;  %s950_s3 = inlined_call_operand.vmem [shape: f32[2,8,128], index: 3, kind: output, shape index: {}]  }
   0x1   :  { %v712_v0 = vld [vmem:[%s947_s1 + $0x4] ss:$12 sps:$4 sm:$0xff]   ;;  %668 = vmatprep.subr.bf16.mxu1 %v772_v1  ;;  %230 = vmatprep.mubr.bf16.mxu0 %v773_v2  ;;  %v714_v3 = vld [vmem:[%s947_s1] ss:$12 sps:$4 sm:$0xff]   ;;  %v715_v4 = vld [vmem:[%s947_s1 + $0x1c] ss:$12 sps:$4 sm:$0xff]   ;;  %v55_v35 = vlaneseq }
   0x2   :  { %684 = vmatprep.mubr.msk.bf16.mxu1 %vm774_vm0, %v772_v1  ;;  %198 = vmatprep.subr.bf16.mxu0 %v712_v0  ;;  %v717_v5 = vld [vmem:[%s947_s1 + $0x18] ss:$12 sps:$4 sm:$0xff]   ;;  %v718_v6 = vld [vmem:[%s947_s1 + $0x34] ss:$12 sps:$4 sm:$0xff]   ;;  %v720_v7 = vld [vmem:[%s947_s1 + $0x30] ss:$12 sps:$4 sm:$0xff]  }
   0x3   :  { %199 = vmatpush1.bf16.msra.mxu0 %v714_v3  ;;  %v721_v8 = vld [vmem:[%s947_s1 + $0x4c] ss:$12 sps:$4 sm:$0xff]   ;;  %v733_v9 = vld [vmem:[%s947_s1 + $0x8] ss:$12 sps:$4 sm:$0xff]   ;;  %v724_v11 = vld [vmem:[%s947_s1 + $0x64] ss:$12 sps:$4 sm:$0xff]  }
   0x4   :  { %200 = vmatprep.subr.bf16.mxu0 %v715_v4  ;;  %v723_v10 = vld [vmem:[%s947_s1 + $0x48] ss:$12 sps:$4 sm:$0xff]   ;;  %669 = vmatpush3.bf16.msra.mxu1 %v733_v9  ;;  %v737_v12 = vld [vmem:[%s947_s1 + $0x20] ss:$12 sps:$4 sm:$0xff]   ;;  %v738_v15 = vld [vmem:[%s947_s1 + $0x38] ss:$12 sps:$4 sm:$0xff]  }
   0x5   :  { %670 = vmatprep.subr.bf16.mxu1 %v772_v1  ;;  %v726_v13 = vld [vmem:[%s947_s1 + $0x60] ss:$12 sps:$4 sm:$0xff]   ;;  %v727_v14 = vld [vmem:[%s947_s1 + $0x7c] ss:$12 sps:$4 sm:$0xff]   ;;  %v729_v16 = vld [vmem:[%s947_s1 + $0x78] ss:$12 sps:$4 sm:$0xff]  }
   0x6   :  { %v730_v17 = vld [vmem:[%s947_s1 + $0x94] ss:$12 sps:$4 sm:$0xff]   ;;  %v739_v18 = vld [vmem:[%s947_s1 + $0x50] ss:$12 sps:$4 sm:$0xff]   ;;  %v734_v20 = vld [vmem:[%s947_s1 + $0xac] ss:$12 sps:$4 sm:$0xff]  }
   0x7   :  { %201 = vmatpush1.bf16.msra.mxu0 %v717_v5  ;;  %v732_v19 = vld [vmem:[%s947_s1 + $0x90] ss:$12 sps:$4 sm:$0xff]   ;;  %v740_v21 = vld [vmem:[%s947_s1 + $0x68] ss:$12 sps:$4 sm:$0xff]   ;;  %v741_v23 = vld [vmem:[%s947_s1 + $0x80] ss:$12 sps:$4 sm:$0xff]  }
   0x8   :  { %202 = vmatprep.subr.bf16.mxu0 %v718_v6  ;;  %671 = vmatpush3.bf16.msra.mxu1 %v737_v12  ;;  %v736_v22 = vld [vmem:[%s947_s1 + $0xa8] ss:$12 sps:$4 sm:$0xff]   ;;  %v742_v24 = vld [vmem:[%s947_s1 + $0x98] ss:$12 sps:$4 sm:$0xff]   ;;  %v743_v26 = vld [vmem:[%s947_s1 + $0xb0] ss:$12 sps:$4 sm:$0xff]  }
   0x9   :  { %672 = vmatprep.subr.bf16.mxu1 %v772_v1  ;;  %v744_v27 = vld [vmem:[%s947_s1 + $0x8] ss:$12 sps:$4 sm:$0xff]   ;;  %v745_v28 = vld [vmem:[%s947_s1 + $0x20] ss:$12 sps:$4 sm:$0xff]   ;;  %v746_v29 = vld [vmem:[%s947_s1 + $0x38] ss:$12 sps:$4 sm:$0xff]  }
   0xa   :  { %v747_v30 = vld [vmem:[%s947_s1 + $0x50] ss:$12 sps:$4 sm:$0xff]   ;;  %v748_v31 = vld [vmem:[%s947_s1 + $0x68] ss:$12 sps:$4 sm:$0xff]   ;;  %v749_v32 = vld [vmem:[%s947_s1 + $0x80] ss:$12 sps:$4 sm:$0xff]  }
   0xb   :  { %203 = vmatpush1.bf16.msra.mxu0 %v720_v7  ;;  %v750_v33 = vld [vmem:[%s947_s1 + $0x98] ss:$12 sps:$4 sm:$0xff]   ;;  %v751_v34 = vld [vmem:[%s947_s1 + $0xb0] ss:$12 sps:$4 sm:$0xff]   ;;  %v912_v36 = vshrl.u32 %v55_v35, 7  ;;  %v17_v49 = vld [vmem:[%s949_s0 + $0x8] sm:$0xff] }
   0xc   :  { %204 = vmatprep.subr.bf16.mxu0 %v721_v8  ;;  %673 = vmatpush3.bf16.msra.mxu1 %v738_v15  ;;  %v53_v38 = vld [vmem:[%s948_s2] sm:$0x7]  ;;  %v620_v15 = vld [vmem:[%s949_s0 + $0x18] sm:$0xff] }
   0xd   :  { %674 = vmatprep.subr.bf16.mxu1 %v772_v1  ;;  %v57_v37 = vsub.s32 0, %v912_v36  ;;  %v61_v39 = vsub.s32 1, %v912_v36  ;;  %v16_v42 = vld [vmem:[%s949_s0] sm:$0xff]  ;;  %v65_v60 = vsub.s32 2, %v912_v36 }
   0xe   :  { %v340_v12 = vld [vmem:[%s948_s2] sm:$0x7] }
   0xf   :  { %205 = vmatpush1.bf16.msra.mxu0 %v723_v10  ;;  %v58_v40 = vrot.slane %v53_v38, %v57_v37  ;;  %v62_v41 = vrot.slane %v53_v38, %v61_v39  ;;  %v66_v61 = vrot.slane %v53_v38, %v65_v60  ;;  %v622_v38 = vld [vmem:[%s949_s0 + $0x28] sm:$0xff] }
  0x10   :  { %206 = vmatprep.subr.bf16.mxu0 %v724_v11  ;;  %675 = vmatpush3.bf16.msra.mxu1 %v739_v18 }
  0x11   :  { %676 = vmatprep.subr.bf16.mxu1 %v772_v1 }
  0x13   :  { %207 = vmatpush1.bf16.msra.mxu0 %v726_v13 }
  0x14   :  { %208 = vmatprep.subr.bf16.mxu0 %v727_v14  ;;  %677 = vmatpush3.bf16.msra.mxu1 %v740_v21 }
  0x15   :  { %678 = vmatprep.subr.bf16.mxu1 %v772_v1 }
  0x17   :  { %209 = vmatpush1.bf16.msra.mxu0 %v729_v16 }
  0x18   :  { %210 = vmatprep.subr.bf16.mxu0 %v730_v17  ;;  %679 = vmatpush3.bf16.msra.mxu1 %v741_v23 }
  0x19   :  { %680 = vmatprep.subr.bf16.mxu1 %v772_v1 }
  0x1b   :  { %211 = vmatpush1.bf16.msra.mxu0 %v732_v19 }
  0x1c   :  { %212 = vmatprep.subr.bf16.mxu0 %v734_v20  ;;  %681 = vmatpush3.bf16.msra.mxu1 %v742_v24 }
  0x1d   :  { %682 = vmatprep.subr.bf16.mxu1 %v772_v1 }
  0x1f   :  { %213 = vmatpush1.bf16.msra.mxu0 %v736_v22 }
  0x20   :  { %485 = vmatprep.subr.bf16.mxu0 %v712_v0  ;;  %683 = vmatpush3.bf16.msra.mxu1 %v743_v26 }
  0x21   :  { %688 = vmatprep.subr.bf16.mxu1 %v772_v1 }
  0x22   :  { %231 = vmatmul.mubr.bf16.vlgmr.msra.gmra.mrb[0].mxu0 %v775_v25 }
  0x23   :  { %486 = vmatpush1.bf16.msra.mxu0 %v714_v3  ;;  %517 = vmatprep.mubr.bf16.mxu0 %v773_v2  ;;  %v18_v2 = vld [vmem:[%s949_s0 + $0x10] sm:$0xff] }
  0x24   :  { %487 = vmatprep.subr.bf16.mxu0 %v715_v4  ;;  %685 = vmatmul.mubr.bf16.vlgmr.msra.gmra.mrb[0].mxu1 %v775_v25  ;;  %v621_v25 = vld [vmem:[%s949_s0 + $0x20] sm:$0xff] }
  0x25   :  { %704 = vmatprep.mubr.msk.bf16.mxu1 %vm774_vm0, %v772_v1  ;;  %689 = vmatpush3.bf16.msra.mxu1 %v744_v27 }
  0x26   :  { %690 = vmatprep.subr.bf16.mxu1 %v772_v1 }
  0x27   :  { %488 = vmatpush1.bf16.msra.mxu0 %v717_v5 }
  0x28   :  { %489 = vmatprep.subr.bf16.mxu0 %v718_v6 }
  0x29   :  { %691 = vmatpush3.bf16.msra.mxu1 %v745_v28 }
  0x2a   :  { %692 = vmatprep.subr.bf16.mxu1 %v772_v1 }
  0x2b   :  { %490 = vmatpush1.bf16.msra.mxu0 %v720_v7 }
  0x2c   :  { %491 = vmatprep.subr.bf16.mxu0 %v721_v8 }
  0x2d   :  { %693 = vmatpush3.bf16.msra.mxu1 %v746_v29 }
  0x2e   :  { %694 = vmatprep.subr.bf16.mxu1 %v772_v1 }
  0x2f   :  { %492 = vmatpush1.bf16.msra.mxu0 %v723_v10 }
  0x30   :  { %493 = vmatprep.subr.bf16.mxu0 %v724_v11 }
  0x31   :  { %695 = vmatpush3.bf16.msra.mxu1 %v747_v30 }
  0x32   :  { %696 = vmatprep.subr.bf16.mxu1 %v772_v1 }
  0x33   :  { %494 = vmatpush1.bf16.msra.mxu0 %v726_v13  ;;  %v345_v13 = vrot.slane %v340_v12, %v57_v37 }
  0x34   :  { %495 = vmatprep.subr.bf16.mxu0 %v727_v14  ;;  %v349_v14 = vrot.slane %v340_v12, %v61_v39 }
  0x35   :  { %697 = vmatpush3.bf16.msra.mxu1 %v748_v31 }
  0x36   :  { %698 = vmatprep.subr.bf16.mxu1 %v772_v1 }
  0x37   :  { %496 = vmatpush1.bf16.msra.mxu0 %v729_v16 }
  0x38   :  { %497 = vmatprep.subr.bf16.mxu0 %v730_v17 }
  0x39   :  { %699 = vmatpush3.bf16.msra.mxu1 %v749_v32 }
  0x3a   :  { %700 = vmatprep.subr.bf16.mxu1 %v772_v1 }
  0x3b   :  { %498 = vmatpush1.bf16.msra.mxu0 %v732_v19 }
  0x3c   :  { %499 = vmatprep.subr.bf16.mxu0 %v734_v20 }
  0x3d   :  { %701 = vmatpush3.bf16.msra.mxu1 %v750_v33 }
  0x3e   :  { %702 = vmatprep.subr.bf16.mxu1 %v772_v1 }
  0x3f   :  { %500 = vmatpush1.bf16.msra.mxu0 %v736_v22 }
  0x41   :  { %703 = vmatpush3.bf16.msra.mxu1 %v751_v34  ;;  %v353_v34 = vrot.slane %v340_v12, %v65_v60 }
  0xf5   :  { %v232_v43 = vpop.f32.mrb[0].mxu0 }
  0xf6   :  { %v233_v44 = vadd.f32 %v232_v43, %v58_v40  ;;  %v234_v45 = vpop.f32.mrb[1].mxu0 }
  0xf7   :  { %v235_v46 = vadd.f32 %v234_v45, %v62_v41  ;;  %v236_v47 = vpop.f32.mrb[2].mxu0  ;;  %v273_v53 = vpop.f32.mrb[0].mxu1 }
  0xf8   :  { %v279_v48 = vadd.f32 %v233_v44, %v16_v42  ;;  %v237_v50 = vpop.f32.mrb[3].mxu0  ;;  %v686_v55 = vpop.f32.mrb[1].mxu1  ;;  %v274_v0 = vadd.f32 %v273_v53, %v66_v61 }
  0xf9   :  { %v286_v52 = vadd.f32 %v235_v46, %v17_v49  ;;  %v276_v56 = vpop.f32.mrb[2].mxu1 }
  0xfa   :  { %v618_v51 = vmul.f32 -1.442695, %v279_v48  ;;  %v687_v57 = vpop.f32.mrb[3].mxu1 }
  0xfb   :  { %v619_v54 = vmul.f32 -1.442695, %v286_v52 }
  0xfc   :  { %752 = vpow2.f32 %v618_v51 }
  0xfd   :  { %754 = vpow2.f32 %v619_v54 }
 0x106   :  { %v753_v58 = vpop.eup %752 }
 0x107   :  { %v283_v59 = vadd.f32 1.0, %v753_v58  ;;  %v755_v62 = vpop.eup %754 }
 0x108   :  { %v290_v63 = vadd.f32 1.0, %v755_v62 }
 0x109   :  { %756 = vrcp.f32 %v283_v59 }
 0x10a   :  { %758 = vrcp.f32 %v290_v63 }
 0x113   :  { %v757_v1 = vpop.eup %756 }
 0x114   :  { %v293_v3 = vmul.f32 %v757_v1, %v274_v0  ;;  %v759_v5 = vpop.eup %758 }
 0x115   :  { %v296_v6 = vsub.f32 1.0, %v759_v5  ;;  %v298_v9 = vmul.f32 0.0, %v759_v5 }
 0x116   :  { %v294_v4 = vadd.f32 %v293_v3, %v18_v2 }
 0x118   :  { %760 = vtanh.f32 %v294_v4 }
 0x122   :  { %v761_v7 = vpop.eup %760 }
 0x123   :  { %v297_v8 = vmul.f32 %v761_v7, %v296_v6 }
 0x125   :  { %v299_v10 = vadd.f32 %v298_v9, %v297_v8 }
 0x127   :  { %301 = vst [vmem:[%s950_s3] sm:$0xff] %v299_v10  ;;  %v307_v11 = vpack.c.bf16 %v299_v10, %v299_v10 }
 0x129   :  { %518 = vmatmul.mubr.bf16.vlgmr.msra.gmra.mrb[4].mxu0 %v307_v11  ;;  %705 = vmatmul.mubr.bf16.vlgmr.msra.gmra.mrb[4].mxu1 %v307_v11 }
 0x1fc   :  { %v519_v16 = vpop.f32.mrb[4].mxu0  ;;  %v560_v17 = vpop.f32.mrb[4].mxu1 }
 0x1fd   :  { %v520_v18 = vadd.f32 %v519_v16, %v345_v13  ;;  %v521_v19 = vpop.f32.mrb[5].mxu0  ;;  %v706_v20 = vpop.f32.mrb[5].mxu1  ;;  %v561_v36 = vadd.f32 %v560_v17, %v353_v34 }
 0x1fe   :  { %v522_v21 = vadd.f32 %v521_v19, %v349_v14  ;;  %v523_v22 = vpop.f32.mrb[6].mxu0  ;;  %v563_v23 = vpop.f32.mrb[6].mxu1 }
 0x1ff   :  { %v566_v24 = vadd.f32 %v620_v15, %v520_v18  ;;  %v524_v26 = vpop.f32.mrb[7].mxu0  ;;  %v707_v27 = vpop.f32.mrb[7].mxu1 }
 0x200   :  { %v573_v29 = vadd.f32 %v621_v25, %v522_v21 }
 0x201   :  { %v647_v28 = vmul.f32 -1.442695, %v566_v24 }
 0x202   :  { %v648_v30 = vmul.f32 -1.442695, %v573_v29 }
 0x203   :  { %762 = vpow2.f32 %v647_v28 }
 0x204   :  { %764 = vpow2.f32 %v648_v30 }
 0x20d   :  { %v763_v31 = vpop.eup %762 }
 0x20e   :  { %v570_v32 = vadd.f32 1.0, %v763_v31  ;;  %v765_v33 = vpop.eup %764 }
 0x20f   :  { %v577_v35 = vadd.f32 1.0, %v765_v33 }
 0x210   :  { %766 = vrcp.f32 %v570_v32 }
 0x211   :  { %768 = vrcp.f32 %v577_v35 }
 0x21a   :  { %v767_v37 = vpop.eup %766 }
 0x21b   :  { %v580_v39 = vmul.f32 %v767_v37, %v561_v36  ;;  %v769_v41 = vpop.eup %768 }
 0x21c   :  { %v583_v42 = vsub.f32 1.0, %v769_v41  ;;  %v585_v45 = vmul.f32 %v769_v41, %v299_v10 }
 0x21d   :  { %v581_v40 = vadd.f32 %v622_v38, %v580_v39 }
 0x21f   :  { %770 = vtanh.f32 %v581_v40 }
 0x229   :  { %v771_v43 = vpop.eup %770 }
 0x22a   :  { %v584_v44 = vmul.f32 %v771_v43, %v583_v42 }
 0x22c   :  { %v586_v46 = vadd.f32 %v585_v45, %v584_v44 }
 0x22e   :  { %649 = vst [vmem:[%s950_s3 + $0x8] sm:$0xff] %v586_v46 }

// kernel: deepspeech2_forward.22
= control target key start
LH: loop header
LB: loop body
LE: loop exit
PB: predicated region body
PF: predicated region fallthrough
CT: control target
= control target key end

     0   :  { %v772_v1 = vmov 0.0   ;;  %v773_v2 = vmov 0   ;;  %vm774_vm0 = vmmov 0   ;;  %v775_v25 = vmov 0.0|0.0   ;;  %s947_s1 = inlined_call_operand.vmem [shape: bf16[128,384], index: 1, kind: input, shape index: {}]   ;;  %s948_s2 = inlined_call_operand.vmem [shape: f32[1,384], index: 2, kind: input, shape index: {}]   ;;  %s949_s0 = inlined_call_operand.vmem [shape: f32[2,8,384], index: 0, kind: input, shape index: {}]   ;;  %s950_s3 = inlined_call_operand.vmem [shape: f32[2,8,128], index: 3, kind: output, shape index: {}]  }
   0x1   :  { %v712_v0 = vld [vmem:[%s947_s1 + $0x4] ss:$12 sps:$4 sm:$0xff]   ;;  %668 = vmatprep.subr.bf16.mxu1 %v772_v1  ;;  %231 = vmatprep.mubr.bf16.mxu0 %v773_v2  ;;  %v714_v3 = vld [vmem:[%s947_s1] ss:$12 sps:$4 sm:$0xff]   ;;  %v715_v4 = vld [vmem:[%s947_s1 + $0x1c] ss:$12 sps:$4 sm:$0xff]   ;;  %v56_v35 = vlaneseq }
   0x2   :  { %684 = vmatprep.mubr.msk.bf16.mxu1 %vm774_vm0, %v772_v1  ;;  %199 = vmatprep.subr.bf16.mxu0 %v712_v0  ;;  %v717_v5 = vld [vmem:[%s947_s1 + $0x18] ss:$12 sps:$4 sm:$0xff]   ;;  %v718_v6 = vld [vmem:[%s947_s1 + $0x34] ss:$12 sps:$4 sm:$0xff]   ;;  %v720_v7 = vld [vmem:[%s947_s1 + $0x30] ss:$12 sps:$4 sm:$0xff]  }
   0x3   :  { %200 = vmatpush1.bf16.msra.mxu0 %v714_v3  ;;  %v721_v8 = vld [vmem:[%s947_s1 + $0x4c] ss:$12 sps:$4 sm:$0xff]   ;;  %v733_v9 = vld [vmem:[%s947_s1 + $0x8] ss:$12 sps:$4 sm:$0xff]   ;;  %v724_v11 = vld [vmem:[%s947_s1 + $0x64] ss:$12 sps:$4 sm:$0xff]  }
   0x4   :  { %201 = vmatprep.subr.bf16.mxu0 %v715_v4  ;;  %v723_v10 = vld [vmem:[%s947_s1 + $0x48] ss:$12 sps:$4 sm:$0xff]   ;;  %669 = vmatpush3.bf16.msra.mxu1 %v733_v9  ;;  %v737_v12 = vld [vmem:[%s947_s1 + $0x20] ss:$12 sps:$4 sm:$0xff]   ;;  %v738_v15 = vld [vmem:[%s947_s1 + $0x38] ss:$12 sps:$4 sm:$0xff]  }
   0x5   :  { %670 = vmatprep.subr.bf16.mxu1 %v772_v1  ;;  %v726_v13 = vld [vmem:[%s947_s1 + $0x60] ss:$12 sps:$4 sm:$0xff]   ;;  %v727_v14 = vld [vmem:[%s947_s1 + $0x7c] ss:$12 sps:$4 sm:$0xff]   ;;  %v729_v16 = vld [vmem:[%s947_s1 + $0x78] ss:$12 sps:$4 sm:$0xff]  }
   0x6   :  { %v730_v17 = vld [vmem:[%s947_s1 + $0x94] ss:$12 sps:$4 sm:$0xff]   ;;  %v739_v18 = vld [vmem:[%s947_s1 + $0x50] ss:$12 sps:$4 sm:$0xff]   ;;  %v734_v20 = vld [vmem:[%s947_s1 + $0xac] ss:$12 sps:$4 sm:$0xff]  }
   0x7   :  { %202 = vmatpush1.bf16.msra.mxu0 %v717_v5  ;;  %v732_v19 = vld [vmem:[%s947_s1 + $0x90] ss:$12 sps:$4 sm:$0xff]   ;;  %v740_v21 = vld [vmem:[%s947_s1 + $0x68] ss:$12 sps:$4 sm:$0xff]   ;;  %v741_v23 = vld [vmem:[%s947_s1 + $0x80] ss:$12 sps:$4 sm:$0xff]  }
   0x8   :  { %203 = vmatprep.subr.bf16.mxu0 %v718_v6  ;;  %671 = vmatpush3.bf16.msra.mxu1 %v737_v12  ;;  %v736_v22 = vld [vmem:[%s947_s1 + $0xa8] ss:$12 sps:$4 sm:$0xff]   ;;  %v742_v24 = vld [vmem:[%s947_s1 + $0x98] ss:$12 sps:$4 sm:$0xff]   ;;  %v743_v26 = vld [vmem:[%s947_s1 + $0xb0] ss:$12 sps:$4 sm:$0xff]  }
   0x9   :  { %672 = vmatprep.subr.bf16.mxu1 %v772_v1  ;;  %v744_v27 = vld [vmem:[%s947_s1 + $0x8] ss:$12 sps:$4 sm:$0xff]   ;;  %v745_v28 = vld [vmem:[%s947_s1 + $0x20] ss:$12 sps:$4 sm:$0xff]   ;;  %v746_v29 = vld [vmem:[%s947_s1 + $0x38] ss:$12 sps:$4 sm:$0xff]  }
   0xa   :  { %v747_v30 = vld [vmem:[%s947_s1 + $0x50] ss:$12 sps:$4 sm:$0xff]   ;;  %v748_v31 = vld [vmem:[%s947_s1 + $0x68] ss:$12 sps:$4 sm:$0xff]   ;;  %v749_v32 = vld [vmem:[%s947_s1 + $0x80] ss:$12 sps:$4 sm:$0xff]  }
   0xb   :  { %204 = vmatpush1.bf16.msra.mxu0 %v720_v7  ;;  %v750_v33 = vld [vmem:[%s947_s1 + $0x98] ss:$12 sps:$4 sm:$0xff]   ;;  %v751_v34 = vld [vmem:[%s947_s1 + $0xb0] ss:$12 sps:$4 sm:$0xff]   ;;  %v912_v36 = vshrl.u32 %v56_v35, 7 }
   0xc   :  { %205 = vmatprep.subr.bf16.mxu0 %v721_v8  ;;  %673 = vmatpush3.bf16.msra.mxu1 %v738_v15  ;;  %v54_v38 = vld [vmem:[%s948_s2] sm:$0x7]  ;;  %v594_v42 = vld [vmem:[%s949_s0 + $0x18] sm:$0xff] }
   0xd   :  { %674 = vmatprep.subr.bf16.mxu1 %v772_v1  ;;  %v58_v37 = vsub.s32 0, %v912_v36  ;;  %v62_v39 = vsub.s32 1, %v912_v36  ;;  %v595_v49 = vld [vmem:[%s949_s0 + $0x20] sm:$0xff]  ;;  %v66_v60 = vsub.s32 2, %v912_v36 }
   0xe   :  { %v341_v12 = vld [vmem:[%s948_s2] sm:$0x7] }
   0xf   :  { %206 = vmatpush1.bf16.msra.mxu0 %v723_v10  ;;  %v59_v40 = vrot.slane %v54_v38, %v58_v37  ;;  %v63_v41 = vrot.slane %v54_v38, %v62_v39  ;;  %v67_v61 = vrot.slane %v54_v38, %v66_v60  ;;  %v304_v15 = vld [vmem:[%s949_s0] sm:$0xff]  ;;  %v306_v38 = vld [vmem:[%s949_s0 + $0x10] sm:$0xff] }
  0x10   :  { %207 = vmatprep.subr.bf16.mxu0 %v724_v11  ;;  %675 = vmatpush3.bf16.msra.mxu1 %v739_v18 }
  0x11   :  { %676 = vmatprep.subr.bf16.mxu1 %v772_v1 }
  0x13   :  { %208 = vmatpush1.bf16.msra.mxu0 %v726_v13 }
  0x14   :  { %209 = vmatprep.subr.bf16.mxu0 %v727_v14  ;;  %677 = vmatpush3.bf16.msra.mxu1 %v740_v21 }
  0x15   :  { %678 = vmatprep.subr.bf16.mxu1 %v772_v1 }
  0x17   :  { %210 = vmatpush1.bf16.msra.mxu0 %v729_v16 }
  0x18   :  { %211 = vmatprep.subr.bf16.mxu0 %v730_v17  ;;  %679 = vmatpush3.bf16.msra.mxu1 %v741_v23 }
  0x19   :  { %680 = vmatprep.subr.bf16.mxu1 %v772_v1 }
  0x1b   :  { %212 = vmatpush1.bf16.msra.mxu0 %v732_v19 }
  0x1c   :  { %213 = vmatprep.subr.bf16.mxu0 %v734_v20  ;;  %681 = vmatpush3.bf16.msra.mxu1 %v742_v24 }
  0x1d   :  { %682 = vmatprep.subr.bf16.mxu1 %v772_v1 }
  0x1f   :  { %214 = vmatpush1.bf16.msra.mxu0 %v736_v22 }
  0x20   :  { %486 = vmatprep.subr.bf16.mxu0 %v712_v0  ;;  %683 = vmatpush3.bf16.msra.mxu1 %v743_v26 }
  0x21   :  { %688 = vmatprep.subr.bf16.mxu1 %v772_v1 }
  0x22   :  { %232 = vmatmul.mubr.bf16.vlgmr.msra.gmra.mrb[0].mxu0 %v775_v25 }
  0x23   :  { %487 = vmatpush1.bf16.msra.mxu0 %v714_v3  ;;  %518 = vmatprep.mubr.bf16.mxu0 %v773_v2  ;;  %v596_v2 = vld [vmem:[%s949_s0 + $0x28] sm:$0xff] }
  0x24   :  { %488 = vmatprep.subr.bf16.mxu0 %v715_v4  ;;  %685 = vmatmul.mubr.bf16.vlgmr.msra.gmra.mrb[0].mxu1 %v775_v25  ;;  %v305_v25 = vld [vmem:[%s949_s0 + $0x8] sm:$0xff] }
  0x25   :  { %704 = vmatprep.mubr.msk.bf16.mxu1 %vm774_vm0, %v772_v1  ;;  %689 = vmatpush3.bf16.msra.mxu1 %v744_v27 }
  0x26   :  { %690 = vmatprep.subr.bf16.mxu1 %v772_v1 }
  0x27   :  { %489 = vmatpush1.bf16.msra.mxu0 %v717_v5 }
  0x28   :  { %490 = vmatprep.subr.bf16.mxu0 %v718_v6 }
  0x29   :  { %691 = vmatpush3.bf16.msra.mxu1 %v745_v28 }
  0x2a   :  { %692 = vmatprep.subr.bf16.mxu1 %v772_v1 }
  0x2b   :  { %491 = vmatpush1.bf16.msra.mxu0 %v720_v7 }
  0x2c   :  { %492 = vmatprep.subr.bf16.mxu0 %v721_v8 }
  0x2d   :  { %693 = vmatpush3.bf16.msra.mxu1 %v746_v29 }
  0x2e   :  { %694 = vmatprep.subr.bf16.mxu1 %v772_v1 }
  0x2f   :  { %493 = vmatpush1.bf16.msra.mxu0 %v723_v10 }
  0x30   :  { %494 = vmatprep.subr.bf16.mxu0 %v724_v11 }
  0x31   :  { %695 = vmatpush3.bf16.msra.mxu1 %v747_v30 }
  0x32   :  { %696 = vmatprep.subr.bf16.mxu1 %v772_v1 }
  0x33   :  { %495 = vmatpush1.bf16.msra.mxu0 %v726_v13  ;;  %v346_v13 = vrot.slane %v341_v12, %v58_v37 }
  0x34   :  { %496 = vmatprep.subr.bf16.mxu0 %v727_v14  ;;  %v350_v14 = vrot.slane %v341_v12, %v62_v39 }
  0x35   :  { %697 = vmatpush3.bf16.msra.mxu1 %v748_v31 }
  0x36   :  { %698 = vmatprep.subr.bf16.mxu1 %v772_v1 }
  0x37   :  { %497 = vmatpush1.bf16.msra.mxu0 %v729_v16 }
  0x38   :  { %498 = vmatprep.subr.bf16.mxu0 %v730_v17 }
  0x39   :  { %699 = vmatpush3.bf16.msra.mxu1 %v749_v32 }
  0x3a   :  { %700 = vmatprep.subr.bf16.mxu1 %v772_v1 }
  0x3b   :  { %499 = vmatpush1.bf16.msra.mxu0 %v732_v19 }
  0x3c   :  { %500 = vmatprep.subr.bf16.mxu0 %v734_v20 }
  0x3d   :  { %701 = vmatpush3.bf16.msra.mxu1 %v750_v33 }
  0x3e   :  { %702 = vmatprep.subr.bf16.mxu1 %v772_v1 }
  0x3f   :  { %501 = vmatpush1.bf16.msra.mxu0 %v736_v22 }
  0x41   :  { %703 = vmatpush3.bf16.msra.mxu1 %v751_v34  ;;  %v354_v34 = vrot.slane %v341_v12, %v66_v60 }
  0xf5   :  { %v233_v43 = vpop.f32.mrb[0].mxu0 }
  0xf6   :  { %v234_v44 = vadd.f32 %v233_v43, %v59_v40  ;;  %v235_v45 = vpop.f32.mrb[1].mxu0 }
  0xf7   :  { %v236_v46 = vadd.f32 %v235_v45, %v63_v41  ;;  %v237_v47 = vpop.f32.mrb[2].mxu0  ;;  %v274_v53 = vpop.f32.mrb[0].mxu1 }
  0xf8   :  { %v280_v48 = vadd.f32 %v594_v42, %v234_v44  ;;  %v238_v50 = vpop.f32.mrb[3].mxu0  ;;  %v686_v55 = vpop.f32.mrb[1].mxu1  ;;  %v275_v0 = vadd.f32 %v274_v53, %v67_v61 }
  0xf9   :  { %v287_v52 = vadd.f32 %v595_v49, %v236_v46  ;;  %v277_v56 = vpop.f32.mrb[2].mxu1 }
  0xfa   :  { %v621_v51 = vmul.f32 -1.442695, %v280_v48  ;;  %v687_v57 = vpop.f32.mrb[3].mxu1 }
  0xfb   :  { %v622_v54 = vmul.f32 -1.442695, %v287_v52 }
  0xfc   :  { %752 = vpow2.f32 %v621_v51 }
  0xfd   :  { %754 = vpow2.f32 %v622_v54 }
 0x106   :  { %v753_v58 = vpop.eup %752 }
 0x107   :  { %v284_v59 = vadd.f32 1.0, %v753_v58  ;;  %v755_v62 = vpop.eup %754 }
 0x108   :  { %v291_v63 = vadd.f32 1.0, %v755_v62 }
 0x109   :  { %756 = vrcp.f32 %v284_v59 }
 0x10a   :  { %758 = vrcp.f32 %v291_v63 }
 0x113   :  { %v757_v1 = vpop.eup %756 }
 0x114   :  { %v294_v3 = vmul.f32 %v757_v1, %v275_v0  ;;  %v759_v5 = vpop.eup %758 }
 0x115   :  { %v297_v6 = vsub.f32 1.0, %v759_v5  ;;  %v299_v9 = vmul.f32 0.0, %v759_v5 }
 0x116   :  { %v295_v4 = vadd.f32 %v596_v2, %v294_v3 }
 0x118   :  { %760 = vtanh.f32 %v295_v4 }
 0x122   :  { %v761_v7 = vpop.eup %760 }
 0x123   :  { %v298_v8 = vmul.f32 %v761_v7, %v297_v6 }
 0x125   :  { %v300_v10 = vadd.f32 %v299_v9, %v298_v8 }
 0x127   :  { %623 = vst [vmem:[%s950_s3 + $0x8] sm:$0xff] %v300_v10  ;;  %v308_v11 = vpack.c.bf16 %v300_v10, %v300_v10 }
 0x129   :  { %519 = vmatmul.mubr.bf16.vlgmr.msra.gmra.mrb[4].mxu0 %v308_v11  ;;  %705 = vmatmul.mubr.bf16.vlgmr.msra.gmra.mrb[4].mxu1 %v308_v11 }
 0x1fc   :  { %v520_v16 = vpop.f32.mrb[4].mxu0  ;;  %v561_v17 = vpop.f32.mrb[4].mxu1 }
 0x1fd   :  { %v521_v18 = vadd.f32 %v520_v16, %v346_v13  ;;  %v522_v19 = vpop.f32.mrb[5].mxu0  ;;  %v706_v20 = vpop.f32.mrb[5].mxu1  ;;  %v562_v36 = vadd.f32 %v561_v17, %v354_v34 }
 0x1fe   :  { %v523_v21 = vadd.f32 %v522_v19, %v350_v14  ;;  %v524_v22 = vpop.f32.mrb[6].mxu0  ;;  %v564_v23 = vpop.f32.mrb[6].mxu1 }
 0x1ff   :  { %v567_v24 = vadd.f32 %v521_v18, %v304_v15  ;;  %v525_v26 = vpop.f32.mrb[7].mxu0  ;;  %v707_v27 = vpop.f32.mrb[7].mxu1 }
 0x200   :  { %v574_v29 = vadd.f32 %v523_v21, %v305_v25 }
 0x201   :  { %v648_v28 = vmul.f32 -1.442695, %v567_v24 }
 0x202   :  { %v649_v30 = vmul.f32 -1.442695, %v574_v29 }
 0x203   :  { %762 = vpow2.f32 %v648_v28 }
 0x204   :  { %764 = vpow2.f32 %v649_v30 }
 0x20d   :  { %v763_v31 = vpop.eup %762 }
 0x20e   :  { %v571_v32 = vadd.f32 1.0, %v763_v31  ;;  %v765_v33 = vpop.eup %764 }
 0x20f   :  { %v578_v35 = vadd.f32 1.0, %v765_v33 }
 0x210   :  { %766 = vrcp.f32 %v571_v32 }
 0x211   :  { %768 = vrcp.f32 %v578_v35 }
 0x21a   :  { %v767_v37 = vpop.eup %766 }
 0x21b   :  { %v581_v39 = vmul.f32 %v767_v37, %v562_v36  ;;  %v769_v41 = vpop.eup %768 }
 0x21c   :  { %v584_v42 = vsub.f32 1.0, %v769_v41  ;;  %v586_v45 = vmul.f32 %v769_v41, %v300_v10 }
 0x21d   :  { %v582_v40 = vadd.f32 %v581_v39, %v306_v38 }
 0x21f   :  { %770 = vtanh.f32 %v582_v40 }
 0x229   :  { %v771_v43 = vpop.eup %770 }
 0x22a   :  { %v585_v44 = vmul.f32 %v771_v43, %v584_v42 }
 0x22c   :  { %v587_v46 = vadd.f32 %v586_v45, %v585_v44 }
 0x22e   :  { %589 = vst [vmem:[%s950_s3] sm:$0xff] %v587_v46 }

// kernel: deepspeech2_forward.19
= control target key start
LH: loop header
LB: loop body
LE: loop exit
PB: predicated region body
PF: predicated region fallthrough
CT: control target
= control target key end

     0   :  { %s11071_s1 = inlined_call_operand.vmem [shape: bf16[7424,128], index: 1, kind: input, shape index: {}]   ;;  %s11072_s0 = inlined_call_operand.vmem [shape: bf16[48,7424], index: 0, kind: input, shape index: {}]   ;;  %s11073_s4 = inlined_call_operand.vmem [shape: f32[48,1], index: 4, kind: input, shape index: {}]   ;;  %s11074_s2 = inlined_call_operand.vmem [shape: f32[1,128], index: 2, kind: input, shape index: {}]   ;;  %s11075_s3 = inlined_call_operand.vmem [shape: f32[1,128], index: 3, kind: input, shape index: {}]   ;;  %s11076_s5 = inlined_call_operand.vmem [shape: bf16[48,128], index: 5, kind: output, shape index: {}]  }
   0x1   :  { %v8218_v0 = vld [vmem:[%s11071_s1 + $0x40] sm:$0xff]   ;;  %v8222_v4 = vld [vmem:[%s11071_s1 + $0x48] sm:$0xff]   ;;  %v8226_v8 = vld [vmem:[%s11071_s1 + $0x50] sm:$0xff]  }
   0x2   :  { %v8219_v1 = vld [vmem:[%s11071_s1 + $0xc0] sm:$0xff]   ;;  %7213 = vmatprep.subr.bf16.mxu0 %v8218_v0  ;;  %v8223_v5 = vld [vmem:[%s11071_s1 + $0xc8] sm:$0xff]   ;;  %v8227_v9 = vld [vmem:[%s11071_s1 + $0xd0] sm:$0xff]  }
   0x3   :  { %v8220_v2 = vld [vmem:[%s11071_s1] sm:$0xff]   ;;  %7247 = vmatprep.subr.bf16.mxu1 %v8219_v1  ;;  %v8224_v6 = vld [vmem:[%s11071_s1 + $0x8] sm:$0xff]   ;;  %v8228_v10 = vld [vmem:[%s11071_s1 + $0x10] sm:$0xff]  }
   0x4   :  { %v8221_v3 = vld [vmem:[%s11071_s1 + $0x80] sm:$0xff]   ;;  %7214 = vmatpush3.bf16.msra.mxu0 %v8220_v2  ;;  %v8225_v7 = vld [vmem:[%s11071_s1 + $0x88] sm:$0xff]   ;;  %v8229_v11 = vld [vmem:[%s11071_s1 + $0x90] sm:$0xff]  }
   0x5   :  { %7248 = vmatpush3.bf16.msra.mxu1 %v8221_v3  ;;  %7215 = vmatprep.subr.bf16.mxu0 %v8222_v4  ;;  %v8230_v12 = vld [vmem:[%s11071_s1 + $0x58] sm:$0xff]   ;;  %v8234_v16 = vld [vmem:[%s11071_s1 + $0x60] sm:$0xff]   ;;  %v8238_v20 = vld [vmem:[%s11071_s1 + $0x68] sm:$0xff]  }
   0x6   :  { %7249 = vmatprep.subr.bf16.mxu1 %v8223_v5  ;;  %v8231_v13 = vld [vmem:[%s11071_s1 + $0xd8] sm:$0xff]   ;;  %v8235_v17 = vld [vmem:[%s11071_s1 + $0xe0] sm:$0xff]   ;;  %v8239_v21 = vld [vmem:[%s11071_s1 + $0xe8] sm:$0xff]  }
   0x7   :  { %v8232_v14 = vld [vmem:[%s11071_s1 + $0x18] sm:$0xff]   ;;  %v8236_v18 = vld [vmem:[%s11071_s1 + $0x20] sm:$0xff]   ;;  %v8240_v22 = vld [vmem:[%s11071_s1 + $0x28] sm:$0xff]  }
   0x8   :  { %7216 = vmatpush3.bf16.msra.mxu0 %v8224_v6  ;;  %v8233_v15 = vld [vmem:[%s11071_s1 + $0x98] sm:$0xff]   ;;  %v8237_v19 = vld [vmem:[%s11071_s1 + $0xa0] sm:$0xff]   ;;  %v8241_v23 = vld [vmem:[%s11071_s1 + $0xa8] sm:$0xff]  }
   0x9   :  { %7250 = vmatpush3.bf16.msra.mxu1 %v8225_v7  ;;  %7217 = vmatprep.subr.bf16.mxu0 %v8226_v8  ;;  %v8242_v24 = vld [vmem:[%s11071_s1 + $0x70] sm:$0xff]   ;;  %v8246_v28 = vld [vmem:[%s11071_s1 + $0x78] sm:$0xff]   ;;  %v8250_v32 = vld [vmem:[%s11072_s0] ss:$232 sps:$4 sm:$0xff]  }
   0xa   :  { %7251 = vmatprep.subr.bf16.mxu1 %v8227_v9  ;;  %v8243_v25 = vld [vmem:[%s11071_s1 + $0xf0] sm:$0xff]   ;;  %v8247_v29 = vld [vmem:[%s11071_s1 + $0xf8] sm:$0xff]   ;;  %v8252_v33 = vld [vmem:[%s11072_s0 + $0x4] ss:$232 sps:$4 sm:$0xff]  }
   0xb   :  { %v8244_v26 = vld [vmem:[%s11071_s1 + $0x30] sm:$0xff]   ;;  %v8248_v30 = vld [vmem:[%s11071_s1 + $0x38] sm:$0xff]   ;;  %4809 = vmatprep.mubr.bf16.mxu0 %v8252_v33  ;;  %v8256_v36 = vld [vmem:[%s11071_s1 + $0x140] sm:$0xff]  }
   0xc   :  { %7218 = vmatpush3.bf16.msra.mxu0 %v8228_v10  ;;  %v8245_v27 = vld [vmem:[%s11071_s1 + $0xb0] sm:$0xff]   ;;  %v8249_v31 = vld [vmem:[%s11071_s1 + $0xb8] sm:$0xff]   ;;  %v8257_v37 = vld [vmem:[%s11071_s1 + $0x1c0] sm:$0xff]  }
   0xd   :  { %7252 = vmatpush3.bf16.msra.mxu1 %v8229_v11  ;;  %7219 = vmatprep.subr.bf16.mxu0 %v8230_v12  ;;  %v8253_v34 = vld [vmem:[%s11072_s0 + $0x8] ss:$232 sps:$4 sm:$0xff]   ;;  %v8255_v35 = vld [vmem:[%s11072_s0 + $0xc] ss:$232 sps:$4 sm:$0xff]   ;;  %v8258_v38 = vld [vmem:[%s11071_s1 + $0x100] sm:$0xff]  }
   0xe   :  { %7253 = vmatprep.subr.bf16.mxu1 %v8231_v13  ;;  %4866 = vmatprep.mubr.bf16.mxu1 %v8255_v35  ;;  %v8259_v39 = vld [vmem:[%s11071_s1 + $0x180] sm:$0xff]   ;;  %v8260_v40 = vld [vmem:[%s11071_s1 + $0x148] sm:$0xff]   ;;  %v8264_v44 = vld [vmem:[%s11071_s1 + $0x150] sm:$0xff]  }
   0xf   :  { %v8261_v41 = vld [vmem:[%s11071_s1 + $0x1c8] sm:$0xff]   ;;  %v8265_v45 = vld [vmem:[%s11071_s1 + $0x1d0] sm:$0xff]   ;;  %v8268_v48 = vld [vmem:[%s11071_s1 + $0x158] sm:$0xff]  }
  0x10   :  { %7220 = vmatpush3.bf16.msra.mxu0 %v8232_v14  ;;  %v8262_v42 = vld [vmem:[%s11071_s1 + $0x108] sm:$0xff]   ;;  %v8266_v46 = vld [vmem:[%s11071_s1 + $0x110] sm:$0xff]   ;;  %v8269_v49 = vld [vmem:[%s11071_s1 + $0x1d8] sm:$0xff]  }
  0x11   :  { %7254 = vmatpush3.bf16.msra.mxu1 %v8233_v15  ;;  %7221 = vmatprep.subr.bf16.mxu0 %v8234_v16  ;;  %v8263_v43 = vld [vmem:[%s11071_s1 + $0x188] sm:$0xff]   ;;  %v8267_v47 = vld [vmem:[%s11071_s1 + $0x190] sm:$0xff]   ;;  %v8272_v51 = vld [vmem:[%s11072_s0 + $0x1dc] ss:$232 sps:$4 sm:$0xff]  }
  0x12   :  { %7255 = vmatprep.subr.bf16.mxu1 %v8235_v17  ;;  %v8270_v50 = vld [vmem:[%s11072_s0 + $0x1d4] ss:$232 sps:$4 sm:$0xff]   ;;  %v8276_v54 = vld [vmem:[%s11072_s0 + $0x1d0] ss:$232 sps:$4 sm:$0xff]   ;;  %v8278_v56 = vld [vmem:[%s11071_s1 + $0x160] sm:$0xff]  }
  0x13   :  { %v8274_v52 = vld [vmem:[%s11071_s1 + $0x118] sm:$0xff]   ;;  %v8279_v57 = vld [vmem:[%s11071_s1 + $0x1e0] sm:$0xff]   ;;  %v8282_v60 = vld [vmem:[%s11071_s1 + $0x168] sm:$0xff]  }
  0x14   :  { %7222 = vmatpush3.bf16.msra.mxu0 %v8236_v18  ;;  %v8275_v53 = vld [vmem:[%s11071_s1 + $0x198] sm:$0xff]   ;;  %v8280_v58 = vld [vmem:[%s11071_s1 + $0x120] sm:$0xff]   ;;  %v8283_v61 = vld [vmem:[%s11071_s1 + $0x1e8] sm:$0xff]  }
  0x15   :  { %7256 = vmatpush3.bf16.msra.mxu1 %v8237_v19  ;;  %7223 = vmatprep.subr.bf16.mxu0 %v8238_v20  ;;  %v8277_v55 = vld [vmem:[%s11072_s0 + $0x1d8] ss:$232 sps:$4 sm:$0xff]   ;;  %v8284_v62 = vld [vmem:[%s11072_s0 + $0x3a4] ss:$232 sps:$4 sm:$0xff]   ;;  %v8291_v3 = vld [vmem:[%s11072_s0 + $0x3a8] ss:$232 sps:$4 sm:$0xff]  }
  0x16   :  { %7257 = vmatprep.subr.bf16.mxu1 %v8239_v21  ;;  %v8281_v59 = vld [vmem:[%s11071_s1 + $0x1a0] sm:$0xff]   ;;  %v8286_v63 = vld [vmem:[%s11072_s0 + $0x3ac] ss:$232 sps:$4 sm:$0xff]   ;;  %v8296_v8 = vld [vmem:[%s11071_s1 + $0x178] sm:$0xff]  }
  0x17   :  { %v8288_v0 = vld [vmem:[%s11071_s1 + $0x128] sm:$0xff]   ;;  %v8292_v4 = vld [vmem:[%s11071_s1 + $0x170] sm:$0xff]   ;;  %v8297_v9 = vld [vmem:[%s11071_s1 + $0x1f8] sm:$0xff]  }
  0x18   :  { %7224 = vmatpush3.bf16.msra.mxu0 %v8240_v22  ;;  %v8289_v1 = vld [vmem:[%s11071_s1 + $0x1a8] sm:$0xff]   ;;  %v8293_v5 = vld [vmem:[%s11071_s1 + $0x1f0] sm:$0xff]   ;;  %v8298_v10 = vld [vmem:[%s11071_s1 + $0x138] sm:$0xff]  }
  0x19   :  { %7258 = vmatpush3.bf16.msra.mxu1 %v8241_v23  ;;  %7225 = vmatprep.subr.bf16.mxu0 %v8242_v24  ;;  %v8290_v2 = vld [vmem:[%s11072_s0 + $0x3a0] ss:$232 sps:$4 sm:$0xff]   ;;  %v8294_v6 = vld [vmem:[%s11071_s1 + $0x130] sm:$0xff]   ;;  %v8299_v11 = vld [vmem:[%s11071_s1 + $0x1b8] sm:$0xff]  }
  0x1a   :  { %7259 = vmatprep.subr.bf16.mxu1 %v8243_v25  ;;  %v8295_v7 = vld [vmem:[%s11071_s1 + $0x1b0] sm:$0xff]   ;;  %v8303_v14 = vld [vmem:[%s11072_s0 + $0x18] ss:$232 sps:$4 sm:$0xff]   ;;  %v8305_v15 = vld [vmem:[%s11072_s0 + $0x1c] ss:$232 sps:$4 sm:$0xff]  }
  0x1b   :  { %v8300_v12 = vld [vmem:[%s11072_s0 + $0x10] ss:$232 sps:$4 sm:$0xff]   ;;  %v8302_v13 = vld [vmem:[%s11072_s0 + $0x14] ss:$232 sps:$4 sm:$0xff]   ;;  %v8306_v16 = vld [vmem:[%s11071_s1 + $0x240] sm:$0xff]  }
  0x1c   :  { %7226 = vmatpush3.bf16.msra.mxu0 %v8244_v26  ;;  %v8307_v17 = vld [vmem:[%s11071_s1 + $0x2c0] sm:$0xff]   ;;  %v8310_v20 = vld [vmem:[%s11071_s1 + $0x248] sm:$0xff]   ;;  %v8317_v26 = vld [vmem:[%s11071_s1 + $0x250] sm:$0xff]  }
  0x1d   :  { %7260 = vmatpush3.bf16.msra.mxu1 %v8245_v27  ;;  %7227 = vmatprep.subr.bf16.mxu0 %v8246_v28  ;;  %v8308_v18 = vld [vmem:[%s11071_s1 + $0x200] sm:$0xff]   ;;  %v8311_v21 = vld [vmem:[%s11071_s1 + $0x2c8] sm:$0xff]   ;;  %v8318_v27 = vld [vmem:[%s11071_s1 + $0x2d0] sm:$0xff]  }
  0x1e   :  { %7261 = vmatprep.subr.bf16.mxu1 %v8247_v29  ;;  %v8309_v19 = vld [vmem:[%s11071_s1 + $0x280] sm:$0xff]   ;;  %v8312_v22 = vld [vmem:[%s11071_s1 + $0x208] sm:$0xff]   ;;  %v8321_v29 = vld [vmem:[%s11071_s1 + $0x210] sm:$0xff]  }
  0x1f   :  { %v8313_v23 = vld [vmem:[%s11071_s1 + $0x288] sm:$0xff]   ;;  %v8325_v33 = vld [vmem:[%s11071_s1 + $0x2d8] sm:$0xff]  }
  0x20   :  { %7228 = vmatpush3.bf16.msra.mxu0 %v8248_v30  ;;  %v8314_v24 = vld [vmem:[%s11072_s0 + $0x1e4] ss:$232 sps:$4 sm:$0xff]   ;;  %v8316_v25 = vld [vmem:[%s11072_s0 + $0x1e0] ss:$232 sps:$4 sm:$0xff]   ;;  %v8322_v30 = vld [vmem:[%s11071_s1 + $0x290] sm:$0xff]  }
  0x21   :  { %7262 = vmatpush3.bf16.msra.mxu1 %v8249_v31  ;;  %7281 = vmatprep.subr.bf16.mxu0 %v8256_v36  ;;  %v8319_v28 = vld [vmem:[%s11072_s0 + $0x1ec] ss:$232 sps:$4 sm:$0xff]   ;;  %v8323_v31 = vld [vmem:[%s11072_s0 + $0x1e8] ss:$232 sps:$4 sm:$0xff]   ;;  %v8327_v35 = vld [vmem:[%s11071_s1 + $0x298] sm:$0xff]  }
  0x22   :  { %7315 = vmatprep.subr.bf16.mxu1 %v8257_v37  ;;  %v8328_v36 = vld [vmem:[%s11072_s0 + $0x3b4] ss:$232 sps:$4 sm:$0xff]   ;;  %v8330_v37 = vld [vmem:[%s11072_s0 + $0x3b0] ss:$232 sps:$4 sm:$0xff]  }
  0x23   :  { %4810 = vmatmul.mubr.bf16.vlgmr.msra.gmra.mrb[0].mxu0 %v8250_v32  ;;  %v8324_v32 = vld [vmem:[%s11071_s1 + $0x258] sm:$0xff]  }
  0x24   :  { %4867 = vmatmul.mubr.bf16.vlgmr.msra.gmra.mrb[0].mxu1 %v8253_v34  ;;  %7282 = vmatpush3.bf16.msra.mxu0 %v8258_v38  ;;  %v8326_v34 = vld [vmem:[%s11071_s1 + $0x218] sm:$0xff]   ;;  %v8331_v38 = vld [vmem:[%s11071_s1 + $0x260] sm:$0xff]  }
  0x25   :  { %7316 = vmatpush3.bf16.msra.mxu1 %v8259_v39  ;;  %7283 = vmatprep.subr.bf16.mxu0 %v8260_v40  ;;  %v8332_v39 = vld [vmem:[%s11071_s1 + $0x2e0] sm:$0xff]  }
  0x26   :  { %7317 = vmatprep.subr.bf16.mxu1 %v8261_v41  ;;  %4817 = vmatprep.mubr.bf16.mxu0 %v8270_v50  ;;  %v8333_v40 = vld [vmem:[%s11072_s0 + $0x3bc] ss:$232 sps:$4 sm:$0xff]   ;;  %v8344_v50 = vld [vmem:[%s11071_s1 + $0x230] sm:$0xff]  }
  0x27   :  { %4874 = vmatprep.mubr.bf16.mxu1 %v8272_v51  ;;  %v8335_v41 = vld [vmem:[%s11071_s1 + $0x220] sm:$0xff]   ;;  %v8345_v51 = vld [vmem:[%s11071_s1 + $0x2b0] sm:$0xff]  }
  0x28   :  { %7284 = vmatpush3.bf16.msra.mxu0 %v8262_v42  ;;  %v8336_v42 = vld [vmem:[%s11071_s1 + $0x2a0] sm:$0xff]  }
  0x29   :  { %7318 = vmatpush3.bf16.msra.mxu1 %v8263_v43  ;;  %7285 = vmatprep.subr.bf16.mxu0 %v8264_v44  ;;  %v8337_v43 = vld [vmem:[%s11072_s0 + $0x3b8] ss:$232 sps:$4 sm:$0xff]   ;;  %v8338_v44 = vld [vmem:[%s11071_s1 + $0x268] sm:$0xff]  }
  0x2a   :  { %7319 = vmatprep.subr.bf16.mxu1 %v8265_v45  ;;  %v8339_v45 = vld [vmem:[%s11071_s1 + $0x2e8] sm:$0xff]  }
  0x2b   :  { %4818 = vmatmul.mubr.bf16.gmra.mrb[4].mxu0 %v8276_v54  ;;  %v8348_v54 = vld [vmem:[%s11071_s1 + $0x238] sm:$0xff]  }
  0x2c   :  { %7286 = vmatpush3.bf16.msra.mxu0 %v8266_v46  ;;  %4875 = vmatmul.mubr.bf16.gmra.mrb[4].mxu1 %v8277_v55  ;;  %v8340_v46 = vld [vmem:[%s11071_s1 + $0x228] sm:$0xff]   ;;  %v8349_v55 = vld [vmem:[%s11071_s1 + $0x2b8] sm:$0xff]  }
  0x2d   :  { %7320 = vmatpush3.bf16.msra.mxu1 %v8267_v47  ;;  %7287 = vmatprep.subr.bf16.mxu0 %v8268_v48  ;;  %v8341_v47 = vld [vmem:[%s11071_s1 + $0x2a8] sm:$0xff]   ;;  %v8342_v48 = vld [vmem:[%s11071_s1 + $0x270] sm:$0xff]  }
  0x2e   :  { %7321 = vmatprep.subr.bf16.mxu1 %v8269_v49  ;;  %4825 = vmatprep.mubr.bf16.mxu0 %v8284_v62  ;;  %v8343_v49 = vld [vmem:[%s11071_s1 + $0x2f0] sm:$0xff]   ;;  %v8358_v62 = vld [vmem:[%s11071_s1 + $0x300] sm:$0xff]  }
  0x2f   :  { %4882 = vmatprep.mubr.bf16.mxu1 %v8286_v63  ;;  %v8359_v63 = vld [vmem:[%s11071_s1 + $0x380] sm:$0xff]  }
  0x30   :  { %7288 = vmatpush3.bf16.msra.mxu0 %v8274_v52  ;;  %v8346_v52 = vld [vmem:[%s11071_s1 + $0x278] sm:$0xff]  }
  0x31   :  { %7322 = vmatpush3.bf16.msra.mxu1 %v8275_v53  ;;  %7289 = vmatprep.subr.bf16.mxu0 %v8278_v56  ;;  %v8347_v53 = vld [vmem:[%s11071_s1 + $0x2f8] sm:$0xff]   ;;  %v8350_v56 = vld [vmem:[%s11072_s0 + $0x20] ss:$232 sps:$4 sm:$0xff]  }
  0x32   :  { %7323 = vmatprep.subr.bf16.mxu1 %v8279_v57  ;;  %v8352_v57 = vld [vmem:[%s11072_s0 + $0x24] ss:$232 sps:$4 sm:$0xff]  }
  0x33   :  { %4826 = vmatmul.mubr.bf16.gmra.mrb[8].mxu0 %v8290_v2  ;;  %v8362_v2 = vld [vmem:[%s11071_s1 + $0x308] sm:$0xff]  }
  0x34   :  { %7290 = vmatpush3.bf16.msra.mxu0 %v8280_v58  ;;  %4883 = vmatmul.mubr.bf16.gmra.mrb[8].mxu1 %v8291_v3  ;;  %v8353_v58 = vld [vmem:[%s11072_s0 + $0x28] ss:$232 sps:$4 sm:$0xff]  }
  0x35   :  { %7324 = vmatpush3.bf16.msra.mxu1 %v8281_v59  ;;  %7291 = vmatprep.subr.bf16.mxu0 %v8282_v60  ;;  %v8355_v59 = vld [vmem:[%s11072_s0 + $0x2c] ss:$232 sps:$4 sm:$0xff]   ;;  %v8356_v60 = vld [vmem:[%s11071_s1 + $0x340] sm:$0xff]  }
  0x36   :  { %7325 = vmatprep.subr.bf16.mxu1 %v8283_v61  ;;  %4923 = vmatprep.mubr.bf16.mxu0 %v8302_v13  ;;  %v8357_v61 = vld [vmem:[%s11071_s1 + $0x3c0] sm:$0xff]   ;;  %v8363_v3 = vld [vmem:[%s11071_s1 + $0x388] sm:$0xff]   ;;  %v8375_v13 = vld [vmem:[%s11071_s1 + $0x3d8] sm:$0xff]  }
  0x37   :  { %4980 = vmatprep.mubr.bf16.mxu1 %v8305_v15  ;;  %v8377_v15 = vld [vmem:[%s11071_s1 + $0x398] sm:$0xff]  }
  0x38   :  { %7292 = vmatpush3.bf16.msra.mxu0 %v8288_v0  ;;  %v8360_v0 = vld [vmem:[%s11071_s1 + $0x348] sm:$0xff]  }
  0x39   :  { %7326 = vmatpush3.bf16.msra.mxu1 %v8289_v1  ;;  %7293 = vmatprep.subr.bf16.mxu0 %v8292_v4  ;;  %v8361_v1 = vld [vmem:[%s11071_s1 + $0x3c8] sm:$0xff]   ;;  %v8364_v4 = vld [vmem:[%s11072_s0 + $0x1f4] ss:$232 sps:$4 sm:$0xff]  }
  0x3a   :  { %7327 = vmatprep.subr.bf16.mxu1 %v8293_v5  ;;  %v8366_v5 = vld [vmem:[%s11072_s0 + $0x1f0] ss:$232 sps:$4 sm:$0xff]  }
  0x3c   :  { %7294 = vmatpush3.bf16.msra.mxu0 %v8294_v6  ;;  %v8367_v6 = vld [vmem:[%s11071_s1 + $0x350] sm:$0xff]  }
  0x3d   :  { %7328 = vmatpush3.bf16.msra.mxu1 %v8295_v7  ;;  %7295 = vmatprep.subr.bf16.mxu0 %v8296_v8  ;;  %v8368_v7 = vld [vmem:[%s11071_s1 + $0x3d0] sm:$0xff]   ;;  %v8369_v8 = vld [vmem:[%s11072_s0 + $0x1fc] ss:$232 sps:$4 sm:$0xff]  }
  0x3e   :  { %7329 = vmatprep.subr.bf16.mxu1 %v8297_v9  ;;  %v8371_v9 = vld [vmem:[%s11071_s1 + $0x310] sm:$0xff]  }
  0x40   :  { %7296 = vmatpush3.bf16.msra.mxu0 %v8298_v10  ;;  %v8372_v10 = vld [vmem:[%s11071_s1 + $0x390] sm:$0xff]  }
  0x41   :  { %7330 = vmatpush3.bf16.msra.mxu1 %v8299_v11  ;;  %7349 = vmatprep.subr.bf16.mxu0 %v8306_v16  ;;  %v8373_v11 = vld [vmem:[%s11072_s0 + $0x1f8] ss:$232 sps:$4 sm:$0xff]   ;;  %v8378_v16 = vld [vmem:[%s11072_s0 + $0x3c4] ss:$232 sps:$4 sm:$0xff]  }
  0x42   :  { %7383 = vmatprep.subr.bf16.mxu1 %v8307_v17  ;;  %v8380_v17 = vld [vmem:[%s11072_s0 + $0x3c0] ss:$232 sps:$4 sm:$0xff]  }
  0x43   :  { %4924 = vmatmul.mubr.bf16.vlgmr.msra.gmra.mrb[12].mxu0 %v8300_v12  ;;  %v8374_v12 = vld [vmem:[%s11071_s1 + $0x358] sm:$0xff]  }
  0x44   :  { %4981 = vmatmul.mubr.bf16.vlgmr.msra.gmra.mrb[12].mxu1 %v8303_v14  ;;  %7350 = vmatpush3.bf16.msra.mxu0 %v8308_v18  ;;  %v8376_v14 = vld [vmem:[%s11071_s1 + $0x318] sm:$0xff]   ;;  %v8381_v18 = vld [vmem:[%s11071_s1 + $0x360] sm:$0xff]  }
  0x45   :  { %7384 = vmatpush3.bf16.msra.mxu1 %v8309_v19  ;;  %7351 = vmatprep.subr.bf16.mxu0 %v8310_v20  ;;  %v8382_v19 = vld [vmem:[%s11071_s1 + $0x3e0] sm:$0xff]   ;;  %v8383_v20 = vld [vmem:[%s11072_s0 + $0x3cc] ss:$232 sps:$4 sm:$0xff]  }
  0x46   :  { %7385 = vmatprep.subr.bf16.mxu1 %v8311_v21  ;;  %4931 = vmatprep.mubr.bf16.mxu0 %v8314_v24  ;;  %v8385_v21 = vld [vmem:[%s11071_s1 + $0x320] sm:$0xff]   ;;  %v8388_v24 = vld [vmem:[%s11071_s1 + $0x368] sm:$0xff]  }
  0x47   :  { %4988 = vmatprep.mubr.bf16.mxu1 %v8319_v28  ;;  %v8392_v28 = vld [vmem:[%s11071_s1 + $0x370] sm:$0xff]  }
  0x48   :  { %7352 = vmatpush3.bf16.msra.mxu0 %v8312_v22  ;;  %v8386_v22 = vld [vmem:[%s11071_s1 + $0x3a0] sm:$0xff]  }
  0x49   :  { %7386 = vmatpush3.bf16.msra.mxu1 %v8313_v23  ;;  %7353 = vmatprep.subr.bf16.mxu0 %v8317_v26  ;;  %v8387_v23 = vld [vmem:[%s11072_s0 + $0x3c8] ss:$232 sps:$4 sm:$0xff]  }
  0x4a   :  { %7387 = vmatprep.subr.bf16.mxu1 %v8318_v27  ;;  %v8390_v26 = vld [vmem:[%s11071_s1 + $0x328] sm:$0xff]  }
  0x4b   :  { %4932 = vmatmul.mubr.bf16.gmra.mrb[16].mxu0 %v8316_v25  ;;  %v8389_v25 = vld [vmem:[%s11071_s1 + $0x3e8] sm:$0xff]  }
  0x4c   :  { %7354 = vmatpush3.bf16.msra.mxu0 %v8321_v29  ;;  %4989 = vmatmul.mubr.bf16.gmra.mrb[16].mxu1 %v8323_v31  ;;  %v8391_v27 = vld [vmem:[%s11071_s1 + $0x3a8] sm:$0xff]   ;;  %v8393_v29 = vld [vmem:[%s11071_s1 + $0x3f0] sm:$0xff]  }
  0x4d   :  { %7388 = vmatpush3.bf16.msra.mxu1 %v8322_v30  ;;  %7355 = vmatprep.subr.bf16.mxu0 %v8324_v32  ;;  %v8394_v30 = vld [vmem:[%s11071_s1 + $0x330] sm:$0xff]   ;;  %v8396_v32 = vld [vmem:[%s11071_s1 + $0x378] sm:$0xff]  }
  0x4e   :  { %7389 = vmatprep.subr.bf16.mxu1 %v8325_v33  ;;  %4939 = vmatprep.mubr.bf16.mxu0 %v8328_v36  ;;  %v8395_v31 = vld [vmem:[%s11071_s1 + $0x3b0] sm:$0xff]   ;;  %v8397_v33 = vld [vmem:[%s11071_s1 + $0x3f8] sm:$0xff]  }
  0x4f   :  { %4996 = vmatprep.mubr.bf16.mxu1 %v8333_v40  ;;  %v8400_v36 = vld [vmem:[%s11072_s0 + $0x30] ss:$232 sps:$4 sm:$0xff]   ;;  %v8406_v40 = vld [vmem:[%s11071_s1 + $0x440] sm:$0xff]  }
  0x50   :  { %7356 = vmatpush3.bf16.msra.mxu0 %v8326_v34  ;;  %v8398_v34 = vld [vmem:[%s11071_s1 + $0x338] sm:$0xff]  }
  0x51   :  { %7390 = vmatpush3.bf16.msra.mxu1 %v8327_v35  ;;  %7357 = vmatprep.subr.bf16.mxu0 %v8331_v38  ;;  %v8399_v35 = vld [vmem:[%s11071_s1 + $0x3b8] sm:$0xff]  }
  0x52   :  { %7391 = vmatprep.subr.bf16.mxu1 %v8332_v39  ;;  %v8403_v38 = vld [vmem:[%s11072_s0 + $0x38] ss:$232 sps:$4 sm:$0xff]   ;;  %v8405_v39 = vld [vmem:[%s11072_s0 + $0x3c] ss:$232 sps:$4 sm:$0xff]  }
  0x53   :  { %4940 = vmatmul.mubr.bf16.gmra.mrb[20].mxu0 %v8330_v37  ;;  %v8402_v37 = vld [vmem:[%s11072_s0 + $0x34] ss:$232 sps:$4 sm:$0xff]  }
  0x54   :  { %7358 = vmatpush3.bf16.msra.mxu0 %v8335_v41  ;;  %4997 = vmatmul.mubr.bf16.gmra.mrb[20].mxu1 %v8337_v43  ;;  %v8407_v41 = vld [vmem:[%s11071_s1 + $0x4c0] sm:$0xff]  }
  0x55   :  { %7392 = vmatpush3.bf16.msra.mxu1 %v8336_v42  ;;  %7359 = vmatprep.subr.bf16.mxu0 %v8338_v44  ;;  %v8408_v42 = vld [vmem:[%s11071_s1 + $0x400] sm:$0xff]   ;;  %v8410_v44 = vld [vmem:[%s11071_s1 + $0x448] sm:$0xff]  }
  0x56   :  { %7393 = vmatprep.subr.bf16.mxu1 %v8339_v45  ;;  %5037 = vmatprep.mubr.bf16.mxu0 %v8352_v57  ;;  %v8409_v43 = vld [vmem:[%s11071_s1 + $0x480] sm:$0xff]   ;;  %v8411_v45 = vld [vmem:[%s11071_s1 + $0x4c8] sm:$0xff]   ;;  %v8425_v57 = vld [vmem:[%s11071_s1 + $0x4d8] sm:$0xff]  }
  0x57   :  { %5094 = vmatprep.mubr.bf16.mxu1 %v8355_v59  ;;  %v8427_v59 = vld [vmem:[%s11071_s1 + $0x498] sm:$0xff]  }
  0x58   :  { %7360 = vmatpush3.bf16.msra.mxu0 %v8340_v46  ;;  %v8412_v46 = vld [vmem:[%s11071_s1 + $0x408] sm:$0xff]  }
  0x59   :  { %7394 = vmatpush3.bf16.msra.mxu1 %v8341_v47  ;;  %7361 = vmatprep.subr.bf16.mxu0 %v8342_v48  ;;  %v8413_v47 = vld [vmem:[%s11071_s1 + $0x488] sm:$0xff]  }
  0x5a   :  { %7395 = vmatprep.subr.bf16.mxu1 %v8343_v49  ;;  %v8414_v48 = vld [vmem:[%s11072_s0 + $0x204] ss:$232 sps:$4 sm:$0xff]   ;;  %v8416_v49 = vld [vmem:[%s11072_s0 + $0x200] ss:$232 sps:$4 sm:$0xff]  }
  0x5c   :  { %7362 = vmatpush3.bf16.msra.mxu0 %v8344_v50  ;;  %v8417_v50 = vld [vmem:[%s11071_s1 + $0x450] sm:$0xff]  }
  0x5d   :  { %7396 = vmatpush3.bf16.msra.mxu1 %v8345_v51  ;;  %7363 = vmatprep.subr.bf16.mxu0 %v8346_v52  ;;  %v8418_v51 = vld [vmem:[%s11071_s1 + $0x4d0] sm:$0xff]  }
  0x5e   :  { %7397 = vmatprep.subr.bf16.mxu1 %v8347_v53  ;;  %v8419_v52 = vld [vmem:[%s11072_s0 + $0x20c] ss:$232 sps:$4 sm:$0xff]  }
  0x5f   :  { %v8421_v53 = vld [vmem:[%s11071_s1 + $0x410] sm:$0xff]  }
  0x60   :  { %7364 = vmatpush3.bf16.msra.mxu0 %v8348_v54  ;;  %v8422_v54 = vld [vmem:[%s11071_s1 + $0x490] sm:$0xff]  }
  0x61   :  { %7398 = vmatpush3.bf16.msra.mxu1 %v8349_v55  ;;  %7417 = vmatprep.subr.bf16.mxu0 %v8356_v60  ;;  %v8423_v55 = vld [vmem:[%s11072_s0 + $0x208] ss:$232 sps:$4 sm:$0xff]   ;;  %v8428_v60 = vld [vmem:[%s11072_s0 + $0x3d4] ss:$232 sps:$4 sm:$0xff]  }
  0x62   :  { %7451 = vmatprep.subr.bf16.mxu1 %v8357_v61  ;;  %v8430_v61 = vld [vmem:[%s11072_s0 + $0x3d0] ss:$232 sps:$4 sm:$0xff]  }
  0x63   :  { %5038 = vmatmul.mubr.bf16.vlgmr.msra.gmra.mrb[24].mxu0 %v8350_v56  ;;  %v8424_v56 = vld [vmem:[%s11071_s1 + $0x458] sm:$0xff]  }
  0x64   :  { %5095 = vmatmul.mubr.bf16.vlgmr.msra.gmra.mrb[24].mxu1 %v8353_v58  ;;  %7418 = vmatpush3.bf16.msra.mxu0 %v8358_v62  ;;  %v8426_v58 = vld [vmem:[%s11071_s1 + $0x418] sm:$0xff]   ;;  %v8431_v62 = vld [vmem:[%s11071_s1 + $0x460] sm:$0xff]  }
  0x65   :  { %7452 = vmatpush3.bf16.msra.mxu1 %v8359_v63  ;;  %7419 = vmatprep.subr.bf16.mxu0 %v8360_v0  ;;  %v8432_v63 = vld [vmem:[%s11071_s1 + $0x4e0] sm:$0xff]  }
  0x66   :  { %7453 = vmatprep.subr.bf16.mxu1 %v8361_v1  ;;  %5045 = vmatprep.mubr.bf16.mxu0 %v8364_v4  ;;  %v8433_v0 = vld [vmem:[%s11072_s0 + $0x3dc] ss:$232 sps:$4 sm:$0xff]   ;;  %v8438_v4 = vld [vmem:[%s11071_s1 + $0x468] sm:$0xff]  }
  0x67   :  { %5102 = vmatprep.mubr.bf16.mxu1 %v8369_v8  ;;  %v8435_v1 = vld [vmem:[%s11071_s1 + $0x420] sm:$0xff]   ;;  %v8442_v8 = vld [vmem:[%s11071_s1 + $0x470] sm:$0xff]  }
  0x68   :  { %7420 = vmatpush3.bf16.msra.mxu0 %v8362_v2  ;;  %v8436_v2 = vld [vmem:[%s11071_s1 + $0x4a0] sm:$0xff]  }
  0x69   :  { %7454 = vmatpush3.bf16.msra.mxu1 %v8363_v3  ;;  %7421 = vmatprep.subr.bf16.mxu0 %v8367_v6  ;;  %v8437_v3 = vld [vmem:[%s11072_s0 + $0x3d8] ss:$232 sps:$4 sm:$0xff]   ;;  %v8440_v6 = vld [vmem:[%s11071_s1 + $0x428] sm:$0xff]  }
  0x6a   :  { %7455 = vmatprep.subr.bf16.mxu1 %v8368_v7  ;;  %v8441_v7 = vld [vmem:[%s11071_s1 + $0x4a8] sm:$0xff]  }
  0x6b   :  { %5046 = vmatmul.mubr.bf16.gmra.mrb[28].mxu0 %v8366_v5  ;;  %v8439_v5 = vld [vmem:[%s11071_s1 + $0x4e8] sm:$0xff]  }
  0x6c   :  { %7422 = vmatpush3.bf16.msra.mxu0 %v8371_v9  ;;  %5103 = vmatmul.mubr.bf16.gmra.mrb[28].mxu1 %v8373_v11  ;;  %v8443_v9 = vld [vmem:[%s11071_s1 + $0x4f0] sm:$0xff]  }
  0x6d   :  { %7456 = vmatpush3.bf16.msra.mxu1 %v8372_v10  ;;  %7423 = vmatprep.subr.bf16.mxu0 %v8374_v12  ;;  %v8444_v10 = vld [vmem:[%s11071_s1 + $0x430] sm:$0xff]   ;;  %v8446_v12 = vld [vmem:[%s11071_s1 + $0x478] sm:$0xff]  }
  0x6e   :  { %7457 = vmatprep.subr.bf16.mxu1 %v8375_v13  ;;  %5053 = vmatprep.mubr.bf16.mxu0 %v8378_v16  ;;  %v8445_v11 = vld [vmem:[%s11071_s1 + $0x4b0] sm:$0xff]   ;;  %v8447_v13 = vld [vmem:[%s11071_s1 + $0x4f8] sm:$0xff]   ;;  %v8450_v16 = vld [vmem:[%s11072_s0 + $0x40] ss:$232 sps:$4 sm:$0xff]  }
  0x6f   :  { %5110 = vmatprep.mubr.bf16.mxu1 %v8383_v20  ;;  %v8456_v20 = vld [vmem:[%s11071_s1 + $0x540] sm:$0xff]  }
  0x70   :  { %7424 = vmatpush3.bf16.msra.mxu0 %v8376_v14  ;;  %v8448_v14 = vld [vmem:[%s11071_s1 + $0x438] sm:$0xff]  }
  0x71   :  { %7458 = vmatpush3.bf16.msra.mxu1 %v8377_v15  ;;  %7425 = vmatprep.subr.bf16.mxu0 %v8381_v18  ;;  %v8449_v15 = vld [vmem:[%s11071_s1 + $0x4b8] sm:$0xff]   ;;  %v8453_v18 = vld [vmem:[%s11072_s0 + $0x48] ss:$232 sps:$4 sm:$0xff]  }
  0x72   :  { %7459 = vmatprep.subr.bf16.mxu1 %v8382_v19  ;;  %v8455_v19 = vld [vmem:[%s11072_s0 + $0x4c] ss:$232 sps:$4 sm:$0xff]  }
  0x73   :  { %5054 = vmatmul.mubr.bf16.gmra.mrb[32].mxu0 %v8380_v17  ;;  %v8452_v17 = vld [vmem:[%s11072_s0 + $0x44] ss:$232 sps:$4 sm:$0xff]  }
  0x74   :  { %7426 = vmatpush3.bf16.msra.mxu0 %v8385_v21  ;;  %5111 = vmatmul.mubr.bf16.gmra.mrb[32].mxu1 %v8387_v23  ;;  %v8457_v21 = vld [vmem:[%s11071_s1 + $0x5c0] sm:$0xff]  }
  0x75   :  { %7460 = vmatpush3.bf16.msra.mxu1 %v8386_v22  ;;  %7427 = vmatprep.subr.bf16.mxu0 %v8388_v24  ;;  %v8458_v22 = vld [vmem:[%s11071_s1 + $0x500] sm:$0xff]   ;;  %v8460_v24 = vld [vmem:[%s11071_s1 + $0x548] sm:$0xff]  }
  0x76   :  { %7461 = vmatprep.subr.bf16.mxu1 %v8389_v25  ;;  %5151 = vmatprep.mubr.bf16.mxu0 %v8402_v37  ;;  %v8459_v23 = vld [vmem:[%s11071_s1 + $0x580] sm:$0xff]   ;;  %v8461_v25 = vld [vmem:[%s11071_s1 + $0x5c8] sm:$0xff]   ;;  %v8475_v37 = vld [vmem:[%s11071_s1 + $0x5d8] sm:$0xff]  }
  0x77   :  { %5208 = vmatprep.mubr.bf16.mxu1 %v8405_v39  ;;  %v8477_v39 = vld [vmem:[%s11071_s1 + $0x598] sm:$0xff]  }
  0x78   :  { %7428 = vmatpush3.bf16.msra.mxu0 %v8390_v26  ;;  %v8462_v26 = vld [vmem:[%s11071_s1 + $0x508] sm:$0xff]  }
  0x79   :  { %7462 = vmatpush3.bf16.msra.mxu1 %v8391_v27  ;;  %7429 = vmatprep.subr.bf16.mxu0 %v8392_v28  ;;  %v8463_v27 = vld [vmem:[%s11071_s1 + $0x588] sm:$0xff]   ;;  %v8464_v28 = vld [vmem:[%s11072_s0 + $0x214] ss:$232 sps:$4 sm:$0xff]  }
  0x7a   :  { %7463 = vmatprep.subr.bf16.mxu1 %v8393_v29  ;;  %v8466_v29 = vld [vmem:[%s11072_s0 + $0x210] ss:$232 sps:$4 sm:$0xff]  }
  0x7c   :  { %7430 = vmatpush3.bf16.msra.mxu0 %v8394_v30  ;;  %v8467_v30 = vld [vmem:[%s11071_s1 + $0x550] sm:$0xff]  }
  0x7d   :  { %7464 = vmatpush3.bf16.msra.mxu1 %v8395_v31  ;;  %7431 = vmatprep.subr.bf16.mxu0 %v8396_v32  ;;  %v8468_v31 = vld [vmem:[%s11071_s1 + $0x5d0] sm:$0xff]   ;;  %v8469_v32 = vld [vmem:[%s11072_s0 + $0x21c] ss:$232 sps:$4 sm:$0xff]  }
  0x7e   :  { %7465 = vmatprep.subr.bf16.mxu1 %v8397_v33  ;;  %v8471_v33 = vld [vmem:[%s11071_s1 + $0x510] sm:$0xff]  }
  0x80   :  { %7432 = vmatpush3.bf16.msra.mxu0 %v8398_v34  ;;  %v8472_v34 = vld [vmem:[%s11071_s1 + $0x590] sm:$0xff]  }
  0x81   :  { %7466 = vmatpush3.bf16.msra.mxu1 %v8399_v35  ;;  %7485 = vmatprep.subr.bf16.mxu0 %v8406_v40  ;;  %v8473_v35 = vld [vmem:[%s11072_s0 + $0x218] ss:$232 sps:$4 sm:$0xff]   ;;  %v8478_v40 = vld [vmem:[%s11072_s0 + $0x3e4] ss:$232 sps:$4 sm:$0xff]  }
  0x82   :  { %7519 = vmatprep.subr.bf16.mxu1 %v8407_v41  ;;  %v8480_v41 = vld [vmem:[%s11072_s0 + $0x3e0] ss:$232 sps:$4 sm:$0xff]  }
  0x83   :  { %5152 = vmatmul.mubr.bf16.vlgmr.msra.gmra.mrb[36].mxu0 %v8400_v36  ;;  %v8474_v36 = vld [vmem:[%s11071_s1 + $0x558] sm:$0xff]  }
  0x84   :  { %5209 = vmatmul.mubr.bf16.vlgmr.msra.gmra.mrb[36].mxu1 %v8403_v38  ;;  %7486 = vmatpush3.bf16.msra.mxu0 %v8408_v42  ;;  %v8476_v38 = vld [vmem:[%s11071_s1 + $0x518] sm:$0xff]   ;;  %v8481_v42 = vld [vmem:[%s11071_s1 + $0x560] sm:$0xff]  }
  0x85   :  { %7520 = vmatpush3.bf16.msra.mxu1 %v8409_v43  ;;  %7487 = vmatprep.subr.bf16.mxu0 %v8410_v44  ;;  %v8482_v43 = vld [vmem:[%s11071_s1 + $0x5e0] sm:$0xff]   ;;  %v8483_v44 = vld [vmem:[%s11072_s0 + $0x3ec] ss:$232 sps:$4 sm:$0xff]  }
  0x86   :  { %7521 = vmatprep.subr.bf16.mxu1 %v8411_v45  ;;  %5159 = vmatprep.mubr.bf16.mxu0 %v8414_v48  ;;  %v8485_v45 = vld [vmem:[%s11071_s1 + $0x520] sm:$0xff]   ;;  %v8488_v48 = vld [vmem:[%s11071_s1 + $0x568] sm:$0xff]  }
  0x87   :  { %5216 = vmatprep.mubr.bf16.mxu1 %v8419_v52  ;;  %v8492_v52 = vld [vmem:[%s11071_s1 + $0x570] sm:$0xff]  }
  0x88   :  { %7488 = vmatpush3.bf16.msra.mxu0 %v8412_v46  ;;  %v8486_v46 = vld [vmem:[%s11071_s1 + $0x5a0] sm:$0xff]  }
  0x89   :  { %7522 = vmatpush3.bf16.msra.mxu1 %v8413_v47  ;;  %7489 = vmatprep.subr.bf16.mxu0 %v8417_v50  ;;  %v8487_v47 = vld [vmem:[%s11072_s0 + $0x3e8] ss:$232 sps:$4 sm:$0xff]  }
  0x8a   :  { %7523 = vmatprep.subr.bf16.mxu1 %v8418_v51  ;;  %v8490_v50 = vld [vmem:[%s11071_s1 + $0x528] sm:$0xff]  }
  0x8b   :  { %5160 = vmatmul.mubr.bf16.gmra.mrb[40].mxu0 %v8416_v49  ;;  %v8489_v49 = vld [vmem:[%s11071_s1 + $0x5e8] sm:$0xff]  }
  0x8c   :  { %7490 = vmatpush3.bf16.msra.mxu0 %v8421_v53  ;;  %5217 = vmatmul.mubr.bf16.gmra.mrb[40].mxu1 %v8423_v55  ;;  %v8491_v51 = vld [vmem:[%s11071_s1 + $0x5a8] sm:$0xff]   ;;  %v8493_v53 = vld [vmem:[%s11071_s1 + $0x5f0] sm:$0xff]  }
  0x8d   :  { %7524 = vmatpush3.bf16.msra.mxu1 %v8422_v54  ;;  %7491 = vmatprep.subr.bf16.mxu0 %v8424_v56  ;;  %v8494_v54 = vld [vmem:[%s11071_s1 + $0x530] sm:$0xff]   ;;  %v8496_v56 = vld [vmem:[%s11071_s1 + $0x578] sm:$0xff]  }
  0x8e   :  { %7525 = vmatprep.subr.bf16.mxu1 %v8425_v57  ;;  %5167 = vmatprep.mubr.bf16.mxu0 %v8428_v60  ;;  %v8495_v55 = vld [vmem:[%s11071_s1 + $0x5b0] sm:$0xff]   ;;  %v8497_v57 = vld [vmem:[%s11071_s1 + $0x5f8] sm:$0xff]  }
  0x8f   :  { %5224 = vmatprep.mubr.bf16.mxu1 %v8433_v0  ;;  %v8500_v60 = vld [vmem:[%s11072_s0 + $0x50] ss:$232 sps:$4 sm:$0xff]   ;;  %v8506_v0 = vld [vmem:[%s11071_s1 + $0x640] sm:$0xff]  }
  0x90   :  { %7492 = vmatpush3.bf16.msra.mxu0 %v8426_v58  ;;  %v8498_v58 = vld [vmem:[%s11071_s1 + $0x538] sm:$0xff]  }
  0x91   :  { %7526 = vmatpush3.bf16.msra.mxu1 %v8427_v59  ;;  %7493 = vmatprep.subr.bf16.mxu0 %v8431_v62  ;;  %v8499_v59 = vld [vmem:[%s11071_s1 + $0x5b8] sm:$0xff]  }
  0x92   :  { %7527 = vmatprep.subr.bf16.mxu1 %v8432_v63  ;;  %v8503_v62 = vld [vmem:[%s11072_s0 + $0x58] ss:$232 sps:$4 sm:$0xff]   ;;  %v8505_v63 = vld [vmem:[%s11072_s0 + $0x5c] ss:$232 sps:$4 sm:$0xff]  }
  0x93   :  { %5168 = vmatmul.mubr.bf16.gmra.mrb[44].mxu0 %v8430_v61  ;;  %v8502_v61 = vld [vmem:[%s11072_s0 + $0x54] ss:$232 sps:$4 sm:$0xff]  }
  0x94   :  { %7494 = vmatpush3.bf16.msra.mxu0 %v8435_v1  ;;  %5225 = vmatmul.mubr.bf16.gmra.mrb[44].mxu1 %v8437_v3  ;;  %v8507_v1 = vld [vmem:[%s11071_s1 + $0x6c0] sm:$0xff]  }
  0x95   :  { %7528 = vmatpush3.bf16.msra.mxu1 %v8436_v2  ;;  %7495 = vmatprep.subr.bf16.mxu0 %v8438_v4  ;;  %v8508_v2 = vld [vmem:[%s11071_s1 + $0x600] sm:$0xff]   ;;  %v8510_v4 = vld [vmem:[%s11071_s1 + $0x648] sm:$0xff]  }
  0x96   :  { %7529 = vmatprep.subr.bf16.mxu1 %v8439_v5  ;;  %5265 = vmatprep.mubr.bf16.mxu0 %v8452_v17  ;;  %v8509_v3 = vld [vmem:[%s11071_s1 + $0x680] sm:$0xff]   ;;  %v8511_v5 = vld [vmem:[%s11071_s1 + $0x6c8] sm:$0xff]  }
  0x97   :  { %5322 = vmatprep.mubr.bf16.mxu1 %v8455_v19  ;;  %v8523_v17 = vld [vmem:[%s11072_s0 + $0x228] ss:$232 sps:$4 sm:$0xff]  }
  0x98   :  { %7496 = vmatpush3.bf16.msra.mxu0 %v8440_v6  ;;  %v8512_v6 = vld [vmem:[%s11071_s1 + $0x608] sm:$0xff]  }
  0x99   :  { %7530 = vmatpush3.bf16.msra.mxu1 %v8441_v7  ;;  %7497 = vmatprep.subr.bf16.mxu0 %v8442_v8  ;;  %v8513_v7 = vld [vmem:[%s11071_s1 + $0x688] sm:$0xff]  }
  0x9a   :  { %7531 = vmatprep.subr.bf16.mxu1 %v8443_v9  ;;  %v8514_v8 = vld [vmem:[%s11072_s0 + $0x224] ss:$232 sps:$4 sm:$0xff]   ;;  %v8516_v9 = vld [vmem:[%s11072_s0 + $0x220] ss:$232 sps:$4 sm:$0xff]  }
  0x9c   :  { %7498 = vmatpush3.bf16.msra.mxu0 %v8444_v10  ;;  %v8517_v10 = vld [vmem:[%s11071_s1 + $0x650] sm:$0xff]  }
  0x9d   :  { %7532 = vmatpush3.bf16.msra.mxu1 %v8445_v11  ;;  %7499 = vmatprep.subr.bf16.mxu0 %v8446_v12  ;;  %v8518_v11 = vld [vmem:[%s11071_s1 + $0x6d0] sm:$0xff]  }
  0x9e   :  { %7533 = vmatprep.subr.bf16.mxu1 %v8447_v13  ;;  %v8519_v12 = vld [vmem:[%s11072_s0 + $0x22c] ss:$232 sps:$4 sm:$0xff]  }
  0x9f   :  { %v8521_v13 = vld [vmem:[%s11071_s1 + $0x610] sm:$0xff]  }
  0xa0   :  { %7500 = vmatpush3.bf16.msra.mxu0 %v8448_v14 }
  0xa1   :  { %7534 = vmatpush3.bf16.msra.mxu1 %v8449_v15  ;;  %7553 = vmatprep.subr.bf16.mxu0 %v8456_v20  ;;  %v8522_v15 = vld [vmem:[%s11071_s1 + $0x690] sm:$0xff]   ;;  %v8525_v20 = vld [vmem:[%s11071_s1 + $0x6d8] sm:$0xff]  }
  0xa2   :  { %7587 = vmatprep.subr.bf16.mxu1 %v8457_v21 }
  0xa3   :  { %5266 = vmatmul.mubr.bf16.vlgmr.msra.gmra.mrb[48].mxu0 %v8450_v16 }
  0xa4   :  { %5323 = vmatmul.mubr.bf16.vlgmr.msra.gmra.mrb[48].mxu1 %v8453_v18  ;;  %7554 = vmatpush3.bf16.msra.mxu0 %v8458_v22  ;;  %v8524_v18 = vld [vmem:[%s11071_s1 + $0x658] sm:$0xff]  }
  0xa5   :  { %7588 = vmatpush3.bf16.msra.mxu1 %v8459_v23  ;;  %7555 = vmatprep.subr.bf16.mxu0 %v8460_v24  ;;  %v8526_v23 = vld [vmem:[%s11071_s1 + $0x618] sm:$0xff]  }
  0xa6   :  { %7589 = vmatprep.subr.bf16.mxu1 %v8461_v25  ;;  %5273 = vmatprep.mubr.bf16.mxu0 %v8464_v28 }
  0xa7   :  { %5330 = vmatprep.mubr.bf16.mxu1 %v8469_v32 }
  0xa8   :  { %7556 = vmatpush3.bf16.msra.mxu0 %v8462_v26  ;;  %v8527_v26 = vld [vmem:[%s11071_s1 + $0x698] sm:$0xff]  }
  0xa9   :  { %7590 = vmatpush3.bf16.msra.mxu1 %v8463_v27  ;;  %7557 = vmatprep.subr.bf16.mxu0 %v8467_v30  ;;  %v8530_v30 = vld [vmem:[%s11072_s0 + $0x3f0] ss:$232 sps:$4 sm:$0xff]  }
  0xaa   :  { %7591 = vmatprep.subr.bf16.mxu1 %v8468_v31 }
  0xab   :  { %5274 = vmatmul.mubr.bf16.gmra.mrb[52].mxu0 %v8466_v29  ;;  %v8528_v29 = vld [vmem:[%s11072_s0 + $0x3f4] ss:$232 sps:$4 sm:$0xff]  }
  0xac   :  { %7558 = vmatpush3.bf16.msra.mxu0 %v8471_v33  ;;  %5331 = vmatmul.mubr.bf16.gmra.mrb[52].mxu1 %v8473_v35  ;;  %v8531_v33 = vld [vmem:[%s11071_s1 + $0x660] sm:$0xff]  }
  0xad   :  { %7592 = vmatpush3.bf16.msra.mxu1 %v8472_v34  ;;  %7559 = vmatprep.subr.bf16.mxu0 %v8474_v36  ;;  %v8532_v35 = vld [vmem:[%s11071_s1 + $0x6e0] sm:$0xff]  }
  0xae   :  { %7593 = vmatprep.subr.bf16.mxu1 %v8475_v37  ;;  %5281 = vmatprep.mubr.bf16.mxu0 %v8478_v40  ;;  %v8533_v37 = vld [vmem:[%s11072_s0 + $0x3fc] ss:$232 sps:$4 sm:$0xff]  }
  0xaf   :  { %5338 = vmatprep.mubr.bf16.mxu1 %v8483_v44  ;;  %v8536_v40 = vld [vmem:[%s11071_s1 + $0x6a0] sm:$0xff]   ;;  %v8540_v44 = vld [vmem:[%s11071_s1 + $0x628] sm:$0xff]  }
  0xb0   :  { %7560 = vmatpush3.bf16.msra.mxu0 %v8476_v38  ;;  %v8535_v38 = vld [vmem:[%s11071_s1 + $0x620] sm:$0xff]  }
  0xb1   :  { %7594 = vmatpush3.bf16.msra.mxu1 %v8477_v39  ;;  %7561 = vmatprep.subr.bf16.mxu0 %v8481_v42  ;;  %v8538_v42 = vld [vmem:[%s11071_s1 + $0x668] sm:$0xff]  }
  0xb2   :  { %7595 = vmatprep.subr.bf16.mxu1 %v8482_v43  ;;  %v8539_v43 = vld [vmem:[%s11071_s1 + $0x6e8] sm:$0xff]  }
  0xb3   :  { %5282 = vmatmul.mubr.bf16.gmra.mrb[56].mxu0 %v8480_v41  ;;  %v8537_v41 = vld [vmem:[%s11072_s0 + $0x3f8] ss:$232 sps:$4 sm:$0xff]  }
  0xb4   :  { %7562 = vmatpush3.bf16.msra.mxu0 %v8485_v45  ;;  %5339 = vmatmul.mubr.bf16.gmra.mrb[56].mxu1 %v8487_v47  ;;  %v8541_v45 = vld [vmem:[%s11071_s1 + $0x6a8] sm:$0xff]   ;;  %v8543_v47 = vld [vmem:[%s11071_s1 + $0x6f0] sm:$0xff]  }
  0xb5   :  { %7596 = vmatpush3.bf16.msra.mxu1 %v8486_v46  ;;  %7563 = vmatprep.subr.bf16.mxu0 %v8488_v48  ;;  %v8542_v46 = vld [vmem:[%s11071_s1 + $0x670] sm:$0xff]  }
  0xb6   :  { %7597 = vmatprep.subr.bf16.mxu1 %v8489_v49  ;;  %5379 = vmatprep.mubr.bf16.mxu0 %v8502_v61  ;;  %v8544_v49 = vld [vmem:[%s11071_s1 + $0x630] sm:$0xff]   ;;  %v8549_v61 = vld [vmem:[%s11071_s1 + $0x6b8] sm:$0xff]  }
  0xb7   :  { %5436 = vmatprep.mubr.bf16.mxu1 %v8505_v63 }
  0xb8   :  { %7564 = vmatpush3.bf16.msra.mxu0 %v8490_v50 }
  0xb9   :  { %7598 = vmatpush3.bf16.msra.mxu1 %v8491_v51  ;;  %7565 = vmatprep.subr.bf16.mxu0 %v8492_v52  ;;  %v8545_v51 = vld [vmem:[%s11071_s1 + $0x6b0] sm:$0xff]  }
  0xba   :  { %7599 = vmatprep.subr.bf16.mxu1 %v8493_v53  ;;  %v8546_v53 = vld [vmem:[%s11071_s1 + $0x678] sm:$0xff]  }
  0xbc   :  { %7566 = vmatpush3.bf16.msra.mxu0 %v8494_v54 }
  0xbd   :  { %7600 = vmatpush3.bf16.msra.mxu1 %v8495_v55  ;;  %7567 = vmatprep.subr.bf16.mxu0 %v8496_v56  ;;  %v8547_v56 = vld [vmem:[%s11071_s1 + $0x6f8] sm:$0xff]  }
  0xbe   :  { %7601 = vmatprep.subr.bf16.mxu1 %v8497_v57 }
  0xc0   :  { %7568 = vmatpush3.bf16.msra.mxu0 %v8498_v58 }
  0xc1   :  { %7602 = vmatpush3.bf16.msra.mxu1 %v8499_v59  ;;  %7621 = vmatprep.subr.bf16.mxu0 %v8506_v0  ;;  %v8548_v59 = vld [vmem:[%s11071_s1 + $0x638] sm:$0xff]   ;;  %v8550_v0 = vld [vmem:[%s11072_s0 + $0x60] ss:$232 sps:$4 sm:$0xff]  }
  0xc2   :  { %7655 = vmatprep.subr.bf16.mxu1 %v8507_v1 }
  0xc3   :  { %5380 = vmatmul.mubr.bf16.vlgmr.msra.gmra.mrb[60].mxu0 %v8500_v60 }
  0xc4   :  { %5437 = vmatmul.mubr.bf16.vlgmr.msra.gmra.mrb[60].mxu1 %v8503_v62  ;;  %7622 = vmatpush3.bf16.msra.mxu0 %v8508_v2 }
  0xc5   :  { %7656 = vmatpush3.bf16.msra.mxu1 %v8509_v3  ;;  %7623 = vmatprep.subr.bf16.mxu0 %v8510_v4  ;;  %v8552_v3 = vld [vmem:[%s11072_s0 + $0x64] ss:$232 sps:$4 sm:$0xff]  }
  0xc6   :  { %7657 = vmatprep.subr.bf16.mxu1 %v8511_v5  ;;  %5387 = vmatprep.mubr.bf16.mxu0 %v8514_v8  ;;  %v8553_v5 = vld [vmem:[%s11072_s0 + $0x68] ss:$232 sps:$4 sm:$0xff]  }
  0xc7   :  { %5444 = vmatprep.mubr.bf16.mxu1 %v8519_v12 }
  0xc8   :  { %7624 = vmatpush3.bf16.msra.mxu0 %v8512_v6  ;;  %v8555_v6 = vld [vmem:[%s11072_s0 + $0x6c] ss:$232 sps:$4 sm:$0xff]  }
  0xc9   :  { %7658 = vmatpush3.bf16.msra.mxu1 %v8513_v7  ;;  %7625 = vmatprep.subr.bf16.mxu0 %v8517_v10  ;;  %v8556_v7 = vld [vmem:[%s11071_s1 + $0x740] sm:$0xff]  }
  0xca   :  { %7659 = vmatprep.subr.bf16.mxu1 %v8518_v11  ;;  %v8558_v11 = vld [vmem:[%s11071_s1 + $0x700] sm:$0xff]  }
  0xcb   :  { %5388 = vmatmul.mubr.bf16.gmra.mrb[64].mxu0 %v8516_v9  ;;  %v8557_v9 = vld [vmem:[%s11071_s1 + $0x7c0] sm:$0xff]  }
  0xcc   :  { %7626 = vmatpush3.bf16.msra.mxu0 %v8521_v13  ;;  %5445 = vmatmul.mubr.bf16.gmra.mrb[64].mxu1 %v8523_v17  ;;  %v8559_v13 = vld [vmem:[%s11071_s1 + $0x780] sm:$0xff]  }
  0xcd   :  { %7660 = vmatpush3.bf16.msra.mxu1 %v8522_v15  ;;  %7627 = vmatprep.subr.bf16.mxu0 %v8524_v18  ;;  %v8560_v15 = vld [vmem:[%s11071_s1 + $0x748] sm:$0xff]  }
  0xce   :  { %7661 = vmatprep.subr.bf16.mxu1 %v8525_v20  ;;  %5395 = vmatprep.mubr.bf16.mxu0 %v8528_v29  ;;  %v8561_v18 = vld [vmem:[%s11071_s1 + $0x7c8] sm:$0xff]  }
  0xcf   :  { %5452 = vmatprep.mubr.bf16.mxu1 %v8533_v37 }
  0xd0   :  { %7628 = vmatpush3.bf16.msra.mxu0 %v8526_v23  ;;  %v8563_v23 = vld [vmem:[%s11071_s1 + $0x788] sm:$0xff]  }
  0xd1   :  { %7662 = vmatpush3.bf16.msra.mxu1 %v8527_v26  ;;  %7629 = vmatprep.subr.bf16.mxu0 %v8531_v33  ;;  %v8568_v33 = vld [vmem:[%s11071_s1 + $0x7d0] sm:$0xff]  }
  0xd2   :  { %7663 = vmatprep.subr.bf16.mxu1 %v8532_v35  ;;  %v8569_v35 = vld [vmem:[%s11072_s0 + $0x23c] ss:$232 sps:$4 sm:$0xff]  }
  0xd3   :  { %5396 = vmatmul.mubr.bf16.gmra.mrb[68].mxu0 %v8530_v30 }
  0xd4   :  { %7630 = vmatpush3.bf16.msra.mxu0 %v8535_v38  ;;  %5453 = vmatmul.mubr.bf16.gmra.mrb[68].mxu1 %v8537_v41  ;;  %v8572_v38 = vld [vmem:[%s11071_s1 + $0x790] sm:$0xff]   ;;  %v8573_v41 = vld [vmem:[%s11072_s0 + $0x238] ss:$232 sps:$4 sm:$0xff]  }
  0xd5   :  { %7664 = vmatpush3.bf16.msra.mxu1 %v8536_v40  ;;  %7631 = vmatprep.subr.bf16.mxu0 %v8538_v42  ;;  %v8574_v42 = vld [vmem:[%s11071_s1 + $0x758] sm:$0xff]  }
  0xd6   :  { %7665 = vmatprep.subr.bf16.mxu1 %v8539_v43  ;;  %5493 = vmatprep.mubr.bf16.mxu0 %v8552_v3 }
  0xd7   :  { %5550 = vmatprep.mubr.bf16.mxu1 %v8555_v6 }
  0xd8   :  { %7632 = vmatpush3.bf16.msra.mxu0 %v8540_v44  ;;  %v8575_v44 = vld [vmem:[%s11071_s1 + $0x7d8] sm:$0xff]  }
  0xd9   :  { %7666 = vmatpush3.bf16.msra.mxu1 %v8541_v45  ;;  %7633 = vmatprep.subr.bf16.mxu0 %v8542_v46 }
  0xda   :  { %7667 = vmatprep.subr.bf16.mxu1 %v8543_v47  ;;  %v8576_v47 = vld [vmem:[%s11071_s1 + $0x718] sm:$0xff]  }
  0xdc   :  { %7634 = vmatpush3.bf16.msra.mxu0 %v8544_v49 }
  0xdd   :  { %7668 = vmatpush3.bf16.msra.mxu1 %v8545_v51  ;;  %7635 = vmatprep.subr.bf16.mxu0 %v8546_v53 }
  0xde   :  { %7669 = vmatprep.subr.bf16.mxu1 %v8547_v56 }
  0xe0   :  { %7636 = vmatpush3.bf16.msra.mxu0 %v8548_v59  ;;  %v8582_v59 = vld [vmem:[%s11071_s1 + $0x7e0] sm:$0xff]  }
  0xe1   :  { %7670 = vmatpush3.bf16.msra.mxu1 %v8549_v61  ;;  %7689 = vmatprep.subr.bf16.mxu0 %v8556_v7  ;;  %v8588_v7 = vld [vmem:[%s11071_s1 + $0x768] sm:$0xff]  }
  0xe2   :  { %7723 = vmatprep.subr.bf16.mxu1 %v8557_v9 }
  0xe3   :  { %5494 = vmatmul.mubr.bf16.vlgmr.msra.gmra.mrb[72].mxu0 %v8550_v0 }
  0xe4   :  { %5551 = vmatmul.mubr.bf16.vlgmr.msra.gmra.mrb[72].mxu1 %v8553_v5  ;;  %7690 = vmatpush3.bf16.msra.mxu0 %v8558_v11 }
  0xe5   :  { %7724 = vmatpush3.bf16.msra.mxu1 %v8559_v13  ;;  %7691 = vmatprep.subr.bf16.mxu0 %v8560_v15  ;;  %v8590_v13 = vld [vmem:[%s11071_s1 + $0x728] sm:$0xff]  }
  0xe6   :  { %7725 = vmatprep.subr.bf16.mxu1 %v8561_v18  ;;  %5558 = vmatprep.mubr.bf16.mxu1 %v8569_v35  ;;  %v8591_v15 = vld [vmem:[%s11071_s1 + $0x7a8] sm:$0xff]  }
  0xe9   :  { %7726 = vmatpush3.bf16.msra.mxu1 %v8563_v23 }
  0xea   :  { %7727 = vmatprep.subr.bf16.mxu1 %v8568_v33 }
  0xec   :  { %5559 = vmatmul.mubr.bf16.gmra.mrb[76].mxu1 %v8573_v41 }
  0xed   :  { %7728 = vmatpush3.bf16.msra.mxu1 %v8572_v38  ;;  %v8600_v38 = vld [vmem:[%s11072_s0 + $0x70] ss:$232 sps:$4 sm:$0xff]  }
  0xee   :  { %7729 = vmatprep.subr.bf16.mxu1 %v8575_v44  ;;  %v8603_v44 = vld [vmem:[%s11072_s0 + $0x78] ss:$232 sps:$4 sm:$0xff]  }
  0xf6   :  { %v7229_v14 = vpop.f32.mrb[0].mxu0 }
  0xf7   :  { %v7263_v16 = vpop.f32.mrb[0].mxu1  ;;  %v7230_v19 = vpop.f32.mrb[1].mxu0 }
  0xf8   :  { %v7231_v21 = vadd.f32 %v7230_v19, %v7229_v14  ;;  %v7264_v22 = vpop.f32.mrb[1].mxu1  ;;  %v7232_v25 = vpop.f32.mrb[2].mxu0 }
  0xf9   :  { %v7265_v24 = vadd.f32 %v7264_v22, %v7263_v16  ;;  %v7266_v27 = vpop.f32.mrb[2].mxu1  ;;  %v7233_v28 = vpop.f32.mrb[3].mxu0 }
  0xfa   :  { %v7234_v32 = vadd.f32 %v7233_v28, %v7232_v25  ;;  %v7267_v34 = vpop.f32.mrb[3].mxu1  ;;  %v8566_v28 = vld [vmem:[%s11072_s0 + $0x230] ss:$232 sps:$4 sm:$0xff]  }
  0xfb   :  { %v9808_v31 = vadd.f32 %v7265_v24, %v7231_v21  ;;  %v7268_v36 = vadd.f32 %v7267_v34, %v7266_v27  ;;  %v8562_v21 = vld [vmem:[%s11071_s1 + $0x708] sm:$0xff]   ;;  %v8564_v27 = vld [vmem:[%s11072_s0 + $0x234] ss:$232 sps:$4 sm:$0xff]  }
  0xfc   :  { %7692 = vmatpush3.bf16.msra.mxu0 %v8562_v21  ;;  %5501 = vmatprep.mubr.bf16.mxu0 %v8564_v27 }
  0xfd   :  { %v9822_v39 = vadd.f32 %v7268_v36, %v7234_v32  ;;  %v8567_v32 = vld [vmem:[%s11071_s1 + $0x750] sm:$0xff]   ;;  %5502 = vmatmul.mubr.bf16.gmra.mrb[76].mxu0 %v8566_v28 }
  0xfe   :  { %v7235_v48 = vpop.f32.mrb[4].mxu0  ;;  %7693 = vmatprep.subr.bf16.mxu0 %v8567_v32  ;;  %v8571_v36 = vld [vmem:[%s11071_s1 + $0x710] sm:$0xff]   ;;  %v8598_v32 = vld [vmem:[%s11071_s1 + $0x738] sm:$0xff]  }
  0xff   :  { %v7269_v50 = vpop.f32.mrb[4].mxu1  ;;  %v7236_v52 = vpop.f32.mrb[5].mxu0 }
 0x100   :  { %v7237_v54 = vadd.f32 %v7236_v52, %v7235_v48  ;;  %v7270_v55 = vpop.f32.mrb[5].mxu1  ;;  %v7238_v58 = vpop.f32.mrb[6].mxu0  ;;  %7694 = vmatpush3.bf16.msra.mxu0 %v8571_v36  ;;  %v8599_v36 = vld [vmem:[%s11071_s1 + $0x7b8] sm:$0xff]  }
 0x101   :  { %v7271_v57 = vadd.f32 %v7270_v55, %v7269_v50  ;;  %v7272_v60 = vpop.f32.mrb[6].mxu1  ;;  %v7239_v63 = vpop.f32.mrb[7].mxu0  ;;  %7695 = vmatprep.subr.bf16.mxu0 %v8574_v42  ;;  %v8577_v50 = vld [vmem:[%s11071_s1 + $0x798] sm:$0xff]   ;;  %v8580_v55 = vld [vmem:[%s11072_s0 + $0x400] ss:$232 sps:$4 sm:$0xff]  }
 0x102   :  { %v7240_v1 = vadd.f32 %v7239_v63, %v7238_v58  ;;  %v7273_v2 = vpop.f32.mrb[7].mxu1  ;;  %7730 = vmatpush3.bf16.msra.mxu1 %v8577_v50  ;;  %v8583_v63 = vld [vmem:[%s11072_s0 + $0x40c] ss:$232 sps:$4 sm:$0xff]  }
 0x103   :  { %v9866_v62 = vadd.f32 %v7271_v57, %v7237_v54  ;;  %v7274_v4 = vadd.f32 %v7273_v2, %v7272_v60  ;;  %v8578_v54 = vld [vmem:[%s11072_s0 + $0x404] ss:$232 sps:$4 sm:$0xff]   ;;  %7731 = vmatprep.subr.bf16.mxu1 %v8582_v59  ;;  %5566 = vmatprep.mubr.bf16.mxu1 %v8583_v63  ;;  %v8602_v42 = vld [vmem:[%s11072_s0 + $0x74] ss:$232 sps:$4 sm:$0xff]  }
 0x104   :  { %7696 = vmatpush3.bf16.msra.mxu0 %v8576_v47  ;;  %v8581_v57 = vld [vmem:[%s11071_s1 + $0x760] sm:$0xff]   ;;  %5509 = vmatprep.mubr.bf16.mxu0 %v8578_v54  ;;  %v8613_v59 = vld [vmem:[%s11071_s1 + $0x888] sm:$0xff]   ;;  %v8617_v63 = vld [vmem:[%s11071_s1 + $0x850] sm:$0xff]  }
 0x105   :  { %v9883_v8 = vadd.f32 %v7274_v4, %v7240_v1  ;;  %5510 = vmatmul.mubr.bf16.gmra.mrb[80].mxu0 %v8580_v55  ;;  %7697 = vmatprep.subr.bf16.mxu0 %v8581_v57  ;;  %v8585_v1 = vld [vmem:[%s11071_s1 + $0x720] sm:$0xff]   ;;  %v8587_v4 = vld [vmem:[%s11072_s0 + $0x408] ss:$232 sps:$4 sm:$0xff]  }
 0x106   :  { %v7241_v10 = vpop.f32.mrb[8].mxu0  ;;  %5567 = vmatmul.mubr.bf16.gmra.mrb[80].mxu1 %v8587_v4  ;;  %5607 = vmatprep.mubr.bf16.mxu0 %v8602_v42  ;;  %v8610_v55 = vld [vmem:[%s11071_s1 + $0x848] sm:$0xff]   ;;  %v8622_v4 = vld [vmem:[%s11071_s1 + $0x890] sm:$0xff]  }
 0x107   :  { %v7275_v12 = vpop.f32.mrb[8].mxu1  ;;  %v7242_v14 = vpop.f32.mrb[9].mxu0  ;;  %v8639_v42 = vld [vmem:[%s11071_s1 + $0x8e8] sm:$0xff]  }
 0x108   :  { %v7243_v16 = vadd.f32 %v7242_v14, %v7241_v10  ;;  %v7276_v17 = vpop.f32.mrb[9].mxu1  ;;  %v7244_v20 = vpop.f32.mrb[10].mxu0  ;;  %7698 = vmatpush3.bf16.msra.mxu0 %v8585_v1  ;;  %v8589_v10 = vld [vmem:[%s11071_s1 + $0x7e8] sm:$0xff]  }
 0x109   :  { %v7277_v19 = vadd.f32 %v7276_v17, %v7275_v12  ;;  %v7278_v22 = vpop.f32.mrb[10].mxu1  ;;  %v7245_v25 = vpop.f32.mrb[11].mxu0  ;;  %7699 = vmatprep.subr.bf16.mxu0 %v8588_v7  ;;  %v8619_v1 = vld [vmem:[%s11072_s0 + $0x24c] ss:$232 sps:$4 sm:$0xff]   ;;  %v8624_v7 = vld [vmem:[%s11071_s1 + $0x858] sm:$0xff]  }
 0x10a   :  { %v7279_v26 = vpop.f32.mrb[11].mxu1  ;;  %v7246_v29 = vadd.f32 %v7245_v25, %v7244_v20  ;;  %v8593_v20 = vld [vmem:[%s11071_s1 + $0x7f0] sm:$0xff]  }
 0x10b   :  { %v9906_v24 = vadd.f32 %v7277_v19, %v7243_v16  ;;  %v7280_v30 = vadd.f32 %v7279_v26, %v7278_v22  ;;  %v8594_v22 = vld [vmem:[%s11071_s1 + $0x730] sm:$0xff]   ;;  %v8596_v26 = vld [vmem:[%s11071_s1 + $0x778] sm:$0xff]  }
 0x10c   :  { %7700 = vmatpush3.bf16.msra.mxu0 %v8590_v13  ;;  %v8595_v25 = vld [vmem:[%s11071_s1 + $0x7b0] sm:$0xff]   ;;  %v8626_v13 = vld [vmem:[%s11071_s1 + $0x818] sm:$0xff]  }
 0x10d   :  { %v9920_v34 = vadd.f32 %v7280_v30, %v7246_v29  ;;  %v8597_v29 = vld [vmem:[%s11071_s1 + $0x7f8] sm:$0xff]  }
 0x116   :  { %v7297_v37 = vpop.f32.mrb[12].mxu0 }
 0x117   :  { %v7331_v40 = vpop.f32.mrb[12].mxu1  ;;  %v7298_v43 = vpop.f32.mrb[13].mxu0 }
 0x118   :  { %v7299_v45 = vadd.f32 %v7298_v43, %v7297_v37  ;;  %v7332_v46 = vpop.f32.mrb[13].mxu1  ;;  %v7300_v49 = vpop.f32.mrb[14].mxu0 }
 0x119   :  { %v7333_v48 = vadd.f32 %v7332_v46, %v7331_v40  ;;  %v7334_v52 = vpop.f32.mrb[14].mxu1  ;;  %v7301_v53 = vpop.f32.mrb[15].mxu0 }
 0x11a   :  { %v4926_v51 = vadd.f32 %v7299_v45, %v9808_v31  ;;  %v7302_v56 = vadd.f32 %v7301_v53, %v7300_v49  ;;  %v7335_v31 = vpop.f32.mrb[15].mxu1  ;;  %v8605_v45 = vld [vmem:[%s11072_s0 + $0x7c] ss:$232 sps:$4 sm:$0xff]  }
 0x11b   :  { %v7336_v61 = vadd.f32 %v7335_v31, %v7334_v52  ;;  %5664 = vmatprep.mubr.bf16.mxu1 %v8605_v45  ;;  %v8609_v52 = vld [vmem:[%s11071_s1 + $0x880] sm:$0xff]   ;;  %v8612_v31 = vld [vmem:[%s11071_s1 + $0x808] sm:$0xff]  }
 0x11c   :  { %v9956_v58 = vadd.f32 %v7333_v48, %v4926_v51  ;;  %v4929_v60 = vadd.f32 %v7302_v56, %v9822_v39  ;;  %v8586_v39 = vld [vmem:[%s11071_s1 + $0x7a0] sm:$0xff]   ;;  %v8611_v56 = vld [vmem:[%s11071_s1 + $0x8c8] sm:$0xff]  }
 0x11d   :  { %7732 = vmatpush3.bf16.msra.mxu1 %v8586_v39  ;;  %v8607_v48 = vld [vmem:[%s11071_s1 + $0x8c0] sm:$0xff]   ;;  %v8640_v45 = vld [vmem:[%s11071_s1 + $0x828] sm:$0xff]  }
 0x11e   :  { %v7303_v0 = vpop.f32.mrb[16].mxu0  ;;  %v9968_v2 = vadd.f32 %v7336_v61, %v4929_v60  ;;  %7733 = vmatprep.subr.bf16.mxu1 %v8589_v10  ;;  %v8614_v60 = vld [vmem:[%s11072_s0 + $0x244] ss:$232 sps:$4 sm:$0xff]   ;;  %v8616_v61 = vld [vmem:[%s11072_s0 + $0x240] ss:$232 sps:$4 sm:$0xff]   ;;  %v8625_v10 = vld [vmem:[%s11071_s1 + $0x8d8] sm:$0xff]  }
 0x11f   :  { %v7304_v3 = vpop.f32.mrb[17].mxu0  ;;  %v7337_v14 = vpop.f32.mrb[16].mxu1 }
 0x120   :  { %v7305_v5 = vadd.f32 %v7304_v3, %v7303_v0  ;;  %v7306_v6 = vpop.f32.mrb[18].mxu0  ;;  %v7338_v17 = vpop.f32.mrb[17].mxu1  ;;  %v8618_v0 = vld [vmem:[%s11071_s1 + $0x8d0] sm:$0xff]  }
 0x121   :  { %v7307_v9 = vpop.f32.mrb[19].mxu0  ;;  %v7339_v18 = vadd.f32 %v7338_v17, %v7337_v14  ;;  %v7340_v19 = vpop.f32.mrb[18].mxu1  ;;  %7734 = vmatpush3.bf16.msra.mxu1 %v8591_v15  ;;  %v8621_v3 = vld [vmem:[%s11071_s1 + $0x810] sm:$0xff]  }
 0x122   :  { %v4934_v11 = vadd.f32 %v7305_v5, %v9866_v62  ;;  %v7308_v12 = vadd.f32 %v7307_v9, %v7306_v6  ;;  %v8592_v62 = vld [vmem:[%s11071_s1 + $0x770] sm:$0xff]   ;;  %v7341_v21 = vpop.f32.mrb[19].mxu1  ;;  %7735 = vmatprep.subr.bf16.mxu1 %v8593_v20 }
 0x123   :  { %7701 = vmatprep.subr.bf16.mxu0 %v8592_v62  ;;  %v7342_v23 = vadd.f32 %v7341_v21, %v7340_v19  ;;  %v8623_v6 = vld [vmem:[%s11072_s0 + $0x248] ss:$232 sps:$4 sm:$0xff]   ;;  %v8628_v19 = vld [vmem:[%s11072_s0 + $0x414] ss:$232 sps:$4 sm:$0xff]  }
 0x124   :  { %v4937_v16 = vadd.f32 %v7308_v12, %v9883_v8  ;;  %v9999_v8 = vadd.f32 %v7339_v18, %v4934_v11  ;;  %7702 = vmatpush3.bf16.msra.mxu0 %v8594_v22  ;;  %v8630_v20 = vld [vmem:[%s11072_s0 + $0x410] ss:$232 sps:$4 sm:$0xff]   ;;  %v8631_v22 = vld [vmem:[%s11071_s1 + $0x860] sm:$0xff]  }
 0x125   :  { %7736 = vmatpush3.bf16.msra.mxu1 %v8595_v25  ;;  %7703 = vmatprep.subr.bf16.mxu0 %v8596_v26  ;;  %v8632_v25 = vld [vmem:[%s11071_s1 + $0x8e0] sm:$0xff]  }
 0x126   :  { %v10007_v27 = vadd.f32 %v7342_v23, %v4937_v16  ;;  %v7309_v28 = vpop.f32.mrb[20].mxu0  ;;  %7737 = vmatprep.subr.bf16.mxu1 %v8597_v29  ;;  %v8627_v16 = vld [vmem:[%s11071_s1 + $0x898] sm:$0xff]  }
 0x127   :  { %v7310_v30 = vpop.f32.mrb[21].mxu0  ;;  %v7343_v43 = vpop.f32.mrb[20].mxu1  ;;  %v8633_v29 = vld [vmem:[%s11072_s0 + $0x41c] ss:$232 sps:$4 sm:$0xff]  }
 0x128   :  { %v7311_v33 = vadd.f32 %v7310_v30, %v7309_v28  ;;  %v7312_v35 = vpop.f32.mrb[22].mxu0  ;;  %7704 = vmatpush3.bf16.msra.mxu0 %v8598_v32  ;;  %v7344_v47 = vpop.f32.mrb[21].mxu1  ;;  %v8635_v32 = vld [vmem:[%s11071_s1 + $0x820] sm:$0xff]  }
 0x129   :  { %v7313_v37 = vpop.f32.mrb[23].mxu0  ;;  %7738 = vmatpush3.bf16.msra.mxu1 %v8599_v36  ;;  %v7345_v49 = vadd.f32 %v7344_v47, %v7343_v43  ;;  %v7346_v50 = vpop.f32.mrb[22].mxu1  ;;  %v8637_v36 = vld [vmem:[%s11072_s0 + $0x418] ss:$232 sps:$4 sm:$0xff]  }
 0x12a   :  { %v4942_v40 = vadd.f32 %v7311_v33, %v9906_v24  ;;  %v7314_v41 = vadd.f32 %v7313_v37, %v7312_v35  ;;  %v8606_v24 = vld [vmem:[%s11071_s1 + $0x840] sm:$0xff]   ;;  %v7347_v51 = vpop.f32.mrb[23].mxu1  ;;  %7791 = vmatprep.subr.bf16.mxu1 %v8607_v48 }
 0x12b   :  { %5608 = vmatmul.mubr.bf16.vlgmr.msra.gmra.mrb[84].mxu0 %v8600_v38  ;;  %7757 = vmatprep.subr.bf16.mxu0 %v8606_v24  ;;  %v7348_v54 = vadd.f32 %v7347_v51, %v7346_v50  ;;  %v8641_v24 = vld [vmem:[%s11071_s1 + $0x8a8] sm:$0xff]  }
 0x12c   :  { %v4945_v46 = vadd.f32 %v7314_v41, %v9920_v34  ;;  %5665 = vmatmul.mubr.bf16.vlgmr.msra.gmra.mrb[84].mxu1 %v8603_v44  ;;  %v8608_v34 = vld [vmem:[%s11071_s1 + $0x800] sm:$0xff]   ;;  %v10044_v53 = vadd.f32 %v7345_v49, %v4942_v40  ;;  %5615 = vmatprep.mubr.bf16.mxu0 %v8614_v60  ;;  %v8638_v40 = vld [vmem:[%s11071_s1 + $0x868] sm:$0xff]   ;;  %v8647_v60 = vld [vmem:[%s11071_s1 + $0x8f8] sm:$0xff]  }
 0x12d   :  { %7758 = vmatpush3.bf16.msra.mxu0 %v8608_v34  ;;  %7792 = vmatpush3.bf16.msra.mxu1 %v8609_v52  ;;  %v8643_v34 = vld [vmem:[%s11071_s1 + $0x8f0] sm:$0xff]  }
 0x12e   :  { %v10052_v57 = vadd.f32 %v7348_v54, %v4945_v46  ;;  %7759 = vmatprep.subr.bf16.mxu0 %v8610_v55  ;;  %7793 = vmatprep.subr.bf16.mxu1 %v8611_v56  ;;  %v8644_v52 = vld [vmem:[%s11071_s1 + $0x830] sm:$0xff]   ;;  %v8646_v56 = vld [vmem:[%s11071_s1 + $0x878] sm:$0xff]  }
 0x12f   :  { %5672 = vmatprep.mubr.bf16.mxu1 %v8619_v1  ;;  %v8645_v55 = vld [vmem:[%s11071_s1 + $0x8b0] sm:$0xff]  }
 0x131   :  { %7760 = vmatpush3.bf16.msra.mxu0 %v8612_v31  ;;  %7794 = vmatpush3.bf16.msra.mxu1 %v8613_v59 }
 0x132   :  { %7761 = vmatprep.subr.bf16.mxu0 %v8617_v63  ;;  %7795 = vmatprep.subr.bf16.mxu1 %v8618_v0  ;;  %v8648_v63 = vld [vmem:[%s11071_s1 + $0x838] sm:$0xff]  }
 0x133   :  { %5616 = vmatmul.mubr.bf16.gmra.mrb[88].mxu0 %v8616_v61 }
 0x134   :  { %5673 = vmatmul.mubr.bf16.gmra.mrb[88].mxu1 %v8623_v6  ;;  %5623 = vmatprep.mubr.bf16.mxu0 %v8628_v19 }
 0x135   :  { %7762 = vmatpush3.bf16.msra.mxu0 %v8621_v3  ;;  %7796 = vmatpush3.bf16.msra.mxu1 %v8622_v4  ;;  %v8649_v3 = vld [vmem:[%s11071_s1 + $0x8b8] sm:$0xff]   ;;  %v8650_v4 = vld [vmem:[%s11072_s0 + $0x80] ss:$232 sps:$4 sm:$0xff]  }
 0x136   :  { %v7365_v39 = vpop.f32.mrb[24].mxu0  ;;  %7763 = vmatprep.subr.bf16.mxu0 %v8624_v7  ;;  %7797 = vmatprep.subr.bf16.mxu1 %v8625_v10  ;;  %v8652_v7 = vld [vmem:[%s11072_s0 + $0x84] ss:$232 sps:$4 sm:$0xff]   ;;  %v8653_v10 = vld [vmem:[%s11072_s0 + $0x88] ss:$232 sps:$4 sm:$0xff]  }
 0x137   :  { %v7399_v5 = vpop.f32.mrb[24].mxu1  ;;  %v7366_v9 = vpop.f32.mrb[25].mxu0  ;;  %5680 = vmatprep.mubr.bf16.mxu1 %v8633_v29  ;;  %v8667_v29 = vld [vmem:[%s11071_s1 + $0x950] sm:$0xff]  }
 0x138   :  { %v7367_v11 = vadd.f32 %v7366_v9, %v7365_v39  ;;  %v7400_v12 = vpop.f32.mrb[25].mxu1  ;;  %v7368_v15 = vpop.f32.mrb[26].mxu0 }
 0x139   :  { %v7401_v14 = vadd.f32 %v7400_v12, %v7399_v5  ;;  %v7402_v62 = vpop.f32.mrb[26].mxu1  ;;  %v7369_v18 = vpop.f32.mrb[27].mxu0  ;;  %7764 = vmatpush3.bf16.msra.mxu0 %v8626_v13  ;;  %7798 = vmatpush3.bf16.msra.mxu1 %v8627_v16 }
 0x13a   :  { %v5040_v17 = vadd.f32 %v7367_v11, %v9956_v58  ;;  %v7370_v21 = vadd.f32 %v7369_v18, %v7368_v15  ;;  %v7403_v58 = vpop.f32.mrb[27].mxu1  ;;  %7765 = vmatprep.subr.bf16.mxu0 %v8631_v22  ;;  %7799 = vmatprep.subr.bf16.mxu1 %v8632_v25  ;;  %v8655_v11 = vld [vmem:[%s11072_s0 + $0x8c] ss:$232 sps:$4 sm:$0xff]  }
 0x13b   :  { %v7404_v28 = vadd.f32 %v7403_v58, %v7402_v62  ;;  %5624 = vmatmul.mubr.bf16.gmra.mrb[92].mxu0 %v8630_v20  ;;  %v8659_v62 = vld [vmem:[%s11071_s1 + $0x980] sm:$0xff]   ;;  %v8660_v20 = vld [vmem:[%s11071_s1 + $0x948] sm:$0xff]  }
 0x13c   :  { %v10106_v23 = vadd.f32 %v7401_v14, %v5040_v17  ;;  %v5043_v26 = vadd.f32 %v7370_v21, %v9968_v2  ;;  %v8636_v2 = vld [vmem:[%s11071_s1 + $0x8a0] sm:$0xff]   ;;  %5681 = vmatmul.mubr.bf16.gmra.mrb[92].mxu1 %v8637_v36  ;;  %5721 = vmatprep.mubr.bf16.mxu0 %v8652_v7  ;;  %v8661_v21 = vld [vmem:[%s11071_s1 + $0x9c8] sm:$0xff]   ;;  %v8672_v36 = vld [vmem:[%s11071_s1 + $0x990] sm:$0xff]  }
 0x13d   :  { %7766 = vmatpush3.bf16.msra.mxu0 %v8635_v32  ;;  %7800 = vmatpush3.bf16.msra.mxu1 %v8636_v2  ;;  %v8657_v14 = vld [vmem:[%s11071_s1 + $0x9c0] sm:$0xff]   ;;  %v8662_v58 = vld [vmem:[%s11071_s1 + $0x908] sm:$0xff]  }
 0x13e   :  { %v7371_v30 = vpop.f32.mrb[28].mxu0  ;;  %v10118_v33 = vadd.f32 %v7404_v28, %v5043_v26  ;;  %7767 = vmatprep.subr.bf16.mxu0 %v8638_v40  ;;  %7801 = vmatprep.subr.bf16.mxu1 %v8639_v42  ;;  %v8663_v25 = vld [vmem:[%s11071_s1 + $0x988] sm:$0xff]   ;;  %v8664_v26 = vld [vmem:[%s11072_s0 + $0x254] ss:$232 sps:$4 sm:$0xff]   ;;  %v8666_v28 = vld [vmem:[%s11072_s0 + $0x250] ss:$232 sps:$4 sm:$0xff]  }
 0x13f   :  { %v7372_v35 = vpop.f32.mrb[29].mxu0  ;;  %v7405_v46 = vpop.f32.mrb[28].mxu1  ;;  %5778 = vmatprep.mubr.bf16.mxu1 %v8655_v11  ;;  %v8669_v32 = vld [vmem:[%s11072_s0 + $0x25c] ss:$232 sps:$4 sm:$0xff]   ;;  %v8689_v7 = vld [vmem:[%s11071_s1 + $0x9e8] sm:$0xff]  }
 0x140   :  { %v7373_v37 = vadd.f32 %v7372_v35, %v7371_v30  ;;  %v7374_v38 = vpop.f32.mrb[30].mxu0  ;;  %v7406_v48 = vpop.f32.mrb[29].mxu1  ;;  %v8668_v30 = vld [vmem:[%s11071_s1 + $0x9d0] sm:$0xff]   ;;  %v8674_v40 = vld [vmem:[%s11071_s1 + $0x958] sm:$0xff]   ;;  %v8690_v11 = vld [vmem:[%s11071_s1 + $0x928] sm:$0xff]  }
 0x141   :  { %v7375_v41 = vpop.f32.mrb[31].mxu0  ;;  %7768 = vmatpush3.bf16.msra.mxu0 %v8640_v45  ;;  %v7407_v49 = vadd.f32 %v7406_v48, %v7405_v46  ;;  %v7408_v50 = vpop.f32.mrb[30].mxu1  ;;  %7802 = vmatpush3.bf16.msra.mxu1 %v8641_v24  ;;  %v8671_v35 = vld [vmem:[%s11071_s1 + $0x910] sm:$0xff]   ;;  %v8675_v42 = vld [vmem:[%s11071_s1 + $0x9d8] sm:$0xff]  }
 0x142   :  { %v5048_v43 = vadd.f32 %v7373_v37, %v9999_v8  ;;  %v7376_v44 = vadd.f32 %v7375_v41, %v7374_v38  ;;  %v8642_v8 = vld [vmem:[%s11071_s1 + $0x870] sm:$0xff]   ;;  %v7409_v51 = vpop.f32.mrb[31].mxu1  ;;  %7803 = vmatprep.subr.bf16.mxu1 %v8643_v34  ;;  %v8673_v38 = vld [vmem:[%s11072_s0 + $0x258] ss:$232 sps:$4 sm:$0xff]  }
 0x143   :  { %7769 = vmatprep.subr.bf16.mxu0 %v8642_v8  ;;  %v7410_v54 = vadd.f32 %v7409_v51, %v7408_v50  ;;  %v8676_v45 = vld [vmem:[%s11071_s1 + $0x918] sm:$0xff]   ;;  %v8678_v50 = vld [vmem:[%s11072_s0 + $0x424] ss:$232 sps:$4 sm:$0xff]   ;;  %v8680_v34 = vld [vmem:[%s11072_s0 + $0x420] ss:$232 sps:$4 sm:$0xff]  }
 0x144   :  { %v5051_v47 = vadd.f32 %v7376_v44, %v10007_v27  ;;  %v10149_v27 = vadd.f32 %v7407_v49, %v5048_v43 }
 0x145   :  { %7770 = vmatpush3.bf16.msra.mxu0 %v8644_v52  ;;  %7804 = vmatpush3.bf16.msra.mxu1 %v8645_v55  ;;  %v8681_v52 = vld [vmem:[%s11071_s1 + $0x960] sm:$0xff]  }
 0x146   :  { %v10157_v31 = vadd.f32 %v7410_v54, %v5051_v47  ;;  %v7377_v59 = vpop.f32.mrb[32].mxu0  ;;  %7771 = vmatprep.subr.bf16.mxu0 %v8646_v56  ;;  %7805 = vmatprep.subr.bf16.mxu1 %v8647_v60  ;;  %v8677_v47 = vld [vmem:[%s11071_s1 + $0x998] sm:$0xff]   ;;  %v8682_v55 = vld [vmem:[%s11071_s1 + $0x9e0] sm:$0xff]   ;;  %v8683_v60 = vld [vmem:[%s11072_s0 + $0x42c] ss:$232 sps:$4 sm:$0xff]  }
 0x147   :  { %v7378_v61 = vpop.f32.mrb[33].mxu0  ;;  %v7411_v9 = vpop.f32.mrb[32].mxu1 }
 0x148   :  { %v7379_v0 = vadd.f32 %v7378_v61, %v7377_v59  ;;  %v7380_v1 = vpop.f32.mrb[34].mxu0  ;;  %v7412_v13 = vpop.f32.mrb[33].mxu1 }
 0x149   :  { %v7381_v39 = vpop.f32.mrb[35].mxu0  ;;  %7772 = vmatpush3.bf16.msra.mxu0 %v8648_v63  ;;  %7806 = vmatpush3.bf16.msra.mxu1 %v8649_v3  ;;  %v7413_v15 = vadd.f32 %v7412_v13, %v7411_v9  ;;  %v7414_v16 = vpop.f32.mrb[34].mxu1  ;;  %v8685_v63 = vld [vmem:[%s11071_s1 + $0x920] sm:$0xff]   ;;  %v8687_v3 = vld [vmem:[%s11072_s0 + $0x428] ss:$232 sps:$4 sm:$0xff]  }
 0x14a   :  { %v5056_v5 = vadd.f32 %v7379_v0, %v10044_v53  ;;  %v7382_v6 = vadd.f32 %v7381_v39, %v7380_v1  ;;  %v8656_v53 = vld [vmem:[%s11071_s1 + $0x940] sm:$0xff]   ;;  %v7415_v17 = vpop.f32.mrb[35].mxu1  ;;  %7859 = vmatprep.subr.bf16.mxu1 %v8657_v14 }
 0x14b   :  { %7825 = vmatprep.subr.bf16.mxu0 %v8656_v53  ;;  %v7416_v19 = vadd.f32 %v7415_v17, %v7414_v16  ;;  %v8691_v53 = vld [vmem:[%s11071_s1 + $0x9a8] sm:$0xff]  }
 0x14c   :  { %v5059_v12 = vadd.f32 %v7382_v6, %v10052_v57  ;;  %5722 = vmatmul.mubr.bf16.vlgmr.msra.gmra.mrb[96].mxu0 %v8650_v4  ;;  %5779 = vmatmul.mubr.bf16.vlgmr.msra.gmra.mrb[96].mxu1 %v8653_v10  ;;  %v8658_v57 = vld [vmem:[%s11071_s1 + $0x900] sm:$0xff]   ;;  %v10194_v18 = vadd.f32 %v7413_v15, %v5056_v5  ;;  %v8688_v5 = vld [vmem:[%s11071_s1 + $0x968] sm:$0xff]  }
 0x14d   :  { %7826 = vmatpush3.bf16.msra.mxu0 %v8658_v57  ;;  %7860 = vmatpush3.bf16.msra.mxu1 %v8659_v62  ;;  %v8693_v57 = vld [vmem:[%s11071_s1 + $0x9f0] sm:$0xff]  }
 0x14e   :  { %v10202_v22 = vadd.f32 %v7416_v19, %v5059_v12  ;;  %7827 = vmatprep.subr.bf16.mxu0 %v8660_v20  ;;  %7861 = vmatprep.subr.bf16.mxu1 %v8661_v21  ;;  %v8694_v62 = vld [vmem:[%s11071_s1 + $0x930] sm:$0xff]   ;;  %v8696_v21 = vld [vmem:[%s11071_s1 + $0x978] sm:$0xff]  }
 0x14f   :  { %5729 = vmatprep.mubr.bf16.mxu0 %v8664_v26  ;;  %5786 = vmatprep.mubr.bf16.mxu1 %v8669_v32  ;;  %v8695_v20 = vld [vmem:[%s11071_s1 + $0x9b0] sm:$0xff]   ;;  %v8697_v26 = vld [vmem:[%s11071_s1 + $0x9f8] sm:$0xff]  }
 0x151   :  { %7828 = vmatpush3.bf16.msra.mxu0 %v8662_v58  ;;  %7862 = vmatpush3.bf16.msra.mxu1 %v8663_v25 }
 0x152   :  { %7829 = vmatprep.subr.bf16.mxu0 %v8667_v29  ;;  %7863 = vmatprep.subr.bf16.mxu1 %v8668_v30  ;;  %v8698_v29 = vld [vmem:[%s11071_s1 + $0x938] sm:$0xff]  }
 0x154   :  { %5730 = vmatmul.mubr.bf16.gmra.mrb[100].mxu0 %v8666_v28  ;;  %5787 = vmatmul.mubr.bf16.gmra.mrb[100].mxu1 %v8673_v38 }
 0x155   :  { %7830 = vmatpush3.bf16.msra.mxu0 %v8671_v35  ;;  %7864 = vmatpush3.bf16.msra.mxu1 %v8672_v36  ;;  %v8699_v35 = vld [vmem:[%s11071_s1 + $0x9b8] sm:$0xff]  }
 0x156   :  { %v7433_v2 = vpop.f32.mrb[36].mxu0  ;;  %7831 = vmatprep.subr.bf16.mxu0 %v8674_v40  ;;  %7865 = vmatprep.subr.bf16.mxu1 %v8675_v42  ;;  %v8700_v36 = vld [vmem:[%s11072_s0 + $0x90] ss:$232 sps:$4 sm:$0xff]   ;;  %v8702_v40 = vld [vmem:[%s11072_s0 + $0x94] ss:$232 sps:$4 sm:$0xff]  }
 0x157   :  { %v7467_v37 = vpop.f32.mrb[36].mxu1  ;;  %v7434_v41 = vpop.f32.mrb[37].mxu0  ;;  %5737 = vmatprep.mubr.bf16.mxu0 %v8678_v50  ;;  %5794 = vmatprep.mubr.bf16.mxu1 %v8683_v60  ;;  %v8703_v42 = vld [vmem:[%s11072_s0 + $0x98] ss:$232 sps:$4 sm:$0xff]   ;;  %v8717_v60 = vld [vmem:[%s11071_s1 + $0xa50] sm:$0xff]  }
 0x158   :  { %v7435_v43 = vadd.f32 %v7434_v41, %v7433_v2  ;;  %v7468_v44 = vpop.f32.mrb[37].mxu1  ;;  %v7436_v24 = vpop.f32.mrb[38].mxu0 }
 0x159   :  { %v7469_v46 = vadd.f32 %v7468_v44, %v7467_v37  ;;  %v7470_v8 = vpop.f32.mrb[38].mxu1  ;;  %v7437_v49 = vpop.f32.mrb[39].mxu0  ;;  %7832 = vmatpush3.bf16.msra.mxu0 %v8676_v45  ;;  %7866 = vmatpush3.bf16.msra.mxu1 %v8677_v47 }
 0x15a   :  { %v5154_v48 = vadd.f32 %v7435_v43, %v10106_v23  ;;  %v7438_v51 = vadd.f32 %v7437_v49, %v7436_v24  ;;  %v7471_v23 = vpop.f32.mrb[39].mxu1  ;;  %7833 = vmatprep.subr.bf16.mxu0 %v8681_v52  ;;  %7867 = vmatprep.subr.bf16.mxu1 %v8682_v55  ;;  %v8705_v43 = vld [vmem:[%s11072_s0 + $0x9c] ss:$232 sps:$4 sm:$0xff]   ;;  %v8713_v55 = vld [vmem:[%s11071_s1 + $0xa88] sm:$0xff]  }
 0x15b   :  { %v7472_v59 = vadd.f32 %v7471_v23, %v7470_v8  ;;  %v8709_v8 = vld [vmem:[%s11071_s1 + $0xa80] sm:$0xff]   ;;  %v8712_v23 = vld [vmem:[%s11071_s1 + $0xa08] sm:$0xff]  }
 0x15c   :  { %v10256_v54 = vadd.f32 %v7469_v46, %v5154_v48  ;;  %v5157_v56 = vadd.f32 %v7438_v51, %v10118_v33  ;;  %5738 = vmatmul.mubr.bf16.gmra.mrb[104].mxu0 %v8680_v34  ;;  %v8686_v33 = vld [vmem:[%s11071_s1 + $0x9a0] sm:$0xff]   ;;  %5795 = vmatmul.mubr.bf16.gmra.mrb[104].mxu1 %v8687_v3  ;;  %v8710_v34 = vld [vmem:[%s11071_s1 + $0xa48] sm:$0xff]   ;;  %v8722_v3 = vld [vmem:[%s11071_s1 + $0xa90] sm:$0xff]  }
 0x15d   :  { %7834 = vmatpush3.bf16.msra.mxu0 %v8685_v63  ;;  %7868 = vmatpush3.bf16.msra.mxu1 %v8686_v33  ;;  %v8707_v46 = vld [vmem:[%s11071_s1 + $0xac0] sm:$0xff]   ;;  %v8711_v51 = vld [vmem:[%s11071_s1 + $0xac8] sm:$0xff]  }
 0x15e   :  { %v7439_v61 = vpop.f32.mrb[40].mxu0  ;;  %v10268_v0 = vadd.f32 %v7472_v59, %v5157_v56  ;;  %7835 = vmatprep.subr.bf16.mxu0 %v8688_v5  ;;  %7869 = vmatprep.subr.bf16.mxu1 %v8689_v7  ;;  %v8714_v56 = vld [vmem:[%s11072_s0 + $0x264] ss:$232 sps:$4 sm:$0xff]   ;;  %v8716_v59 = vld [vmem:[%s11072_s0 + $0x260] ss:$232 sps:$4 sm:$0xff]   ;;  %v8724_v5 = vld [vmem:[%s11071_s1 + $0xa58] sm:$0xff]  }
 0x15f   :  { %v7440_v1 = vpop.f32.mrb[41].mxu0  ;;  %v7473_v12 = vpop.f32.mrb[40].mxu1  ;;  %5835 = vmatprep.mubr.bf16.mxu0 %v8702_v40  ;;  %5892 = vmatprep.mubr.bf16.mxu1 %v8705_v43  ;;  %v8719_v63 = vld [vmem:[%s11072_s0 + $0x26c] ss:$232 sps:$4 sm:$0xff]   ;;  %v8725_v7 = vld [vmem:[%s11071_s1 + $0xad8] sm:$0xff]  }
 0x160   :  { %v7441_v39 = vadd.f32 %v7440_v1, %v7439_v61  ;;  %v7442_v4 = vpop.f32.mrb[42].mxu0  ;;  %v7474_v14 = vpop.f32.mrb[41].mxu1  ;;  %v8718_v61 = vld [vmem:[%s11071_s1 + $0xad0] sm:$0xff]   ;;  %v8739_v40 = vld [vmem:[%s11071_s1 + $0xae8] sm:$0xff]  }
 0x161   :  { %v7443_v6 = vpop.f32.mrb[43].mxu0  ;;  %7836 = vmatpush3.bf16.msra.mxu0 %v8690_v11  ;;  %v7475_v15 = vadd.f32 %v7474_v14, %v7473_v12  ;;  %v7476_v16 = vpop.f32.mrb[42].mxu1  ;;  %7870 = vmatpush3.bf16.msra.mxu1 %v8691_v53  ;;  %v8721_v1 = vld [vmem:[%s11071_s1 + $0xa10] sm:$0xff]   ;;  %v8726_v11 = vld [vmem:[%s11071_s1 + $0xa18] sm:$0xff]   ;;  %v8740_v43 = vld [vmem:[%s11071_s1 + $0xa28] sm:$0xff]  }
 0x162   :  { %v5162_v9 = vadd.f32 %v7441_v39, %v10149_v27  ;;  %v7444_v10 = vadd.f32 %v7443_v6, %v7442_v4  ;;  %v8692_v27 = vld [vmem:[%s11071_s1 + $0x970] sm:$0xff]   ;;  %v7477_v17 = vpop.f32.mrb[43].mxu1  ;;  %7871 = vmatprep.subr.bf16.mxu1 %v8693_v57 }
 0x163   :  { %7837 = vmatprep.subr.bf16.mxu0 %v8692_v27  ;;  %v7478_v19 = vadd.f32 %v7477_v17, %v7476_v16  ;;  %v8723_v4 = vld [vmem:[%s11072_s0 + $0x268] ss:$232 sps:$4 sm:$0xff]   ;;  %v8728_v16 = vld [vmem:[%s11072_s0 + $0x434] ss:$232 sps:$4 sm:$0xff]  }
 0x164   :  { %v5165_v13 = vadd.f32 %v7444_v10, %v10157_v31  ;;  %v10299_v31 = vadd.f32 %v7475_v15, %v5162_v9  ;;  %v8730_v57 = vld [vmem:[%s11072_s0 + $0x430] ss:$232 sps:$4 sm:$0xff]  }
 0x165   :  { %7838 = vmatpush3.bf16.msra.mxu0 %v8694_v62  ;;  %7872 = vmatpush3.bf16.msra.mxu1 %v8695_v20  ;;  %v8731_v62 = vld [vmem:[%s11071_s1 + $0xa60] sm:$0xff]  }
 0x166   :  { %v10307_v58 = vadd.f32 %v7478_v19, %v5165_v13  ;;  %v7445_v25 = vpop.f32.mrb[44].mxu0  ;;  %7839 = vmatprep.subr.bf16.mxu0 %v8696_v21  ;;  %7873 = vmatprep.subr.bf16.mxu1 %v8697_v26  ;;  %v8727_v13 = vld [vmem:[%s11071_s1 + $0xa98] sm:$0xff]   ;;  %v8732_v20 = vld [vmem:[%s11071_s1 + $0xae0] sm:$0xff]  }
 0x167   :  { %v7446_v28 = vpop.f32.mrb[45].mxu0  ;;  %v7479_v41 = vpop.f32.mrb[44].mxu1  ;;  %v8733_v26 = vld [vmem:[%s11072_s0 + $0x43c] ss:$232 sps:$4 sm:$0xff]  }
 0x168   :  { %v7447_v30 = vadd.f32 %v7446_v28, %v7445_v25  ;;  %v7448_v32 = vpop.f32.mrb[46].mxu0  ;;  %v7480_v45 = vpop.f32.mrb[45].mxu1 }
 0x169   :  { %v7449_v2 = vpop.f32.mrb[47].mxu0  ;;  %7840 = vmatpush3.bf16.msra.mxu0 %v8698_v29  ;;  %7874 = vmatpush3.bf16.msra.mxu1 %v8699_v35  ;;  %v7481_v24 = vadd.f32 %v7480_v45, %v7479_v41  ;;  %v7482_v47 = vpop.f32.mrb[46].mxu1  ;;  %v8735_v29 = vld [vmem:[%s11071_s1 + $0xa20] sm:$0xff]  }
 0x16a   :  { %v5170_v37 = vadd.f32 %v7447_v30, %v10194_v18  ;;  %v7450_v38 = vadd.f32 %v7449_v2, %v7448_v32  ;;  %v8706_v18 = vld [vmem:[%s11071_s1 + $0xa40] sm:$0xff]   ;;  %v7483_v48 = vpop.f32.mrb[47].mxu1  ;;  %7927 = vmatprep.subr.bf16.mxu1 %v8707_v46 }
 0x16b   :  { %7893 = vmatprep.subr.bf16.mxu0 %v8706_v18  ;;  %v7484_v50 = vadd.f32 %v7483_v48, %v7482_v47  ;;  %v8737_v35 = vld [vmem:[%s11072_s0 + $0x438] ss:$232 sps:$4 sm:$0xff]   ;;  %v8741_v18 = vld [vmem:[%s11071_s1 + $0xaa8] sm:$0xff]  }
 0x16c   :  { %v5173_v44 = vadd.f32 %v7450_v38, %v10202_v22  ;;  %5836 = vmatmul.mubr.bf16.vlgmr.msra.gmra.mrb[108].mxu0 %v8700_v36  ;;  %5893 = vmatmul.mubr.bf16.vlgmr.msra.gmra.mrb[108].mxu1 %v8703_v42  ;;  %v8708_v22 = vld [vmem:[%s11071_s1 + $0xa00] sm:$0xff]   ;;  %v10344_v49 = vadd.f32 %v7481_v24, %v5170_v37  ;;  %v8738_v37 = vld [vmem:[%s11071_s1 + $0xa68] sm:$0xff]  }
 0x16d   :  { %7894 = vmatpush3.bf16.msra.mxu0 %v8708_v22  ;;  %7928 = vmatpush3.bf16.msra.mxu1 %v8709_v8  ;;  %v8743_v22 = vld [vmem:[%s11071_s1 + $0xaf0] sm:$0xff]  }
 0x16e   :  { %v10352_v52 = vadd.f32 %v7484_v50, %v5173_v44  ;;  %7895 = vmatprep.subr.bf16.mxu0 %v8710_v34  ;;  %7929 = vmatprep.subr.bf16.mxu1 %v8711_v51  ;;  %v8744_v8 = vld [vmem:[%s11071_s1 + $0xa30] sm:$0xff]   ;;  %v8746_v51 = vld [vmem:[%s11071_s1 + $0xa78] sm:$0xff]  }
 0x16f   :  { %5843 = vmatprep.mubr.bf16.mxu0 %v8714_v56  ;;  %5900 = vmatprep.mubr.bf16.mxu1 %v8719_v63  ;;  %v8745_v34 = vld [vmem:[%s11071_s1 + $0xab0] sm:$0xff]   ;;  %v8747_v56 = vld [vmem:[%s11071_s1 + $0xaf8] sm:$0xff]  }
 0x171   :  { %7896 = vmatpush3.bf16.msra.mxu0 %v8712_v23  ;;  %7930 = vmatpush3.bf16.msra.mxu1 %v8713_v55 }
 0x172   :  { %7897 = vmatprep.subr.bf16.mxu0 %v8717_v60  ;;  %7931 = vmatprep.subr.bf16.mxu1 %v8718_v61  ;;  %v8748_v60 = vld [vmem:[%s11071_s1 + $0xa38] sm:$0xff]  }
 0x174   :  { %5844 = vmatmul.mubr.bf16.gmra.mrb[112].mxu0 %v8716_v59  ;;  %5901 = vmatmul.mubr.bf16.gmra.mrb[112].mxu1 %v8723_v4 }
 0x175   :  { %7898 = vmatpush3.bf16.msra.mxu0 %v8721_v1  ;;  %7932 = vmatpush3.bf16.msra.mxu1 %v8722_v3  ;;  %v8749_v1 = vld [vmem:[%s11071_s1 + $0xab8] sm:$0xff]   ;;  %v8750_v3 = vld [vmem:[%s11072_s0 + $0xa0] ss:$232 sps:$4 sm:$0xff]  }
 0x176   :  { %v7501_v33 = vpop.f32.mrb[48].mxu0  ;;  %7899 = vmatprep.subr.bf16.mxu0 %v8724_v5  ;;  %7933 = vmatprep.subr.bf16.mxu1 %v8725_v7  ;;  %v8752_v5 = vld [vmem:[%s11072_s0 + $0xa4] ss:$232 sps:$4 sm:$0xff]   ;;  %v8753_v7 = vld [vmem:[%s11072_s0 + $0xa8] ss:$232 sps:$4 sm:$0xff]  }
 0x177   :  { %v7535_v39 = vpop.f32.mrb[48].mxu1  ;;  %v7502_v6 = vpop.f32.mrb[49].mxu0  ;;  %5851 = vmatprep.mubr.bf16.mxu0 %v8728_v16  ;;  %5908 = vmatprep.mubr.bf16.mxu1 %v8733_v26  ;;  %v8767_v26 = vld [vmem:[%s11071_s1 + $0xb50] sm:$0xff]  }
 0x178   :  { %v7503_v9 = vadd.f32 %v7502_v6, %v7501_v33  ;;  %v7536_v10 = vpop.f32.mrb[49].mxu1  ;;  %v7504_v53 = vpop.f32.mrb[50].mxu0 }
 0x179   :  { %v7537_v12 = vadd.f32 %v7536_v10, %v7535_v39  ;;  %v7538_v27 = vpop.f32.mrb[50].mxu1  ;;  %v7505_v15 = vpop.f32.mrb[51].mxu0  ;;  %7900 = vmatpush3.bf16.msra.mxu0 %v8726_v11  ;;  %7934 = vmatpush3.bf16.msra.mxu1 %v8727_v13 }
 0x17a   :  { %v5268_v14 = vadd.f32 %v7503_v9, %v10256_v54  ;;  %v7506_v17 = vadd.f32 %v7505_v15, %v7504_v53  ;;  %v7539_v54 = vpop.f32.mrb[51].mxu1  ;;  %7901 = vmatprep.subr.bf16.mxu0 %v8731_v62  ;;  %7935 = vmatprep.subr.bf16.mxu1 %v8732_v20  ;;  %v8755_v9 = vld [vmem:[%s11072_s0 + $0xac] ss:$232 sps:$4 sm:$0xff]  }
 0x17b   :  { %v7540_v25 = vadd.f32 %v7539_v54, %v7538_v27  ;;  %v8759_v27 = vld [vmem:[%s11071_s1 + $0xb80] sm:$0xff]   ;;  %v8762_v54 = vld [vmem:[%s11071_s1 + $0xb08] sm:$0xff]  }
 0x17c   :  { %v10406_v19 = vadd.f32 %v7537_v12, %v5268_v14  ;;  %v5271_v21 = vadd.f32 %v7506_v17, %v10268_v0  ;;  %5852 = vmatmul.mubr.bf16.gmra.mrb[116].mxu0 %v8730_v57  ;;  %v8736_v0 = vld [vmem:[%s11071_s1 + $0xaa0] sm:$0xff]   ;;  %5909 = vmatmul.mubr.bf16.gmra.mrb[116].mxu1 %v8737_v35  ;;  %v8760_v57 = vld [vmem:[%s11071_s1 + $0xb48] sm:$0xff]   ;;  %v8772_v35 = vld [vmem:[%s11071_s1 + $0xb90] sm:$0xff]  }
 0x17d   :  { %7902 = vmatpush3.bf16.msra.mxu0 %v8735_v29  ;;  %7936 = vmatpush3.bf16.msra.mxu1 %v8736_v0  ;;  %v8757_v12 = vld [vmem:[%s11071_s1 + $0xbc0] sm:$0xff]   ;;  %v8761_v17 = vld [vmem:[%s11071_s1 + $0xbc8] sm:$0xff]  }
 0x17e   :  { %v7507_v28 = vpop.f32.mrb[52].mxu0  ;;  %v10418_v30 = vadd.f32 %v7540_v25, %v5271_v21  ;;  %7903 = vmatprep.subr.bf16.mxu0 %v8738_v37  ;;  %7937 = vmatprep.subr.bf16.mxu1 %v8739_v40  ;;  %v8763_v20 = vld [vmem:[%s11071_s1 + $0xb88] sm:$0xff]   ;;  %v8764_v21 = vld [vmem:[%s11072_s0 + $0x274] ss:$232 sps:$4 sm:$0xff]   ;;  %v8766_v25 = vld [vmem:[%s11072_s0 + $0x270] ss:$232 sps:$4 sm:$0xff]  }
 0x17f   :  { %v7508_v32 = vpop.f32.mrb[53].mxu0  ;;  %v7541_v44 = vpop.f32.mrb[52].mxu1  ;;  %5949 = vmatprep.mubr.bf16.mxu0 %v8752_v5  ;;  %6006 = vmatprep.mubr.bf16.mxu1 %v8755_v9  ;;  %v8769_v29 = vld [vmem:[%s11072_s0 + $0x27c] ss:$232 sps:$4 sm:$0xff]   ;;  %v8789_v5 = vld [vmem:[%s11071_s1 + $0xbe8] sm:$0xff]  }
 0x180   :  { %v7509_v2 = vadd.f32 %v7508_v32, %v7507_v28  ;;  %v7510_v36 = vpop.f32.mrb[54].mxu0  ;;  %v7542_v46 = vpop.f32.mrb[53].mxu1  ;;  %v8768_v28 = vld [vmem:[%s11071_s1 + $0xbd0] sm:$0xff]   ;;  %v8774_v37 = vld [vmem:[%s11071_s1 + $0xb58] sm:$0xff]   ;;  %v8790_v9 = vld [vmem:[%s11071_s1 + $0xb28] sm:$0xff]  }
 0x181   :  { %v7511_v38 = vpop.f32.mrb[55].mxu0  ;;  %7904 = vmatpush3.bf16.msra.mxu0 %v8740_v43  ;;  %v7543_v24 = vadd.f32 %v7542_v46, %v7541_v44  ;;  %v7544_v47 = vpop.f32.mrb[54].mxu1  ;;  %7938 = vmatpush3.bf16.msra.mxu1 %v8741_v18  ;;  %v8771_v32 = vld [vmem:[%s11071_s1 + $0xb10] sm:$0xff]   ;;  %v8775_v40 = vld [vmem:[%s11071_s1 + $0xbd8] sm:$0xff]  }
 0x182   :  { %v5276_v41 = vadd.f32 %v7509_v2, %v10299_v31  ;;  %v7512_v42 = vadd.f32 %v7511_v38, %v7510_v36  ;;  %v8742_v31 = vld [vmem:[%s11071_s1 + $0xa70] sm:$0xff]   ;;  %v7545_v48 = vpop.f32.mrb[55].mxu1  ;;  %7939 = vmatprep.subr.bf16.mxu1 %v8743_v22  ;;  %v8773_v36 = vld [vmem:[%s11072_s0 + $0x278] ss:$232 sps:$4 sm:$0xff]  }
 0x183   :  { %7905 = vmatprep.subr.bf16.mxu0 %v8742_v31  ;;  %v7546_v50 = vadd.f32 %v7545_v48, %v7544_v47  ;;  %v8776_v43 = vld [vmem:[%s11071_s1 + $0xb18] sm:$0xff]   ;;  %v8778_v47 = vld [vmem:[%s11072_s0 + $0x444] ss:$232 sps:$4 sm:$0xff]   ;;  %v8780_v22 = vld [vmem:[%s11072_s0 + $0x440] ss:$232 sps:$4 sm:$0xff]  }
 0x184   :  { %v5279_v45 = vadd.f32 %v7512_v42, %v10307_v58  ;;  %v10449_v58 = vadd.f32 %v7543_v24, %v5276_v41 }
 0x185   :  { %7906 = vmatpush3.bf16.msra.mxu0 %v8744_v8  ;;  %7940 = vmatpush3.bf16.msra.mxu1 %v8745_v34  ;;  %v8781_v8 = vld [vmem:[%s11071_s1 + $0xb60] sm:$0xff]  }
 0x186   :  { %v10457_v23 = vadd.f32 %v7546_v50, %v5279_v45  ;;  %v7513_v55 = vpop.f32.mrb[56].mxu0  ;;  %7907 = vmatprep.subr.bf16.mxu0 %v8746_v51  ;;  %7941 = vmatprep.subr.bf16.mxu1 %v8747_v56  ;;  %v8777_v45 = vld [vmem:[%s11071_s1 + $0xb98] sm:$0xff]   ;;  %v8782_v34 = vld [vmem:[%s11071_s1 + $0xbe0] sm:$0xff]   ;;  %v8783_v56 = vld [vmem:[%s11072_s0 + $0x44c] ss:$232 sps:$4 sm:$0xff]  }
 0x187   :  { %v7514_v59 = vpop.f32.mrb[57].mxu0  ;;  %v7547_v6 = vpop.f32.mrb[56].mxu1 }
 0x188   :  { %v7515_v61 = vadd.f32 %v7514_v59, %v7513_v55  ;;  %v7516_v63 = vpop.f32.mrb[58].mxu0  ;;  %v7548_v11 = vpop.f32.mrb[57].mxu1 }
 0x189   :  { %v7517_v33 = vpop.f32.mrb[59].mxu0  ;;  %7908 = vmatpush3.bf16.msra.mxu0 %v8748_v60  ;;  %7942 = vmatpush3.bf16.msra.mxu1 %v8749_v1  ;;  %v7549_v53 = vadd.f32 %v7548_v11, %v7547_v6  ;;  %v7550_v13 = vpop.f32.mrb[58].mxu1  ;;  %v8785_v60 = vld [vmem:[%s11071_s1 + $0xb20] sm:$0xff]   ;;  %v8787_v1 = vld [vmem:[%s11072_s0 + $0x448] ss:$232 sps:$4 sm:$0xff]  }
 0x18a   :  { %v5284_v39 = vadd.f32 %v7515_v61, %v10344_v49  ;;  %v7518_v4 = vadd.f32 %v7517_v33, %v7516_v63  ;;  %v8756_v49 = vld [vmem:[%s11071_s1 + $0xb40] sm:$0xff]   ;;  %v7551_v14 = vpop.f32.mrb[59].mxu1  ;;  %7995 = vmatprep.subr.bf16.mxu1 %v8757_v12 }
 0x18b   :  { %7961 = vmatprep.subr.bf16.mxu0 %v8756_v49  ;;  %v7552_v16 = vadd.f32 %v7551_v14, %v7550_v13  ;;  %v8791_v49 = vld [vmem:[%s11071_s1 + $0xba8] sm:$0xff]  }
 0x18c   :  { %v5287_v10 = vadd.f32 %v7518_v4, %v10352_v52  ;;  %5950 = vmatmul.mubr.bf16.vlgmr.msra.gmra.mrb[120].mxu0 %v8750_v3  ;;  %6007 = vmatmul.mubr.bf16.vlgmr.msra.gmra.mrb[120].mxu1 %v8753_v7  ;;  %v8758_v52 = vld [vmem:[%s11071_s1 + $0xb00] sm:$0xff]   ;;  %v10494_v15 = vadd.f32 %v7549_v53, %v5284_v39  ;;  %v8788_v39 = vld [vmem:[%s11071_s1 + $0xb68] sm:$0xff]  }
 0x18d   :  { %7962 = vmatpush3.bf16.msra.mxu0 %v8758_v52  ;;  %7996 = vmatpush3.bf16.msra.mxu1 %v8759_v27  ;;  %v8793_v52 = vld [vmem:[%s11071_s1 + $0xbf0] sm:$0xff]  }
 0x18e   :  { %v10502_v62 = vadd.f32 %v7552_v16, %v5287_v10  ;;  %7963 = vmatprep.subr.bf16.mxu0 %v8760_v57  ;;  %7997 = vmatprep.subr.bf16.mxu1 %v8761_v17  ;;  %v8794_v27 = vld [vmem:[%s11071_s1 + $0xb30] sm:$0xff]   ;;  %v8796_v17 = vld [vmem:[%s11071_s1 + $0xb78] sm:$0xff]  }
 0x18f   :  { %5957 = vmatprep.mubr.bf16.mxu0 %v8764_v21  ;;  %6014 = vmatprep.mubr.bf16.mxu1 %v8769_v29  ;;  %v8795_v57 = vld [vmem:[%s11071_s1 + $0xbb0] sm:$0xff]   ;;  %v8797_v21 = vld [vmem:[%s11071_s1 + $0xbf8] sm:$0xff]  }
 0x191   :  { %7964 = vmatpush3.bf16.msra.mxu0 %v8762_v54  ;;  %7998 = vmatpush3.bf16.msra.mxu1 %v8763_v20 }
 0x192   :  { %7965 = vmatprep.subr.bf16.mxu0 %v8767_v26  ;;  %7999 = vmatprep.subr.bf16.mxu1 %v8768_v28  ;;  %v8798_v26 = vld [vmem:[%s11071_s1 + $0xb38] sm:$0xff]  }
 0x194   :  { %5958 = vmatmul.mubr.bf16.gmra.mrb[124].mxu0 %v8766_v25  ;;  %6015 = vmatmul.mubr.bf16.gmra.mrb[124].mxu1 %v8773_v36 }
 0x195   :  { %7966 = vmatpush3.bf16.msra.mxu0 %v8771_v32  ;;  %8000 = vmatpush3.bf16.msra.mxu1 %v8772_v35  ;;  %v8799_v32 = vld [vmem:[%s11071_s1 + $0xbb8] sm:$0xff]  }
 0x196   :  { %v7569_v0 = vpop.f32.mrb[60].mxu0  ;;  %7967 = vmatprep.subr.bf16.mxu0 %v8774_v37  ;;  %8001 = vmatprep.subr.bf16.mxu1 %v8775_v40  ;;  %v8800_v35 = vld [vmem:[%s11072_s0 + $0xb0] ss:$232 sps:$4 sm:$0xff]   ;;  %v8802_v37 = vld [vmem:[%s11072_s0 + $0xb4] ss:$232 sps:$4 sm:$0xff]  }
 0x197   :  { %v7603_v2 = vpop.f32.mrb[60].mxu1  ;;  %v7570_v38 = vpop.f32.mrb[61].mxu0  ;;  %5965 = vmatprep.mubr.bf16.mxu0 %v8778_v47  ;;  %6022 = vmatprep.mubr.bf16.mxu1 %v8783_v56  ;;  %v8803_v40 = vld [vmem:[%s11072_s0 + $0xb8] ss:$232 sps:$4 sm:$0xff]   ;;  %v8817_v56 = vld [vmem:[%s11071_s1 + $0xc50] sm:$0xff]  }
 0x198   :  { %v7571_v41 = vadd.f32 %v7570_v38, %v7569_v0  ;;  %v7604_v42 = vpop.f32.mrb[61].mxu1  ;;  %v7572_v18 = vpop.f32.mrb[62].mxu0 }
 0x199   :  { %v7605_v44 = vadd.f32 %v7604_v42, %v7603_v2  ;;  %v7606_v31 = vpop.f32.mrb[62].mxu1  ;;  %v7573_v24 = vpop.f32.mrb[63].mxu0  ;;  %7968 = vmatpush3.bf16.msra.mxu0 %v8776_v43  ;;  %8002 = vmatpush3.bf16.msra.mxu1 %v8777_v45 }
 0x19a   :  { %v5382_v46 = vadd.f32 %v7571_v41, %v10406_v19  ;;  %v7574_v48 = vadd.f32 %v7573_v24, %v7572_v18  ;;  %v7607_v19 = vpop.f32.mrb[63].mxu1  ;;  %7969 = vmatprep.subr.bf16.mxu0 %v8781_v8  ;;  %8003 = vmatprep.subr.bf16.mxu1 %v8782_v34  ;;  %v8805_v41 = vld [vmem:[%s11072_s0 + $0xbc] ss:$232 sps:$4 sm:$0xff]   ;;  %v8813_v34 = vld [vmem:[%s11071_s1 + $0xc88] sm:$0xff]  }
 0x19b   :  { %v7608_v55 = vadd.f32 %v7607_v19, %v7606_v31  ;;  %v8809_v31 = vld [vmem:[%s11071_s1 + $0xc80] sm:$0xff]   ;;  %v8812_v19 = vld [vmem:[%s11071_s1 + $0xc08] sm:$0xff]  }
 0x19c   :  { %v10556_v50 = vadd.f32 %v7605_v44, %v5382_v46  ;;  %v5385_v51 = vadd.f32 %v7574_v48, %v10418_v30  ;;  %5966 = vmatmul.mubr.bf16.gmra.mrb[128].mxu0 %v8780_v22  ;;  %v8786_v30 = vld [vmem:[%s11071_s1 + $0xba0] sm:$0xff]   ;;  %6023 = vmatmul.mubr.bf16.gmra.mrb[128].mxu1 %v8787_v1  ;;  %v8810_v22 = vld [vmem:[%s11071_s1 + $0xc48] sm:$0xff]   ;;  %v8822_v1 = vld [vmem:[%s11071_s1 + $0xc90] sm:$0xff]  }
 0x19d   :  { %7970 = vmatpush3.bf16.msra.mxu0 %v8785_v60  ;;  %8004 = vmatpush3.bf16.msra.mxu1 %v8786_v30  ;;  %v8807_v44 = vld [vmem:[%s11071_s1 + $0xcc0] sm:$0xff]   ;;  %v8811_v48 = vld [vmem:[%s11071_s1 + $0xcc8] sm:$0xff]  }
 0x19e   :  { %v7575_v59 = vpop.f32.mrb[64].mxu0  ;;  %v10568_v61 = vadd.f32 %v7608_v55, %v5385_v51  ;;  %7971 = vmatprep.subr.bf16.mxu0 %v8788_v39  ;;  %8005 = vmatprep.subr.bf16.mxu1 %v8789_v5  ;;  %v8814_v51 = vld [vmem:[%s11072_s0 + $0x284] ss:$232 sps:$4 sm:$0xff]   ;;  %v8816_v55 = vld [vmem:[%s11072_s0 + $0x280] ss:$232 sps:$4 sm:$0xff]   ;;  %v8824_v39 = vld [vmem:[%s11071_s1 + $0xc58] sm:$0xff]  }
 0x19f   :  { %v7576_v63 = vpop.f32.mrb[65].mxu0  ;;  %v7609_v10 = vpop.f32.mrb[64].mxu1  ;;  %6063 = vmatprep.mubr.bf16.mxu0 %v8802_v37  ;;  %6120 = vmatprep.mubr.bf16.mxu1 %v8805_v41  ;;  %v8819_v60 = vld [vmem:[%s11072_s0 + $0x28c] ss:$232 sps:$4 sm:$0xff]   ;;  %v8825_v5 = vld [vmem:[%s11071_s1 + $0xcd8] sm:$0xff]  }
 0x1a0   :  { %v7577_v33 = vadd.f32 %v7576_v63, %v7575_v59  ;;  %v7578_v3 = vpop.f32.mrb[66].mxu0  ;;  %v7610_v12 = vpop.f32.mrb[65].mxu1  ;;  %v8818_v59 = vld [vmem:[%s11071_s1 + $0xcd0] sm:$0xff]   ;;  %v8839_v37 = vld [vmem:[%s11071_s1 + $0xce8] sm:$0xff]  }
 0x1a1   :  { %v7579_v4 = vpop.f32.mrb[67].mxu0  ;;  %7972 = vmatpush3.bf16.msra.mxu0 %v8790_v9  ;;  %v7611_v53 = vadd.f32 %v7610_v12, %v7609_v10  ;;  %v7612_v13 = vpop.f32.mrb[66].mxu1  ;;  %8006 = vmatpush3.bf16.msra.mxu1 %v8791_v49  ;;  %v8821_v63 = vld [vmem:[%s11071_s1 + $0xc10] sm:$0xff]   ;;  %v8826_v9 = vld [vmem:[%s11071_s1 + $0xc18] sm:$0xff]   ;;  %v8840_v41 = vld [vmem:[%s11071_s1 + $0xc28] sm:$0xff]  }
 0x1a2   :  { %v5390_v6 = vadd.f32 %v7577_v33, %v10449_v58  ;;  %v7580_v7 = vadd.f32 %v7579_v4, %v7578_v3  ;;  %v8792_v58 = vld [vmem:[%s11071_s1 + $0xb70] sm:$0xff]   ;;  %v7613_v14 = vpop.f32.mrb[67].mxu1  ;;  %8007 = vmatprep.subr.bf16.mxu1 %v8793_v52 }
 0x1a3   :  { %7973 = vmatprep.subr.bf16.mxu0 %v8792_v58  ;;  %v7614_v16 = vadd.f32 %v7613_v14, %v7612_v13  ;;  %v8823_v3 = vld [vmem:[%s11072_s0 + $0x288] ss:$232 sps:$4 sm:$0xff]   ;;  %v8828_v13 = vld [vmem:[%s11072_s0 + $0x454] ss:$232 sps:$4 sm:$0xff]  }
 0x1a4   :  { %v5393_v11 = vadd.f32 %v7580_v7, %v10457_v23  ;;  %v10599_v23 = vadd.f32 %v7611_v53, %v5390_v6  ;;  %v8830_v52 = vld [vmem:[%s11072_s0 + $0x450] ss:$232 sps:$4 sm:$0xff]  }
 0x1a5   :  { %7974 = vmatpush3.bf16.msra.mxu0 %v8794_v27  ;;  %8008 = vmatpush3.bf16.msra.mxu1 %v8795_v57  ;;  %v8831_v27 = vld [vmem:[%s11071_s1 + $0xc60] sm:$0xff]  }
 0x1a6   :  { %v10607_v54 = vadd.f32 %v7614_v16, %v5393_v11  ;;  %v7581_v20 = vpop.f32.mrb[68].mxu0  ;;  %7975 = vmatprep.subr.bf16.mxu0 %v8796_v17  ;;  %8009 = vmatprep.subr.bf16.mxu1 %v8797_v21  ;;  %v8827_v11 = vld [vmem:[%s11071_s1 + $0xc98] sm:$0xff]   ;;  %v8832_v57 = vld [vmem:[%s11071_s1 + $0xce0] sm:$0xff]  }
 0x1a7   :  { %v7582_v25 = vpop.f32.mrb[69].mxu0  ;;  %v7615_v38 = vpop.f32.mrb[68].mxu1  ;;  %v8833_v21 = vld [vmem:[%s11072_s0 + $0x45c] ss:$232 sps:$4 sm:$0xff]  }
 0x1a8   :  { %v7583_v28 = vadd.f32 %v7582_v25, %v7581_v20  ;;  %v7584_v29 = vpop.f32.mrb[70].mxu0  ;;  %v7616_v43 = vpop.f32.mrb[69].mxu1 }
 0x1a9   :  { %v7585_v0 = vpop.f32.mrb[71].mxu0  ;;  %7976 = vmatpush3.bf16.msra.mxu0 %v8798_v26  ;;  %8010 = vmatpush3.bf16.msra.mxu1 %v8799_v32  ;;  %v7617_v18 = vadd.f32 %v7616_v43, %v7615_v38  ;;  %v7618_v45 = vpop.f32.mrb[70].mxu1  ;;  %v8835_v26 = vld [vmem:[%s11071_s1 + $0xc20] sm:$0xff]  }
 0x1aa   :  { %v5398_v2 = vadd.f32 %v7583_v28, %v10494_v15  ;;  %v7586_v36 = vadd.f32 %v7585_v0, %v7584_v29  ;;  %v8806_v15 = vld [vmem:[%s11071_s1 + $0xc40] sm:$0xff]   ;;  %v7619_v46 = vpop.f32.mrb[71].mxu1  ;;  %8063 = vmatprep.subr.bf16.mxu1 %v8807_v44 }
 0x1ab   :  { %8029 = vmatprep.subr.bf16.mxu0 %v8806_v15  ;;  %v7620_v47 = vadd.f32 %v7619_v46, %v7618_v45  ;;  %v8837_v32 = vld [vmem:[%s11072_s0 + $0x458] ss:$232 sps:$4 sm:$0xff]   ;;  %v8841_v15 = vld [vmem:[%s11071_s1 + $0xca8] sm:$0xff]  }
 0x1ac   :  { %v5401_v42 = vadd.f32 %v7586_v36, %v10502_v62  ;;  %6064 = vmatmul.mubr.bf16.vlgmr.msra.gmra.mrb[132].mxu0 %v8800_v35  ;;  %6121 = vmatmul.mubr.bf16.vlgmr.msra.gmra.mrb[132].mxu1 %v8803_v40  ;;  %v8808_v62 = vld [vmem:[%s11071_s1 + $0xc00] sm:$0xff]   ;;  %v10644_v24 = vadd.f32 %v7617_v18, %v5398_v2  ;;  %v8838_v2 = vld [vmem:[%s11071_s1 + $0xc68] sm:$0xff]  }
 0x1ad   :  { %8030 = vmatpush3.bf16.msra.mxu0 %v8808_v62  ;;  %8064 = vmatpush3.bf16.msra.mxu1 %v8809_v31  ;;  %v8843_v62 = vld [vmem:[%s11071_s1 + $0xcf0] sm:$0xff]  }
 0x1ae   :  { %v10652_v8 = vadd.f32 %v7620_v47, %v5401_v42  ;;  %8031 = vmatprep.subr.bf16.mxu0 %v8810_v22  ;;  %8065 = vmatprep.subr.bf16.mxu1 %v8811_v48  ;;  %v8844_v31 = vld [vmem:[%s11071_s1 + $0xc30] sm:$0xff]   ;;  %v8846_v48 = vld [vmem:[%s11071_s1 + $0xc78] sm:$0xff]  }
 0x1af   :  { %6071 = vmatprep.mubr.bf16.mxu0 %v8814_v51  ;;  %6128 = vmatprep.mubr.bf16.mxu1 %v8819_v60  ;;  %v8845_v22 = vld [vmem:[%s11071_s1 + $0xcb0] sm:$0xff]   ;;  %v8847_v51 = vld [vmem:[%s11071_s1 + $0xcf8] sm:$0xff]  }
 0x1b1   :  { %8032 = vmatpush3.bf16.msra.mxu0 %v8812_v19  ;;  %8066 = vmatpush3.bf16.msra.mxu1 %v8813_v34 }
 0x1b2   :  { %8033 = vmatprep.subr.bf16.mxu0 %v8817_v56  ;;  %8067 = vmatprep.subr.bf16.mxu1 %v8818_v59  ;;  %v8848_v56 = vld [vmem:[%s11071_s1 + $0xc38] sm:$0xff]  }
 0x1b4   :  { %6072 = vmatmul.mubr.bf16.gmra.mrb[136].mxu0 %v8816_v55  ;;  %6129 = vmatmul.mubr.bf16.gmra.mrb[136].mxu1 %v8823_v3 }
 0x1b5   :  { %8034 = vmatpush3.bf16.msra.mxu0 %v8821_v63  ;;  %8068 = vmatpush3.bf16.msra.mxu1 %v8822_v1  ;;  %v8849_v63 = vld [vmem:[%s11071_s1 + $0xcb8] sm:$0xff]   ;;  %v8850_v1 = vld [vmem:[%s11072_s0 + $0xc0] ss:$232 sps:$4 sm:$0xff]  }
 0x1b6   :  { %v7637_v30 = vpop.f32.mrb[72].mxu0  ;;  %8035 = vmatprep.subr.bf16.mxu0 %v8824_v39  ;;  %8069 = vmatprep.subr.bf16.mxu1 %v8825_v5  ;;  %v8852_v39 = vld [vmem:[%s11072_s0 + $0xc4] ss:$232 sps:$4 sm:$0xff]   ;;  %v8853_v5 = vld [vmem:[%s11072_s0 + $0xc8] ss:$232 sps:$4 sm:$0xff]  }
 0x1b7   :  { %v7671_v33 = vpop.f32.mrb[72].mxu1  ;;  %v7638_v4 = vpop.f32.mrb[73].mxu0  ;;  %6079 = vmatprep.mubr.bf16.mxu0 %v8828_v13  ;;  %6136 = vmatprep.mubr.bf16.mxu1 %v8833_v21  ;;  %v8867_v21 = vld [vmem:[%s11071_s1 + $0xd50] sm:$0xff]  }
 0x1b8   :  { %v7639_v6 = vadd.f32 %v7638_v4, %v7637_v30  ;;  %v7672_v7 = vpop.f32.mrb[73].mxu1  ;;  %v7640_v49 = vpop.f32.mrb[74].mxu0 }
 0x1b9   :  { %v7673_v10 = vadd.f32 %v7672_v7, %v7671_v33  ;;  %v7674_v58 = vpop.f32.mrb[74].mxu1  ;;  %v7641_v53 = vpop.f32.mrb[75].mxu0  ;;  %8036 = vmatpush3.bf16.msra.mxu0 %v8826_v9  ;;  %8070 = vmatpush3.bf16.msra.mxu1 %v8827_v11 }
 0x1ba   :  { %v5496_v12 = vadd.f32 %v7639_v6, %v10556_v50  ;;  %v7642_v14 = vadd.f32 %v7641_v53, %v7640_v49  ;;  %v7675_v50 = vpop.f32.mrb[75].mxu1  ;;  %8037 = vmatprep.subr.bf16.mxu0 %v8831_v27  ;;  %8071 = vmatprep.subr.bf16.mxu1 %v8832_v57  ;;  %v8855_v6 = vld [vmem:[%s11072_s0 + $0xcc] ss:$232 sps:$4 sm:$0xff]  }
 0x1bb   :  { %v7676_v20 = vadd.f32 %v7675_v50, %v7674_v58  ;;  %v8859_v58 = vld [vmem:[%s11071_s1 + $0xd80] sm:$0xff]   ;;  %v8862_v50 = vld [vmem:[%s11071_s1 + $0xd08] sm:$0xff]  }
 0x1bc   :  { %v10706_v16 = vadd.f32 %v7673_v10, %v5496_v12  ;;  %v5499_v17 = vadd.f32 %v7642_v14, %v10568_v61  ;;  %6080 = vmatmul.mubr.bf16.gmra.mrb[140].mxu0 %v8830_v52  ;;  %v8836_v61 = vld [vmem:[%s11071_s1 + $0xca0] sm:$0xff]   ;;  %6137 = vmatmul.mubr.bf16.gmra.mrb[140].mxu1 %v8837_v32  ;;  %v8860_v52 = vld [vmem:[%s11071_s1 + $0xd48] sm:$0xff]   ;;  %v8872_v32 = vld [vmem:[%s11071_s1 + $0xd90] sm:$0xff]  }
 0x1bd   :  { %8038 = vmatpush3.bf16.msra.mxu0 %v8835_v26  ;;  %8072 = vmatpush3.bf16.msra.mxu1 %v8836_v61  ;;  %v8857_v10 = vld [vmem:[%s11071_s1 + $0xdc0] sm:$0xff]   ;;  %v8861_v14 = vld [vmem:[%s11071_s1 + $0xdc8] sm:$0xff]  }
 0x1be   :  { %v10718_v28 = vadd.f32 %v7676_v20, %v5499_v17  ;;  %8039 = vmatprep.subr.bf16.mxu0 %v8838_v2  ;;  %8073 = vmatprep.subr.bf16.mxu1 %v8839_v37  ;;  %v8863_v57 = vld [vmem:[%s11071_s1 + $0xd88] sm:$0xff]   ;;  %v8864_v17 = vld [vmem:[%s11072_s0 + $0x294] ss:$232 sps:$4 sm:$0xff]   ;;  %v8866_v20 = vld [vmem:[%s11072_s0 + $0x290] ss:$232 sps:$4 sm:$0xff]  }
 0x1bf   :  { %v7677_v42 = vpop.f32.mrb[76].mxu1  ;;  %6177 = vmatprep.mubr.bf16.mxu0 %v8852_v39  ;;  %6234 = vmatprep.mubr.bf16.mxu1 %v8855_v6  ;;  %v8869_v26 = vld [vmem:[%s11072_s0 + $0x29c] ss:$232 sps:$4 sm:$0xff]  }
 0x1c0   :  { %v7678_v44 = vpop.f32.mrb[77].mxu1  ;;  %v8874_v2 = vld [vmem:[%s11071_s1 + $0xd58] sm:$0xff]  }
 0x1c1   :  { %8040 = vmatpush3.bf16.msra.mxu0 %v8840_v41  ;;  %v7679_v18 = vadd.f32 %v7678_v44, %v7677_v42  ;;  %v7680_v45 = vpop.f32.mrb[78].mxu1  ;;  %8074 = vmatpush3.bf16.msra.mxu1 %v8841_v15  ;;  %v8875_v37 = vld [vmem:[%s11071_s1 + $0xdd8] sm:$0xff]  }
 0x1c2   :  { %v7681_v46 = vpop.f32.mrb[79].mxu1  ;;  %8075 = vmatprep.subr.bf16.mxu1 %v8843_v62  ;;  %v8876_v41 = vld [vmem:[%s11071_s1 + $0xd18] sm:$0xff]   ;;  %v8880_v62 = vld [vmem:[%s11072_s0 + $0x460] ss:$232 sps:$4 sm:$0xff]  }
 0x1c3   :  { %v7682_v47 = vadd.f32 %v7681_v46, %v7680_v45  ;;  %v8878_v45 = vld [vmem:[%s11072_s0 + $0x464] ss:$232 sps:$4 sm:$0xff]  }
 0x1c5   :  { %8076 = vmatpush3.bf16.msra.mxu1 %v8845_v22 }
 0x1c6   :  { %8077 = vmatprep.subr.bf16.mxu1 %v8847_v51 }
 0x1c9   :  { %8078 = vmatpush3.bf16.msra.mxu1 %v8849_v63 }
 0x1ca   :  { %8131 = vmatprep.subr.bf16.mxu1 %v8857_v10 }
 0x1cc   :  { %6235 = vmatmul.mubr.bf16.vlgmr.msra.gmra.mrb[144].mxu1 %v8853_v5 }
 0x1cd   :  { %8132 = vmatpush3.bf16.msra.mxu1 %v8859_v58  ;;  %6242 = vmatprep.mubr.bf16.mxu1 %v8869_v26 }
 0x1ce   :  { %8133 = vmatprep.subr.bf16.mxu1 %v8861_v14  ;;  %v8895_v14 = vld [vmem:[%s11071_s1 + $0xdb0] sm:$0xff]  }
 0x1d0   :  { %v7643_v25 = vpop.f32.mrb[76].mxu0 }
 0x1d1   :  { %v7644_v29 = vpop.f32.mrb[77].mxu0  ;;  %8134 = vmatpush3.bf16.msra.mxu1 %v8863_v57 }
 0x1d2   :  { %v7645_v0 = vadd.f32 %v7644_v29, %v7643_v25  ;;  %v7646_v35 = vpop.f32.mrb[78].mxu0  ;;  %v8868_v25 = vld [vmem:[%s11071_s1 + $0xdd0] sm:$0xff]  }
 0x1d3   :  { %v7647_v36 = vpop.f32.mrb[79].mxu0  ;;  %8135 = vmatprep.subr.bf16.mxu1 %v8868_v25  ;;  %v8871_v29 = vld [vmem:[%s11071_s1 + $0xd10] sm:$0xff]   ;;  %v8898_v25 = vld [vmem:[%s11071_s1 + $0xd38] sm:$0xff]  }
 0x1d4   :  { %v5504_v38 = vadd.f32 %v7645_v0, %v10599_v23  ;;  %v7648_v40 = vadd.f32 %v7647_v36, %v7646_v35  ;;  %v8842_v23 = vld [vmem:[%s11071_s1 + $0xc70] sm:$0xff]   ;;  %v8873_v35 = vld [vmem:[%s11072_s0 + $0x298] ss:$232 sps:$4 sm:$0xff]  }
 0x1d5   :  { %8041 = vmatprep.subr.bf16.mxu0 %v8842_v23  ;;  %8136 = vmatpush3.bf16.msra.mxu1 %v8872_v32 }
 0x1d6   :  { %v5507_v43 = vadd.f32 %v7648_v40, %v10607_v54  ;;  %v10749_v54 = vadd.f32 %v7679_v18, %v5504_v38  ;;  %8042 = vmatpush3.bf16.msra.mxu0 %v8844_v31  ;;  %6243 = vmatmul.mubr.bf16.gmra.mrb[148].mxu1 %v8873_v35  ;;  %v8943_v31 = vmov 0  }
 0x1d7   :  { %8043 = vmatprep.subr.bf16.mxu0 %v8846_v48  ;;  %8137 = vmatprep.subr.bf16.mxu1 %v8875_v37  ;;  %v8882_v48 = vld [vmem:[%s11071_s1 + $0xde0] sm:$0xff]  }
 0x1d8   :  { %v10757_v19 = vadd.f32 %v7682_v47, %v5507_v43  ;;  %v7649_v34 = vpop.f32.mrb[80].mxu0  ;;  %v8877_v43 = vld [vmem:[%s11071_s1 + $0xd98] sm:$0xff]   ;;  %8217 = vset.pattern.permute.xlu1 %v8943_v31  ;;  %v8881_v47 = vld [vmem:[%s11071_s1 + $0xd60] sm:$0xff]   ;;  %8216 = vset.pattern.permute.xlu0 %v8943_v31 }
 0x1d9   :  { %v7650_v55 = vpop.f32.mrb[81].mxu0  ;;  %v7683_v4 = vpop.f32.mrb[80].mxu1  ;;  %8138 = vmatpush3.bf16.msra.mxu1 %v8877_v43  ;;  %v8912_v31 = vld [vmem:[%s11072_s0 + $0x2a0] ss:$232 sps:$4 sm:$0xff]  }
 0x1da   :  { %v7651_v59 = vadd.f32 %v7650_v55, %v7649_v34  ;;  %v7652_v60 = vpop.f32.mrb[82].mxu0  ;;  %8044 = vmatpush3.bf16.msra.mxu0 %v8848_v56  ;;  %v7684_v9 = vpop.f32.mrb[81].mxu1  ;;  %v8883_v55 = vld [vmem:[%s11072_s0 + $0x46c] ss:$232 sps:$4 sm:$0xff]   ;;  %8139 = vmatprep.subr.bf16.mxu1 %v8882_v48 }
 0x1db   :  { %v7653_v30 = vpop.f32.mrb[83].mxu0  ;;  %v7685_v49 = vadd.f32 %v7684_v9, %v7683_v4  ;;  %v7686_v11 = vpop.f32.mrb[82].mxu1  ;;  %6250 = vmatprep.mubr.bf16.mxu1 %v8883_v55  ;;  %v8889_v4 = vld [vmem:[%s11071_s1 + $0xde8] sm:$0xff]   ;;  %v8918_v55 = vld [vmem:[%s11071_s1 + $0xe58] sm:$0xff]  }
 0x1dc   :  { %v5512_v33 = vadd.f32 %v7651_v59, %v10644_v24  ;;  %v7654_v3 = vadd.f32 %v7653_v30, %v7652_v60  ;;  %v8856_v24 = vld [vmem:[%s11071_s1 + $0xd40] sm:$0xff]   ;;  %v7687_v12 = vpop.f32.mrb[83].mxu1  ;;  %v8887_v30 = vld [vmem:[%s11072_s0 + $0x468] ss:$232 sps:$4 sm:$0xff]   ;;  %v8914_v48 = vld [vmem:[%s11072_s0 + $0x2ac] ss:$232 sps:$4 sm:$0xff]  }
 0x1dd   :  { %6178 = vmatmul.mubr.bf16.vlgmr.msra.gmra.mrb[144].mxu0 %v8850_v1  ;;  %8097 = vmatprep.subr.bf16.mxu0 %v8856_v24  ;;  %v7688_v13 = vadd.f32 %v7687_v12, %v7686_v11  ;;  %v8885_v59 = vld [vmem:[%s11071_s1 + $0xd20] sm:$0xff]   ;;  %v8891_v9 = vld [vmem:[%s11071_s1 + $0xda8] sm:$0xff]   ;;  %v8893_v12 = vld [vmem:[%s11071_s1 + $0xdf0] sm:$0xff]  }
 0x1de   :  { %v5515_v7 = vadd.f32 %v7654_v3, %v10652_v8  ;;  %v8858_v8 = vld [vmem:[%s11071_s1 + $0xd00] sm:$0xff]   ;;  %v10794_v53 = vadd.f32 %v7685_v49, %v5512_v33  ;;  %6185 = vmatprep.mubr.bf16.mxu0 %v8864_v17  ;;  %v8888_v3 = vld [vmem:[%s11071_s1 + $0xd68] sm:$0xff]   ;;  %6251 = vmatmul.mubr.bf16.gmra.mrb[152].mxu1 %v8887_v30 }
 0x1df   :  { %8098 = vmatpush3.bf16.msra.mxu0 %v8858_v8 }
 0x1e0   :  { %v10802_v27 = vadd.f32 %v7688_v13, %v5515_v7  ;;  %8099 = vmatprep.subr.bf16.mxu0 %v8860_v52  ;;  %v8890_v7 = vld [vmem:[%s11071_s1 + $0xd28] sm:$0xff]   ;;  %v8894_v13 = vld [vmem:[%s11071_s1 + $0xd30] sm:$0xff]  }
 0x1e3   :  { %8100 = vmatpush3.bf16.msra.mxu0 %v8862_v50  ;;  %v8896_v50 = vld [vmem:[%s11071_s1 + $0xd78] sm:$0xff]  }
 0x1e4   :  { %8101 = vmatprep.subr.bf16.mxu0 %v8867_v21 }
 0x1e5   :  { %6186 = vmatmul.mubr.bf16.gmra.mrb[148].mxu0 %v8866_v20  ;;  %v8897_v20 = vld [vmem:[%s11071_s1 + $0xdf8] sm:$0xff]  }
 0x1e6   :  { %6193 = vmatprep.mubr.bf16.mxu0 %v8878_v45 }
 0x1e7   :  { %8102 = vmatpush3.bf16.msra.mxu0 %v8871_v29 }
 0x1e8   :  { %8103 = vmatprep.subr.bf16.mxu0 %v8874_v2 }
 0x1eb   :  { %8104 = vmatpush3.bf16.msra.mxu0 %v8876_v41 }
 0x1ec   :  { %8105 = vmatprep.subr.bf16.mxu0 %v8881_v47  ;;  %v8913_v47 = vld [vmem:[%s11071_s1 + $0xe50] sm:$0xff]  }
 0x1ed   :  { %6194 = vmatmul.mubr.bf16.gmra.mrb[152].mxu0 %v8880_v62 }
 0x1ef   :  { %8106 = vmatpush3.bf16.msra.mxu0 %v8885_v59  ;;  %v8920_v59 = vld [vmem:[%s11072_s0 + $0x474] ss:$232 sps:$4 sm:$0xff]  }
 0x1f0   :  { %8107 = vmatprep.subr.bf16.mxu0 %v8888_v3  ;;  %v8927_v3 = vld [vmem:[%s11072_s0 + $0x478] ss:$232 sps:$4 sm:$0xff]  }
 0x1f3   :  { %8108 = vmatpush3.bf16.msra.mxu0 %v8890_v7  ;;  %v8928_v7 = vld [vmem:[%s11071_s1 + $0xe68] sm:$0xff]  }
 0x1fe   :  { %v7705_v61 = vpop.f32.mrb[84].mxu0 }
 0x1ff   :  { %v7739_v0 = vpop.f32.mrb[84].mxu1  ;;  %v7706_v36 = vpop.f32.mrb[85].mxu0 }
 0x200   :  { %v7707_v38 = vadd.f32 %v7706_v36, %v7705_v61  ;;  %v7740_v40 = vpop.f32.mrb[85].mxu1  ;;  %v7708_v15 = vpop.f32.mrb[86].mxu0  ;;  %v8899_v61 = vld [vmem:[%s11071_s1 + $0xdb8] sm:$0xff]  }
 0x201   :  { %v7741_v42 = vadd.f32 %v7740_v40, %v7739_v0  ;;  %v7742_v23 = vpop.f32.mrb[86].mxu1  ;;  %v7709_v18 = vpop.f32.mrb[87].mxu0  ;;  %v8900_v0 = vld [vmem:[%s11072_s0 + $0xd0] ss:$232 sps:$4 sm:$0xff]   ;;  %v8902_v36 = vld [vmem:[%s11072_s0 + $0xd4] ss:$232 sps:$4 sm:$0xff]  }
 0x202   :  { %v5610_v44 = vadd.f32 %v7707_v38, %v10706_v16  ;;  %v7710_v46 = vadd.f32 %v7709_v18, %v7708_v15  ;;  %v7743_v22 = vpop.f32.mrb[87].mxu1  ;;  %v8903_v38 = vld [vmem:[%s11072_s0 + $0xd8] ss:$232 sps:$4 sm:$0xff]   ;;  %v8905_v40 = vld [vmem:[%s11072_s0 + $0xdc] ss:$232 sps:$4 sm:$0xff]   ;;  %6291 = vmatprep.mubr.bf16.mxu0 %v8902_v36  ;;  %v8909_v18 = vld [vmem:[%s11071_s1 + $0xe08] sm:$0xff]  }
 0x203   :  { %v7744_v51 = vadd.f32 %v7743_v22, %v7742_v23  ;;  %6348 = vmatprep.mubr.bf16.mxu1 %v8905_v40  ;;  %v8907_v15 = vld [vmem:[%s11071_s1 + $0xe00] sm:$0xff]   ;;  %v8933_v36 = vld [vmem:[%s11071_s1 + $0xe38] sm:$0xff]  }
 0x204   :  { %v10856_v16 = vadd.f32 %v7741_v42, %v5610_v44  ;;  %v5613_v34 = vadd.f32 %v7710_v46, %v10718_v28  ;;  %v8886_v28 = vld [vmem:[%s11071_s1 + $0xda0] sm:$0xff]  }
 0x205   :  { %8140 = vmatpush3.bf16.msra.mxu1 %v8886_v28  ;;  %v8910_v46 = vld [vmem:[%s11072_s0 + $0x2a4] ss:$232 sps:$4 sm:$0xff]  }
 0x206   :  { %v7711_v56 = vpop.f32.mrb[88].mxu0  ;;  %v10868_v60 = vadd.f32 %v7744_v51, %v5613_v34  ;;  %8141 = vmatprep.subr.bf16.mxu1 %v8889_v4  ;;  %v8916_v34 = vld [vmem:[%s11071_s1 + $0xe10] sm:$0xff]   ;;  %v8923_v28 = vld [vmem:[%s11071_s1 + $0xe60] sm:$0xff]  }
 0x207   :  { %v7712_v63 = vpop.f32.mrb[89].mxu0  ;;  %v7745_v24 = vpop.f32.mrb[88].mxu1  ;;  %v8917_v51 = vld [vmem:[%s11072_s0 + $0x2a8] ss:$232 sps:$4 sm:$0xff]   ;;  %v8926_v4 = vld [vmem:[%s11071_s1 + $0xe20] sm:$0xff]  }
 0x208   :  { %v7713_v1 = vadd.f32 %v7712_v63, %v7711_v56  ;;  %v7714_v33 = vpop.f32.mrb[90].mxu0  ;;  %v7746_v49 = vpop.f32.mrb[89].mxu1  ;;  %v8919_v56 = vld [vmem:[%s11071_s1 + $0xe18] sm:$0xff]  }
 0x209   :  { %v7715_v39 = vpop.f32.mrb[91].mxu0  ;;  %v7747_v11 = vadd.f32 %v7746_v49, %v7745_v24  ;;  %v7748_v8 = vpop.f32.mrb[90].mxu1  ;;  %8142 = vmatpush3.bf16.msra.mxu1 %v8891_v9  ;;  %v8922_v63 = vld [vmem:[%s11072_s0 + $0x470] ss:$232 sps:$4 sm:$0xff]  }
 0x20a   :  { %v5618_v5 = vadd.f32 %v7713_v1, %v10749_v54  ;;  %v7716_v6 = vadd.f32 %v7715_v39, %v7714_v33  ;;  %v8892_v54 = vld [vmem:[%s11071_s1 + $0xd70] sm:$0xff]   ;;  %v7749_v58 = vpop.f32.mrb[91].mxu1  ;;  %8143 = vmatprep.subr.bf16.mxu1 %v8893_v12  ;;  %v8924_v1 = vld [vmem:[%s11072_s0 + $0x47c] ss:$232 sps:$4 sm:$0xff]  }
 0x20b   :  { %8109 = vmatprep.subr.bf16.mxu0 %v8892_v54  ;;  %v7750_v52 = vadd.f32 %v7749_v58, %v7748_v8 }
 0x20c   :  { %v5621_v10 = vadd.f32 %v7716_v6, %v10757_v19  ;;  %v10899_v19 = vadd.f32 %v7747_v11, %v5618_v5  ;;  %8110 = vmatpush3.bf16.msra.mxu0 %v8894_v13  ;;  %v8929_v11 = vld [vmem:[%s11071_s1 + $0xe28] sm:$0xff]   ;;  %v8930_v13 = vld [vmem:[%s11071_s1 + $0xe70] sm:$0xff]  }
 0x20d   :  { %8144 = vmatpush3.bf16.msra.mxu1 %v8895_v14  ;;  %8111 = vmatprep.subr.bf16.mxu0 %v8896_v50  ;;  %v8936_v14 = vld [vmem:[%s11072_s0 + $0xe4] ss:$232 sps:$4 sm:$0xff]  }
 0x20e   :  { %v10907_v57 = vadd.f32 %v7750_v52, %v5621_v10  ;;  %v7717_v17 = vpop.f32.mrb[92].mxu0  ;;  %8145 = vmatprep.subr.bf16.mxu1 %v8897_v20  ;;  %v8939_v20 = vld [vmem:[%s11072_s0 + $0x2b4] ss:$232 sps:$4 sm:$0xff]  }
 0x20f   :  { %v7718_v21 = vpop.f32.mrb[93].mxu0  ;;  %v7751_v37 = vpop.f32.mrb[92].mxu1 }
 0x210   :  { %v7719_v26 = vadd.f32 %v7718_v21, %v7717_v17  ;;  %v7720_v29 = vpop.f32.mrb[94].mxu0  ;;  %8112 = vmatpush3.bf16.msra.mxu0 %v8898_v25  ;;  %v7752_v42 = vpop.f32.mrb[93].mxu1  ;;  %v8931_v17 = vld [vmem:[%s11071_s1 + $0xe30] sm:$0xff]  }
 0x211   :  { %v7721_v32 = vpop.f32.mrb[95].mxu0  ;;  %8146 = vmatpush3.bf16.msra.mxu1 %v8899_v61  ;;  %v7753_v43 = vadd.f32 %v7752_v42, %v7751_v37  ;;  %v7754_v44 = vpop.f32.mrb[94].mxu1 }
 0x212   :  { %v5626_v35 = vadd.f32 %v7719_v26, %v10794_v53  ;;  %v7722_v2 = vadd.f32 %v7721_v32, %v7720_v29  ;;  %v8906_v53 = vld [vmem:[%s11071_s1 + $0xe40] sm:$0xff]   ;;  %v7755_v23 = vpop.f32.mrb[95].mxu1  ;;  %v6470_v32 = vld [vmem:[%s11073_s4 + $0x10] sm:$0xff] }
 0x213   :  { %6292 = vmatmul.mubr.bf16.vlgmr.msra.gmra.mrb[156].mxu0 %v8900_v0  ;;  %8165 = vmatprep.subr.bf16.mxu0 %v8906_v53  ;;  %v7756_v62 = vadd.f32 %v7755_v23, %v7754_v44  ;;  %v6468_v0 = vld [vmem:[%s11073_s4] sm:$0xff]  ;;  %v8937_v44 = vld [vmem:[%s11072_s0 + $0x2b0] ss:$232 sps:$4 sm:$0xff]   ;;  %v6473_v23 = vld [vmem:[%s11073_s4 + $0x28] sm:$0xff] }
 0x214   :  { %v5629_v41 = vadd.f32 %v7722_v2, %v10802_v27  ;;  %6349 = vmatmul.mubr.bf16.vlgmr.msra.gmra.mrb[156].mxu1 %v8903_v38  ;;  %v8908_v27 = vld [vmem:[%s11071_s1 + $0xe48] sm:$0xff]   ;;  %8199 = vmatprep.subr.bf16.mxu1 %v8906_v53  ;;  %v10944_v45 = vadd.f32 %v7753_v43, %v5626_v35  ;;  %v6471_v38 = vld [vmem:[%s11073_s4 + $0x18] sm:$0xff] }
 0x215   :  { %8166 = vmatpush3.bf16.msra.mxu0 %v8907_v15  ;;  %8207 = vmatpush3.bf16.msra.mxu1 %v8907_v15  ;;  %v8934_v15 = vld [vmem:[%s11072_s0 + $0xe0] ss:$232 sps:$4 sm:$0xff]  }
 0x216   :  { %8167 = vmatprep.subr.bf16.mxu0 %v8908_v27  ;;  %8200 = vmatprep.subr.bf16.mxu1 %v8908_v27  ;;  %v10955_v22 = vadd.f32 %v7756_v62, %v5629_v41  ;;  %v6472_v62 = vld [vmem:[%s11073_s4 + $0x20] sm:$0xff] }
 0x217   :  { %6299 = vmatprep.mubr.bf16.mxu0 %v8910_v46  ;;  %6356 = vmatprep.mubr.bf16.mxu1 %v8914_v48 }
 0x218   :  { %6486 = vperm.xlu1 %8217, %v6470_v32   ;;  %6476 = vperm.xlu0 %8216, %v6468_v0  }
 0x219   :  { %8168 = vmatpush3.bf16.msra.mxu0 %v8909_v18  ;;  %8208 = vmatpush3.bf16.msra.mxu1 %v8909_v18  ;;  %v8940_v18 = vld [vmem:[%s11072_s0 + $0x484] ss:$232 sps:$4 sm:$0xff]  }
 0x21a   :  { %8169 = vmatprep.subr.bf16.mxu0 %v8913_v47  ;;  %8201 = vmatprep.subr.bf16.mxu1 %v8913_v47 }
 0x21b   :  { %6300 = vmatmul.mubr.bf16.gmra.mrb[160].mxu0 %v8912_v31 }
 0x21c   :  { %6357 = vmatmul.mubr.bf16.gmra.mrb[160].mxu1 %v8917_v51  ;;  %6307 = vmatprep.mubr.bf16.mxu0 %v8920_v59 }
 0x21d   :  { %8170 = vmatpush3.bf16.msra.mxu0 %v8916_v34  ;;  %8209 = vmatpush3.bf16.msra.mxu1 %v8916_v34 }
 0x21e   :  { %8171 = vmatprep.subr.bf16.mxu0 %v8918_v55  ;;  %8202 = vmatprep.subr.bf16.mxu1 %v8918_v55 }
 0x21f   :  { %v7773_v30 = vpop.f32.mrb[96].mxu0  ;;  %v7807_v33 = vpop.f32.mrb[96].mxu1  ;;  %6364 = vmatprep.mubr.bf16.mxu1 %v8924_v1  ;;  %6491 = vperm.xlu1 %8217, %v6471_v38  }
 0x220   :  { %v7774_v39 = vpop.f32.mrb[97].mxu0  ;;  %v7808_v6 = vpop.f32.mrb[97].mxu1 }
 0x221   :  { %8172 = vmatpush3.bf16.msra.mxu0 %v8919_v56  ;;  %v7775_v5 = vadd.f32 %v7774_v39, %v7773_v30  ;;  %8210 = vmatpush3.bf16.msra.mxu1 %v8919_v56  ;;  %v7809_v24 = vadd.f32 %v7808_v6, %v7807_v33  ;;  %v7776_v9 = vpop.f32.mrb[98].mxu0  ;;  %v7810_v49 = vpop.f32.mrb[98].mxu1 }
 0x222   :  { %8173 = vmatprep.subr.bf16.mxu0 %v8923_v28  ;;  %8203 = vmatprep.subr.bf16.mxu1 %v8923_v28  ;;  %v7777_v54 = vpop.f32.mrb[99].mxu0  ;;  %v7811_v58 = vpop.f32.mrb[99].mxu1 }
 0x223   :  { %6308 = vmatmul.mubr.bf16.gmra.mrb[164].mxu0 %v8922_v63  ;;  %v5724_v10 = vadd.f32 %v7775_v5, %v10856_v16  ;;  %v7778_v12 = vadd.f32 %v7777_v54, %v7776_v9  ;;  %v7812_v52 = vadd.f32 %v7811_v58, %v7810_v49  ;;  %6501 = vperm.xlu1 %8217, %v6473_v23   ;;  %v8942_v63 = vld [vmem:[%s11072_s0 + $0x480] ss:$232 sps:$4 sm:$0xff]  }
 0x224   :  { %6365 = vmatmul.mubr.bf16.gmra.mrb[164].mxu1 %v8927_v3  ;;  %6405 = vmatprep.mubr.bf16.mxu0 %v8936_v14 }
 0x225   :  { %8174 = vmatpush3.bf16.msra.mxu0 %v8926_v4  ;;  %v10997_v8 = vadd.f32 %v7809_v24, %v5724_v10  ;;  %8211 = vmatpush3.bf16.msra.mxu1 %v8926_v4  ;;  %v5727_v16 = vadd.f32 %v7778_v12, %v10868_v60  ;;  %v8932_v60 = vld [vmem:[%s11071_s1 + $0xe78] sm:$0xff]  }
 0x226   :  { %8175 = vmatprep.subr.bf16.mxu0 %v8928_v7  ;;  %8204 = vmatprep.subr.bf16.mxu1 %v8928_v7 }
 0x227   :  { %v7779_v50 = vpop.f32.mrb[100].mxu0  ;;  %v11012_v21 = vadd.f32 %v7812_v52, %v5727_v16  ;;  %6413 = vmatprep.mubr.bf16.mxu1 %v8939_v20  ;;  %v7813_v37 = vpop.f32.mrb[100].mxu1 }
 0x228   :  { %v7780_v25 = vpop.f32.mrb[101].mxu0  ;;  %v7814_v41 = vpop.f32.mrb[101].mxu1 }
 0x229   :  { %8176 = vmatpush3.bf16.msra.mxu0 %v8929_v11  ;;  %8212 = vmatpush3.bf16.msra.mxu1 %v8929_v11  ;;  %v7781_v26 = vadd.f32 %v7780_v25, %v7779_v50  ;;  %v7782_v29 = vpop.f32.mrb[102].mxu0  ;;  %v7815_v53 = vadd.f32 %v7814_v41, %v7813_v37  ;;  %v7816_v42 = vpop.f32.mrb[102].mxu1 }
 0x22a   :  { %8177 = vmatprep.subr.bf16.mxu0 %v8930_v13  ;;  %8205 = vmatprep.subr.bf16.mxu1 %v8930_v13  ;;  %v7783_v61 = vpop.f32.mrb[103].mxu0  ;;  %v7817_v43 = vpop.f32.mrb[103].mxu1 }
 0x22b   :  { %v5732_v35 = vadd.f32 %v7781_v26, %v10899_v19  ;;  %v7784_v2 = vadd.f32 %v7783_v61, %v7782_v29  ;;  %v6469_v19 = vld [vmem:[%s11073_s4 + $0x8] sm:$0xff]  ;;  %v7818_v27 = vadd.f32 %v7817_v43, %v7816_v42 }
 0x22c   :  { %6481 = vperm.xlu0 %8216, %v6469_v19  }
 0x22d   :  { %8178 = vmatpush3.bf16.msra.mxu0 %v8931_v17  ;;  %8213 = vmatpush3.bf16.msra.mxu1 %v8931_v17  ;;  %v5735_v40 = vadd.f32 %v7784_v2, %v10907_v57  ;;  %v5789_v57 = vadd.f32 %v7815_v53, %v5732_v35 }
 0x22e   :  { %8179 = vmatprep.subr.bf16.mxu0 %v8932_v60  ;;  %8206 = vmatprep.subr.bf16.mxu1 %v8932_v60 }
 0x22f   :  { %v5792_v46 = vadd.f32 %v7818_v27, %v5735_v40  ;;  %v7785_v31 = vpop.f32.mrb[104].mxu0  ;;  %v7819_v59 = vpop.f32.mrb[104].mxu1 }
 0x230   :  { %v7786_v47 = vpop.f32.mrb[105].mxu0  ;;  %6496 = vperm.xlu0 %8216, %v6472_v62   ;;  %v7820_v30 = vpop.f32.mrb[105].mxu1 }
 0x231   :  { %8180 = vmatpush3.bf16.msra.mxu0 %v8933_v36  ;;  %8214 = vmatpush3.bf16.msra.mxu1 %v8933_v36  ;;  %v7787_v48 = vadd.f32 %v7786_v47, %v7785_v31  ;;  %v7788_v34 = vpop.f32.mrb[106].mxu0  ;;  %v7821_v1 = vadd.f32 %v7820_v30, %v7819_v59  ;;  %v7822_v33 = vpop.f32.mrb[106].mxu1 }
 0x232   :  { %v7789_v51 = vpop.f32.mrb[107].mxu0  ;;  %v7823_v3 = vpop.f32.mrb[107].mxu1 }
 0x233   :  { %v5740_v55 = vadd.f32 %v7787_v48, %v10944_v45  ;;  %v7790_v56 = vadd.f32 %v7789_v51, %v7788_v34  ;;  %v7824_v4 = vadd.f32 %v7823_v3, %v7822_v33 }
 0x234   :  { %6406 = vmatmul.mubr.bf16.vlgmr.msra.gmra.mrb[168].mxu0 %v8934_v15  ;;  %6414 = vmatmul.mubr.bf16.vlgmr.msra.gmra.mrb[168].mxu1 %v8937_v44 }
 0x235   :  { %6421 = vmatprep.mubr.bf16.mxu1 %v8940_v18  ;;  %v5743_v28 = vadd.f32 %v7790_v56, %v10955_v22  ;;  %v5797_v39 = vadd.f32 %v7821_v1, %v5740_v55 }
 0x237   :  { %v5800_v5 = vadd.f32 %v7824_v4, %v5743_v28 }
 0x23c   :  { %6422 = vmatmul.mubr.bf16.gmra.mrb[172].mxu1 %v8942_v63 }
 0x23f   :  { %v7841_v6 = vpop.f32.mrb[108].mxu0  ;;  %v7875_v7 = vpop.f32.mrb[108].mxu1 }
 0x240   :  { %v7842_v24 = vpop.f32.mrb[109].mxu0  ;;  %v7876_v9 = vpop.f32.mrb[109].mxu1 }
 0x241   :  { %v7843_v45 = vadd.f32 %v7842_v24, %v7841_v6  ;;  %v7844_v10 = vpop.f32.mrb[110].mxu0  ;;  %v7877_v49 = vadd.f32 %v7876_v9, %v7875_v7  ;;  %v7878_v54 = vpop.f32.mrb[110].mxu1 }
 0x242   :  { %v7845_v11 = vpop.f32.mrb[111].mxu0  ;;  %v7879_v58 = vpop.f32.mrb[111].mxu1 }
 0x243   :  { %v5838_v12 = vadd.f32 %v7843_v45, %v10997_v8  ;;  %v7846_v22 = vadd.f32 %v7845_v11, %v7844_v10  ;;  %v7880_v13 = vadd.f32 %v7879_v58, %v7878_v54 }
 0x245   :  { %v5895_v52 = vadd.f32 %v7877_v49, %v5838_v12  ;;  %v5841_v16 = vadd.f32 %v7846_v22, %v11012_v21 }
 0x247   :  { %v5898_v14 = vadd.f32 %v7880_v13, %v5841_v16  ;;  %v7847_v50 = vpop.f32.mrb[112].mxu0  ;;  %v7881_v61 = vpop.f32.mrb[112].mxu1 }
 0x248   :  { %v7848_v17 = vpop.f32.mrb[113].mxu0  ;;  %v7882_v0 = vpop.f32.mrb[113].mxu1 }
 0x249   :  { %v7849_v20 = vadd.f32 %v7848_v17, %v7847_v50  ;;  %v7850_v25 = vpop.f32.mrb[114].mxu0  ;;  %v7883_v35 = vadd.f32 %v7882_v0, %v7881_v61  ;;  %v7884_v2 = vpop.f32.mrb[114].mxu1 }
 0x24a   :  { %v7851_v60 = vpop.f32.mrb[115].mxu0  ;;  %v7885_v8 = vpop.f32.mrb[115].mxu1 }
 0x24b   :  { %v5846_v26 = vadd.f32 %v7849_v20, %v5789_v57  ;;  %v7852_v29 = vadd.f32 %v7851_v60, %v7850_v25  ;;  %v7886_v37 = vadd.f32 %v7885_v8, %v7884_v2 }
 0x24d   :  { %v5849_v32 = vadd.f32 %v7852_v29, %v5792_v46  ;;  %v5903_v36 = vadd.f32 %v7883_v35, %v5846_v26 }
 0x24f   :  { %v5906_v38 = vadd.f32 %v7886_v37, %v5849_v32  ;;  %v7853_v40 = vpop.f32.mrb[116].mxu0  ;;  %v7887_v43 = vpop.f32.mrb[116].mxu1 }
 0x250   :  { %v7854_v41 = vpop.f32.mrb[117].mxu0  ;;  %v7888_v57 = vpop.f32.mrb[117].mxu1 }
 0x251   :  { %v7855_v21 = vadd.f32 %v7854_v41, %v7853_v40  ;;  %v7856_v19 = vpop.f32.mrb[118].mxu0  ;;  %v7889_v27 = vadd.f32 %v7888_v57, %v7887_v43  ;;  %v7890_v23 = vpop.f32.mrb[118].mxu1 }
 0x252   :  { %v7857_v53 = vpop.f32.mrb[119].mxu0  ;;  %v7891_v18 = vpop.f32.mrb[119].mxu1 }
 0x253   :  { %v5854_v42 = vadd.f32 %v7855_v21, %v5797_v39  ;;  %v7858_v15 = vadd.f32 %v7857_v53, %v7856_v19  ;;  %v7892_v46 = vadd.f32 %v7891_v18, %v7890_v23 }
 0x255   :  { %v5857_v44 = vadd.f32 %v7858_v15, %v5800_v5  ;;  %v5911_v62 = vadd.f32 %v7889_v27, %v5854_v42 }
 0x257   :  { %v5914_v31 = vadd.f32 %v7892_v46, %v5857_v44 }
 0x25f   :  { %v7909_v47 = vpop.f32.mrb[120].mxu0  ;;  %v7943_v48 = vpop.f32.mrb[120].mxu1 }
 0x260   :  { %v7910_v34 = vpop.f32.mrb[121].mxu0  ;;  %v7944_v55 = vpop.f32.mrb[121].mxu1 }
 0x261   :  { %v7911_v51 = vadd.f32 %v7910_v34, %v7909_v47  ;;  %v7912_v56 = vpop.f32.mrb[122].mxu0  ;;  %v7945_v59 = vadd.f32 %v7944_v55, %v7943_v48  ;;  %v7946_v63 = vpop.f32.mrb[122].mxu1 }
 0x262   :  { %v7913_v28 = vpop.f32.mrb[123].mxu0  ;;  %v7947_v33 = vpop.f32.mrb[123].mxu1 }
 0x263   :  { %v5952_v30 = vadd.f32 %v7911_v51, %v5895_v52  ;;  %v7914_v1 = vadd.f32 %v7913_v28, %v7912_v56  ;;  %v7948_v3 = vadd.f32 %v7947_v33, %v7946_v63 }
 0x265   :  { %v6009_v39 = vadd.f32 %v7945_v59, %v5952_v30  ;;  %v5955_v4 = vadd.f32 %v7914_v1, %v5898_v14 }
 0x267   :  { %v6012_v5 = vadd.f32 %v7948_v3, %v5955_v4  ;;  %v7915_v6 = vpop.f32.mrb[124].mxu0  ;;  %v7949_v54 = vpop.f32.mrb[124].mxu1 }
 0x268   :  { %v7916_v7 = vpop.f32.mrb[125].mxu0  ;;  %v7950_v12 = vpop.f32.mrb[125].mxu1 }
 0x269   :  { %v7917_v24 = vadd.f32 %v7916_v7, %v7915_v6  ;;  %v7918_v45 = vpop.f32.mrb[126].mxu0  ;;  %v7951_v22 = vadd.f32 %v7950_v12, %v7949_v54  ;;  %v7952_v58 = vpop.f32.mrb[126].mxu1 }
 0x26a   :  { %v7919_v9 = vpop.f32.mrb[127].mxu0  ;;  %v7953_v13 = vpop.f32.mrb[127].mxu1 }
 0x26b   :  { %v5960_v10 = vadd.f32 %v7917_v24, %v5903_v36  ;;  %v7920_v49 = vadd.f32 %v7919_v9, %v7918_v45  ;;  %v7954_v16 = vadd.f32 %v7953_v13, %v7952_v58 }
 0x26d   :  { %v5963_v11 = vadd.f32 %v7920_v49, %v5906_v38  ;;  %v6017_v52 = vadd.f32 %v7951_v22, %v5960_v10 }
 0x26f   :  { %v6020_v50 = vadd.f32 %v7954_v16, %v5963_v11  ;;  %v7921_v17 = vpop.f32.mrb[128].mxu0  ;;  %v7955_v61 = vpop.f32.mrb[128].mxu1 }
 0x270   :  { %v7922_v20 = vpop.f32.mrb[129].mxu0  ;;  %v7956_v0 = vpop.f32.mrb[129].mxu1 }
 0x271   :  { %v7923_v14 = vadd.f32 %v7922_v20, %v7921_v17  ;;  %v7924_v25 = vpop.f32.mrb[130].mxu0  ;;  %v7957_v35 = vadd.f32 %v7956_v0, %v7955_v61  ;;  %v7958_v2 = vpop.f32.mrb[130].mxu1 }
 0x272   :  { %v7925_v60 = vpop.f32.mrb[131].mxu0  ;;  %v7959_v8 = vpop.f32.mrb[131].mxu1 }
 0x273   :  { %v5968_v26 = vadd.f32 %v7923_v14, %v5911_v62  ;;  %v7926_v29 = vadd.f32 %v7925_v60, %v7924_v25  ;;  %v7960_v37 = vadd.f32 %v7959_v8, %v7958_v2 }
 0x275   :  { %v5971_v32 = vadd.f32 %v7926_v29, %v5914_v31  ;;  %v6025_v36 = vadd.f32 %v7957_v35, %v5968_v26 }
 0x277   :  { %v6028_v38 = vadd.f32 %v7960_v37, %v5971_v32 }
 0x27f   :  { %v7977_v40 = vpop.f32.mrb[132].mxu0  ;;  %v8011_v41 = vpop.f32.mrb[132].mxu1 }
 0x280   :  { %v7978_v21 = vpop.f32.mrb[133].mxu0  ;;  %v8012_v53 = vpop.f32.mrb[133].mxu1 }
 0x281   :  { %v7979_v19 = vadd.f32 %v7978_v21, %v7977_v40  ;;  %v7980_v42 = vpop.f32.mrb[134].mxu0  ;;  %v8013_v15 = vadd.f32 %v8012_v53, %v8011_v41  ;;  %v8014_v43 = vpop.f32.mrb[134].mxu1 }
 0x282   :  { %v7981_v44 = vpop.f32.mrb[135].mxu0  ;;  %v8015_v23 = vpop.f32.mrb[135].mxu1 }
 0x283   :  { %v6066_v57 = vadd.f32 %v7979_v19, %v6009_v39  ;;  %v7982_v27 = vadd.f32 %v7981_v44, %v7980_v42  ;;  %v8016_v18 = vadd.f32 %v8015_v23, %v8014_v43 }
 0x285   :  { %v6123_v62 = vadd.f32 %v8013_v15, %v6066_v57  ;;  %v6069_v46 = vadd.f32 %v7982_v27, %v6012_v5 }
 0x287   :  { %v6126_v31 = vadd.f32 %v8016_v18, %v6069_v46  ;;  %v7983_v47 = vpop.f32.mrb[136].mxu0  ;;  %v8017_v63 = vpop.f32.mrb[136].mxu1 }
 0x288   :  { %v7984_v48 = vpop.f32.mrb[137].mxu0  ;;  %v8018_v30 = vpop.f32.mrb[137].mxu1 }
 0x289   :  { %v7985_v34 = vadd.f32 %v7984_v48, %v7983_v47  ;;  %v7986_v51 = vpop.f32.mrb[138].mxu0  ;;  %v8019_v1 = vadd.f32 %v8018_v30, %v8017_v63  ;;  %v8020_v33 = vpop.f32.mrb[138].mxu1 }
 0x28a   :  { %v7987_v55 = vpop.f32.mrb[139].mxu0  ;;  %v8021_v3 = vpop.f32.mrb[139].mxu1 }
 0x28b   :  { %v6074_v56 = vadd.f32 %v7985_v34, %v6017_v52  ;;  %v7988_v59 = vadd.f32 %v7987_v55, %v7986_v51  ;;  %v8022_v4 = vadd.f32 %v8021_v3, %v8020_v33 }
 0x28d   :  { %v6077_v28 = vadd.f32 %v7988_v59, %v6020_v50  ;;  %v6131_v39 = vadd.f32 %v8019_v1, %v6074_v56 }
 0x28f   :  { %v6134_v6 = vadd.f32 %v8022_v4, %v6077_v28  ;;  %v7989_v7 = vpop.f32.mrb[140].mxu0  ;;  %v8023_v54 = vpop.f32.mrb[140].mxu1 }
 0x290   :  { %v7990_v24 = vpop.f32.mrb[141].mxu0  ;;  %v8024_v12 = vpop.f32.mrb[141].mxu1 }
 0x291   :  { %v7991_v5 = vadd.f32 %v7990_v24, %v7989_v7  ;;  %v7992_v45 = vpop.f32.mrb[142].mxu0  ;;  %v8025_v22 = vadd.f32 %v8024_v12, %v8023_v54  ;;  %v8026_v58 = vpop.f32.mrb[142].mxu1 }
 0x292   :  { %v7993_v9 = vpop.f32.mrb[143].mxu0  ;;  %v8027_v13 = vpop.f32.mrb[143].mxu1 }
 0x293   :  { %v6082_v10 = vadd.f32 %v7991_v5, %v6025_v36  ;;  %v7994_v49 = vadd.f32 %v7993_v9, %v7992_v45  ;;  %v8028_v16 = vadd.f32 %v8027_v13, %v8026_v58 }
 0x295   :  { %v6085_v11 = vadd.f32 %v7994_v49, %v6028_v38  ;;  %v6139_v52 = vadd.f32 %v8025_v22, %v6082_v10 }
 0x297   :  { %v6142_v50 = vadd.f32 %v8028_v16, %v6085_v11 }
 0x29f   :  { %v8079_v20 = vpop.f32.mrb[144].mxu1 }
 0x2a0   :  { %v8080_v60 = vpop.f32.mrb[145].mxu1 }
 0x2a1   :  { %v8081_v29 = vadd.f32 %v8080_v60, %v8079_v20  ;;  %v8082_v61 = vpop.f32.mrb[146].mxu1 }
 0x2a2   :  { %v8083_v2 = vpop.f32.mrb[147].mxu1 }
 0x2a3   :  { %v8084_v8 = vadd.f32 %v8083_v2, %v8082_v61 }
 0x2a9   :  { %v8085_v43 = vpop.f32.mrb[148].mxu1 }
 0x2aa   :  { %v8086_v57 = vpop.f32.mrb[149].mxu1 }
 0x2ab   :  { %v8087_v27 = vadd.f32 %v8086_v57, %v8085_v43  ;;  %v8088_v23 = vpop.f32.mrb[150].mxu1 }
 0x2ac   :  { %v8089_v18 = vpop.f32.mrb[151].mxu1 }
 0x2ad   :  { %v8090_v46 = vadd.f32 %v8089_v18, %v8088_v23 }
 0x2b0   :  { %v8045_v17 = vpop.f32.mrb[144].mxu0 }
 0x2b1   :  { %v8046_v14 = vpop.f32.mrb[145].mxu0  ;;  %v8091_v63 = vpop.f32.mrb[152].mxu1 }
 0x2b2   :  { %v8047_v25 = vadd.f32 %v8046_v14, %v8045_v17  ;;  %v8048_v26 = vpop.f32.mrb[146].mxu0  ;;  %v8092_v30 = vpop.f32.mrb[153].mxu1 }
 0x2b3   :  { %v8049_v32 = vpop.f32.mrb[147].mxu0  ;;  %v8093_v1 = vadd.f32 %v8092_v30, %v8091_v63  ;;  %v8094_v33 = vpop.f32.mrb[154].mxu1 }
 0x2b4   :  { %v6180_v0 = vadd.f32 %v8047_v25, %v6123_v62  ;;  %v8050_v35 = vadd.f32 %v8049_v32, %v8048_v26  ;;  %v8095_v3 = vpop.f32.mrb[155].mxu1 }
 0x2b5   :  { %v8096_v4 = vadd.f32 %v8095_v3, %v8094_v33 }
 0x2b6   :  { %v6237_v36 = vadd.f32 %v8081_v29, %v6180_v0  ;;  %v6183_v37 = vadd.f32 %v8050_v35, %v6126_v31 }
 0x2b8   :  { %v6240_v38 = vadd.f32 %v8084_v8, %v6183_v37  ;;  %v8051_v40 = vpop.f32.mrb[148].mxu0 }
 0x2b9   :  { %v8052_v41 = vpop.f32.mrb[149].mxu0 }
 0x2ba   :  { %v8053_v21 = vadd.f32 %v8052_v41, %v8051_v40  ;;  %v8054_v19 = vpop.f32.mrb[150].mxu0 }
 0x2bb   :  { %v8055_v53 = vpop.f32.mrb[151].mxu0 }
 0x2bc   :  { %v6188_v42 = vadd.f32 %v8053_v21, %v6131_v39  ;;  %v8056_v15 = vadd.f32 %v8055_v53, %v8054_v19 }
 0x2be   :  { %v6191_v44 = vadd.f32 %v8056_v15, %v6134_v6  ;;  %v6245_v62 = vadd.f32 %v8087_v27, %v6188_v42 }
 0x2c0   :  { %v6248_v47 = vadd.f32 %v8090_v46, %v6191_v44  ;;  %v8057_v48 = vpop.f32.mrb[152].mxu0 }
 0x2c1   :  { %v8058_v34 = vpop.f32.mrb[153].mxu0 }
 0x2c2   :  { %v8059_v31 = vadd.f32 %v8058_v34, %v8057_v48  ;;  %v8060_v51 = vpop.f32.mrb[154].mxu0 }
 0x2c3   :  { %v8061_v55 = vpop.f32.mrb[155].mxu0 }
 0x2c4   :  { %v6196_v56 = vadd.f32 %v8059_v31, %v6139_v52  ;;  %v8062_v59 = vadd.f32 %v8061_v55, %v8060_v51 }
 0x2c6   :  { %v6199_v28 = vadd.f32 %v8062_v59, %v6142_v50  ;;  %v6253_v39 = vadd.f32 %v8093_v1, %v6196_v56  ;;  %v7182_v59 = vld [vmem:[%s11074_s2] ss:$0 sm:$0xff] }
 0x2c8   :  { %v6256_v6 = vadd.f32 %v8096_v4, %v6199_v28 }
 0x2e6   :  { %v8113_v7 = vpop.f32.mrb[156].mxu0 }
 0x2e7   :  { %v8147_v24 = vpop.f32.mrb[156].mxu1  ;;  %v8114_v5 = vpop.f32.mrb[157].mxu0 }
 0x2e8   :  { %v8115_v45 = vadd.f32 %v8114_v5, %v8113_v7  ;;  %v8148_v9 = vpop.f32.mrb[157].mxu1  ;;  %v8116_v10 = vpop.f32.mrb[158].mxu0 }
 0x2e9   :  { %v8149_v49 = vadd.f32 %v8148_v9, %v8147_v24  ;;  %v8150_v54 = vpop.f32.mrb[158].mxu1  ;;  %v8117_v11 = vpop.f32.mrb[159].mxu0 }
 0x2ea   :  { %v6294_v12 = vadd.f32 %v8115_v45, %v6237_v36  ;;  %v8118_v22 = vadd.f32 %v8117_v11, %v8116_v10  ;;  %v8151_v58 = vpop.f32.mrb[159].mxu1  ;;  %v6477_v11 = vpop.permute.xlu0 %6476 }
 0x2eb   :  { %v8152_v13 = vadd.f32 %v8151_v58, %v8150_v54 }
 0x2ec   :  { %v6351_v52 = vadd.f32 %v8149_v49, %v6294_v12  ;;  %v6297_v16 = vadd.f32 %v8118_v22, %v6240_v38  ;;  %v6487_v22 = vpop.permute.xlu1 %6486 }
 0x2ee   :  { %v6354_v50 = vadd.f32 %v8152_v13, %v6297_v16  ;;  %v8119_v17 = vpop.f32.mrb[160].mxu0 }
 0x2ef   :  { %v8120_v20 = vpop.f32.mrb[161].mxu0  ;;  %v8153_v60 = vpop.f32.mrb[160].mxu1 }
 0x2f0   :  { %v8121_v14 = vadd.f32 %v8120_v20, %v8119_v17  ;;  %v8122_v25 = vpop.f32.mrb[162].mxu0  ;;  %v8154_v29 = vpop.f32.mrb[161].mxu1 }
 0x2f1   :  { %v8123_v26 = vpop.f32.mrb[163].mxu0  ;;  %v8155_v0 = vadd.f32 %v8154_v29, %v8153_v60  ;;  %v8156_v35 = vpop.f32.mrb[162].mxu1 }
 0x2f2   :  { %v6302_v61 = vadd.f32 %v8121_v14, %v6245_v62  ;;  %v8124_v32 = vadd.f32 %v8123_v26, %v8122_v25  ;;  %v8157_v2 = vpop.f32.mrb[163].mxu1 }
 0x2f3   :  { %v8158_v37 = vadd.f32 %v8157_v2, %v8156_v35 }
 0x2f4   :  { %v6305_v8 = vadd.f32 %v8124_v32, %v6248_v47  ;;  %v6359_v36 = vadd.f32 %v8155_v0, %v6302_v61 }
 0x2f6   :  { %v6362_v40 = vadd.f32 %v8158_v37, %v6305_v8  ;;  %v8125_v41 = vpop.f32.mrb[164].mxu0  ;;  %v6482_v8 = vpop.permute.xlu0 %6481 }
 0x2f7   :  { %v8126_v21 = vpop.f32.mrb[165].mxu0  ;;  %v8159_v53 = vpop.f32.mrb[164].mxu1 }
 0x2f8   :  { %v8127_v38 = vadd.f32 %v8126_v21, %v8125_v41  ;;  %v8128_v19 = vpop.f32.mrb[166].mxu0  ;;  %v8160_v15 = vpop.f32.mrb[165].mxu1 }
 0x2f9   :  { %v8129_v42 = vpop.f32.mrb[167].mxu0  ;;  %v8161_v57 = vadd.f32 %v8160_v15, %v8159_v53  ;;  %v8162_v27 = vpop.f32.mrb[166].mxu1 }
 0x2fa   :  { %v6310_v43 = vadd.f32 %v8127_v38, %v6253_v39  ;;  %v8130_v44 = vadd.f32 %v8129_v42, %v8128_v19  ;;  %v8163_v23 = vpop.f32.mrb[167].mxu1 }
 0x2fb   :  { %v8164_v46 = vadd.f32 %v8163_v23, %v8162_v27 }
 0x2fc   :  { %v6313_v18 = vadd.f32 %v8130_v44, %v6256_v6  ;;  %v6367_v62 = vadd.f32 %v8161_v57, %v6310_v43  ;;  %v7183_v6 = vld [vmem:[%s11075_s3] ss:$0 sm:$0xff] }
 0x2fe   :  { %v6370_v48 = vadd.f32 %v8164_v46, %v6313_v18 }
 0x307   :  { %v8181_v47 = vpop.f32.mrb[168].mxu0  ;;  %v8187_v34 = vpop.f32.mrb[168].mxu1 }
 0x308   :  { %v8182_v31 = vpop.f32.mrb[169].mxu0  ;;  %v8188_v55 = vpop.f32.mrb[169].mxu1 }
 0x309   :  { %v8183_v51 = vadd.f32 %v8182_v31, %v8181_v47  ;;  %v8184_v56 = vpop.f32.mrb[170].mxu0  ;;  %v8189_v63 = vadd.f32 %v8188_v55, %v8187_v34  ;;  %v8190_v28 = vpop.f32.mrb[170].mxu1 }
 0x30a   :  { %v8185_v30 = vpop.f32.mrb[171].mxu0  ;;  %v8191_v3 = vpop.f32.mrb[171].mxu1 }
 0x30b   :  { %v6408_v1 = vadd.f32 %v8183_v51, %v6351_v52  ;;  %v8186_v33 = vadd.f32 %v8185_v30, %v8184_v56  ;;  %v6416_v39 = vadd.f32 %v8189_v63, %v6359_v36  ;;  %v8192_v4 = vadd.f32 %v8191_v3, %v8190_v28 }
 0x30d   :  { %v6437_v7 = vmul.f32 %v7182_v59, %v6408_v1  ;;  %v6411_v24 = vadd.f32 %v8186_v33, %v6354_v50  ;;  %v6439_v5 = vmul.f32 %v7182_v59, %v6416_v39  ;;  %v6419_v45 = vadd.f32 %v8192_v4, %v6362_v40  ;;  %v6492_v40 = vpop.permute.xlu1 %6491 }
 0x30f   :  { %v6438_v9 = vmul.f32 %v7182_v59, %v6411_v24  ;;  %v6450_v10 = vadd.f32 %v7183_v6, %v6437_v7  ;;  %v6440_v49 = vmul.f32 %v7182_v59, %v6419_v45  ;;  %v6452_v54 = vadd.f32 %v7183_v6, %v6439_v5  ;;  %v8193_v12 = vpop.f32.mrb[172].mxu1 }
 0x310   :  { %v8194_v13 = vpop.f32.mrb[173].mxu1 }
 0x311   :  { %v6456_v58 = vmax.f32 %v6450_v10, 0.0  ;;  %v6451_v52 = vadd.f32 %v7183_v6, %v6438_v9  ;;  %v6458_v16 = vmax.f32 %v6452_v54, 0.0  ;;  %v8195_v17 = vadd.f32 %v8194_v13, %v8193_v12  ;;  %v8196_v20 = vpop.f32.mrb[174].mxu1  ;;  %v6502_v18 = vpop.permute.xlu1 %6501 }
 0x312   :  { %v6453_v14 = vadd.f32 %v7183_v6, %v6440_v49  ;;  %v8197_v26 = vpop.f32.mrb[175].mxu1 }
 0x313   :  { %v6462_v25 = vmin.f32 %v6456_v58, 20.0  ;;  %v6457_v60 = vmax.f32 %v6451_v52, 0.0  ;;  %v6464_v50 = vmin.f32 %v6458_v16, 20.0  ;;  %v6424_v29 = vadd.f32 %v8195_v17, %v6367_v62  ;;  %v6497_v62 = vpop.permute.xlu0 %6496 }
 0x314   :  { %v6459_v61 = vmax.f32 %v6453_v14, 0.0  ;;  %v8198_v32 = vadd.f32 %v8197_v26, %v8196_v20 }
 0x315   :  { %v6463_v0 = vmin.f32 %v6457_v60, 20.0  ;;  %v6441_v35 = vmul.f32 %v7182_v59, %v6424_v29  ;;  %v6504_v37 = vmul.f32 %v6477_v11, %v6462_v25  ;;  %v6506_v21 = vmul.f32 %v6487_v22, %v6464_v50 }
 0x316   :  { %v6465_v2 = vmin.f32 %v6459_v61, 20.0  ;;  %v6427_v36 = vadd.f32 %v8198_v32, %v6370_v48 }
 0x317   :  { %v6505_v41 = vmul.f32 %v6482_v8, %v6463_v0  ;;  %v6454_v53 = vadd.f32 %v7183_v6, %v6441_v35 }
 0x318   :  { %v6507_v38 = vmul.f32 %v6492_v40, %v6465_v2  ;;  %v6442_v19 = vmul.f32 %v7182_v59, %v6427_v36 }
 0x319   :  { %v7199_v42 = vpack.c.bf16 %v6505_v41, %v6504_v37  ;;  %v6460_v44 = vmax.f32 %v6454_v53, 0.0 }
 0x31a   :  { %v7204_v15 = vpack.c.bf16 %v6507_v38, %v6506_v21  ;;  %v6455_v43 = vadd.f32 %v7183_v6, %v6442_v19 }
 0x31b   :  { %7200 = vst [vmem:[%s11076_s5] sm:$0xff] %v7199_v42   ;;  %v6466_v27 = vmin.f32 %v6460_v44, 20.0 }
 0x31c   :  { %7211 = vst [vmem:[%s11076_s5 + $0x8] sm:$0xff] %v7204_v15   ;;  %v6461_v57 = vmax.f32 %v6455_v43, 0.0 }
 0x31d   :  { %v6508_v48 = vmul.f32 %v6497_v62, %v6466_v27 }
 0x31e   :  { %v6467_v23 = vmin.f32 %v6461_v57, 20.0 }
 0x320   :  { %v6509_v46 = vmul.f32 %v6502_v18, %v6467_v23 }
 0x322   :  { %v7209_v47 = vpack.c.bf16 %v6509_v46, %v6508_v48 }
 0x324   :  { %7212 = vst [vmem:[%s11076_s5 + $0x10] sm:$0xff] %v7209_v47  }

// kernel: deepspeech2_forward.23
= control target key start
LH: loop header
LB: loop body
LE: loop exit
PB: predicated region body
PF: predicated region fallthrough
CT: control target
= control target key end

     0   :  { %s1382_s1 = inlined_call_operand.vmem [shape: bf16[256,768], index: 1, kind: input, shape index: {}]   ;;  %s1383_s0 = inlined_call_operand.vmem [shape: f32[16,256], index: 0, kind: input, shape index: {}]   ;;  %s1384_s2 = inlined_call_operand.vmem [shape: f32[1,768], index: 2, kind: input, shape index: {}]   ;;  %s1385_s3 = inlined_call_operand.vmem [shape: f32[16,768], index: 3, kind: output, shape index: {}]  }
   0x1   :  { %v869_v0 = vld [vmem:[%s1382_s1 + $0x4] ss:$24 sps:$4 sm:$0xff]   ;;  %v871_v1 = vld [vmem:[%s1382_s1] ss:$24 sps:$4 sm:$0xff]   ;;  %v872_v2 = vld [vmem:[%s1382_s1 + $0x34] ss:$24 sps:$4 sm:$0xff]  }
   0x2   :  { %628 = vmatprep.subr.bf16.mxu0 %v869_v0  ;;  %v874_v3 = vld [vmem:[%s1382_s1 + $0x30] ss:$24 sps:$4 sm:$0xff]   ;;  %v875_v4 = vld [vmem:[%s1382_s1 + $0x64] ss:$24 sps:$4 sm:$0xff]   ;;  %v877_v5 = vld [vmem:[%s1382_s1 + $0x60] ss:$24 sps:$4 sm:$0xff]  }
   0x3   :  { %629 = vmatpush1.bf16.msra.mxu0 %v871_v1  ;;  %v878_v6 = vld [vmem:[%s1382_s1 + $0x94] ss:$24 sps:$4 sm:$0xff]   ;;  %v880_v7 = vld [vmem:[%s1382_s1 + $0x90] ss:$24 sps:$4 sm:$0xff]   ;;  %v881_v8 = vld [vmem:[%s1382_s1 + $0xc4] ss:$24 sps:$4 sm:$0xff]  }
   0x4   :  { %630 = vmatprep.subr.bf16.mxu0 %v872_v2  ;;  %v883_v9 = vld [vmem:[%s1382_s1 + $0xc0] ss:$24 sps:$4 sm:$0xff]   ;;  %v884_v10 = vld [vmem:[%s1382_s1 + $0xf4] ss:$24 sps:$4 sm:$0xff]   ;;  %v886_v11 = vld [vmem:[%s1382_s1 + $0xf0] ss:$24 sps:$4 sm:$0xff]  }
   0x5   :  { %v887_v12 = vld [vmem:[%s1382_s1 + $0x124] ss:$24 sps:$4 sm:$0xff]   ;;  %v919_v14 = vld [vmem:[%s1382_s1 + $0x8] ss:$24 sps:$4 sm:$0xff]   ;;  %v890_v18 = vld [vmem:[%s1382_s1 + $0x154] ss:$24 sps:$4 sm:$0xff]  }
   0x6   :  { %v917_v13 = vld [vmem:[%s1382_s1 + $0xc] ss:$24 sps:$4 sm:$0xff]   ;;  %v889_v16 = vld [vmem:[%s1382_s1 + $0x120] ss:$24 sps:$4 sm:$0xff]   ;;  %v923_v20 = vld [vmem:[%s1382_s1 + $0x3c] ss:$24 sps:$4 sm:$0xff]  }
   0x7   :  { %631 = vmatpush1.bf16.msra.mxu0 %v874_v3  ;;  %v15_v15 = vld [vmem:[%s1383_s0 + $0x8] sm:$0xff]  ;;  %v17_v17 = vld [vmem:[%s1383_s0 + $0x18] sm:$0xff]  ;;  %671 = vmatprep.subr.bf16.mxu1 %v917_v13  ;;  %v14_v56 = vld [vmem:[%s1383_s0] sm:$0xff] }
   0x8   :  { %632 = vmatprep.subr.bf16.mxu0 %v875_v4  ;;  %v1090_v19 = vpack.c.bf16 %v17_v17, %v15_v15  ;;  %672 = vmatpush1.bf16.msra.mxu1 %v919_v14  ;;  %v925_v21 = vld [vmem:[%s1382_s1 + $0x38] ss:$24 sps:$4 sm:$0xff]   ;;  %v893_v23 = vld [vmem:[%s1382_s1 + $0x184] ss:$24 sps:$4 sm:$0xff]   ;;  %v931_v25 = vld [vmem:[%s1382_s1 + $0x68] ss:$24 sps:$4 sm:$0xff]  }
   0x9   :  { %v892_v22 = vld [vmem:[%s1382_s1 + $0x150] ss:$24 sps:$4 sm:$0xff]   ;;  %673 = vmatprep.subr.bf16.mxu1 %v923_v20  ;;  %v929_v24 = vld [vmem:[%s1382_s1 + $0x6c] ss:$24 sps:$4 sm:$0xff]   ;;  %v895_v26 = vld [vmem:[%s1382_s1 + $0x180] ss:$24 sps:$4 sm:$0xff]  }
   0xa   :  { %660 = vmatprep.mubr.bf16.mxu0 %v1090_v19  ;;  %703 = vmatprep.mubr.bf16.mxu1 %v1090_v19  ;;  %v935_v27 = vld [vmem:[%s1382_s1 + $0x9c] ss:$24 sps:$4 sm:$0xff]   ;;  %v937_v29 = vld [vmem:[%s1382_s1 + $0x98] ss:$24 sps:$4 sm:$0xff]   ;;  %v941_v30 = vld [vmem:[%s1382_s1 + $0xcc] ss:$24 sps:$4 sm:$0xff]  }
   0xb   :  { %633 = vmatpush1.bf16.msra.mxu0 %v877_v5  ;;  %v896_v28 = vld [vmem:[%s1382_s1 + $0x1b4] ss:$24 sps:$4 sm:$0xff]   ;;  %v898_v31 = vld [vmem:[%s1382_s1 + $0x1b0] ss:$24 sps:$4 sm:$0xff]   ;;  %v899_v32 = vld [vmem:[%s1382_s1 + $0x1e4] ss:$24 sps:$4 sm:$0xff]  }
   0xc   :  { %634 = vmatprep.subr.bf16.mxu0 %v878_v6  ;;  %674 = vmatpush1.bf16.msra.mxu1 %v925_v21  ;;  %v943_v33 = vld [vmem:[%s1382_s1 + $0xc8] ss:$24 sps:$4 sm:$0xff]   ;;  %v947_v34 = vld [vmem:[%s1382_s1 + $0xfc] ss:$24 sps:$4 sm:$0xff]   ;;  %v949_v37 = vld [vmem:[%s1382_s1 + $0xf8] ss:$24 sps:$4 sm:$0xff]  }
   0xd   :  { %675 = vmatprep.subr.bf16.mxu1 %v929_v24  ;;  %v901_v35 = vld [vmem:[%s1382_s1 + $0x1e0] ss:$24 sps:$4 sm:$0xff]   ;;  %v902_v36 = vld [vmem:[%s1382_s1 + $0x214] ss:$24 sps:$4 sm:$0xff]   ;;  %v904_v39 = vld [vmem:[%s1382_s1 + $0x210] ss:$24 sps:$4 sm:$0xff]  }
   0xe   :  { %v953_v38 = vld [vmem:[%s1382_s1 + $0x12c] ss:$24 sps:$4 sm:$0xff]   ;;  %v955_v41 = vld [vmem:[%s1382_s1 + $0x128] ss:$24 sps:$4 sm:$0xff]   ;;  %v959_v42 = vld [vmem:[%s1382_s1 + $0x15c] ss:$24 sps:$4 sm:$0xff]  }
   0xf   :  { %635 = vmatpush1.bf16.msra.mxu0 %v880_v7  ;;  %v905_v40 = vld [vmem:[%s1382_s1 + $0x244] ss:$24 sps:$4 sm:$0xff]   ;;  %v907_v43 = vld [vmem:[%s1382_s1 + $0x240] ss:$24 sps:$4 sm:$0xff]   ;;  %v908_v44 = vld [vmem:[%s1382_s1 + $0x274] ss:$24 sps:$4 sm:$0xff]  }
  0x10   :  { %636 = vmatprep.subr.bf16.mxu0 %v881_v8  ;;  %676 = vmatpush1.bf16.msra.mxu1 %v931_v25  ;;  %v961_v45 = vld [vmem:[%s1382_s1 + $0x158] ss:$24 sps:$4 sm:$0xff]   ;;  %v965_v46 = vld [vmem:[%s1382_s1 + $0x18c] ss:$24 sps:$4 sm:$0xff]   ;;  %v967_v49 = vld [vmem:[%s1382_s1 + $0x188] ss:$24 sps:$4 sm:$0xff]  }
  0x11   :  { %677 = vmatprep.subr.bf16.mxu1 %v935_v27  ;;  %v910_v47 = vld [vmem:[%s1382_s1 + $0x270] ss:$24 sps:$4 sm:$0xff]   ;;  %v911_v48 = vld [vmem:[%s1382_s1 + $0x2a4] ss:$24 sps:$4 sm:$0xff]   ;;  %v913_v51 = vld [vmem:[%s1382_s1 + $0x2a0] ss:$24 sps:$4 sm:$0xff]  }
  0x12   :  { %v971_v50 = vld [vmem:[%s1382_s1 + $0x1bc] ss:$24 sps:$4 sm:$0xff]   ;;  %v973_v53 = vld [vmem:[%s1382_s1 + $0x1b8] ss:$24 sps:$4 sm:$0xff]   ;;  %v977_v55 = vld [vmem:[%s1382_s1 + $0x1ec] ss:$24 sps:$4 sm:$0xff]  }
  0x13   :  { %637 = vmatpush1.bf16.msra.mxu0 %v883_v9  ;;  %v914_v52 = vld [vmem:[%s1382_s1 + $0x2d4] ss:$24 sps:$4 sm:$0xff]   ;;  %v916_v54 = vld [vmem:[%s1382_s1 + $0x2d0] ss:$24 sps:$4 sm:$0xff]   ;;  %v928_v63 = vld [vmem:[%s1382_s1 + $0x44] ss:$24 sps:$4 sm:$0xff]  }
  0x14   :  { %638 = vmatprep.subr.bf16.mxu0 %v884_v10  ;;  %678 = vmatpush1.bf16.msra.mxu1 %v937_v29  ;;  %v16_v57 = vld [vmem:[%s1383_s0 + $0x10] sm:$0xff]  ;;  %v979_v59 = vld [vmem:[%s1382_s1 + $0x1e8] ss:$24 sps:$4 sm:$0xff]   ;;  %v989_v1 = vld [vmem:[%s1382_s1 + $0x24c] ss:$24 sps:$4 sm:$0xff]  }
  0x15   :  { %679 = vmatprep.subr.bf16.mxu1 %v941_v30  ;;  %v922_v58 = vld [vmem:[%s1382_s1 + $0x14] ss:$24 sps:$4 sm:$0xff]   ;;  %v1214_v60 = vpack.c.bf16 %v16_v57, %v14_v56  ;;  %v920_v62 = vld [vmem:[%s1382_s1 + $0x10] ss:$24 sps:$4 sm:$0xff]   ;;  %v926_v2 = vld [vmem:[%s1382_s1 + $0x40] ss:$24 sps:$4 sm:$0xff]  }
  0x16   :  { %v983_v61 = vld [vmem:[%s1382_s1 + $0x21c] ss:$24 sps:$4 sm:$0xff]   ;;  %v985_v0 = vld [vmem:[%s1382_s1 + $0x218] ss:$24 sps:$4 sm:$0xff]   ;;  %v991_v4 = vld [vmem:[%s1382_s1 + $0x248] ss:$24 sps:$4 sm:$0xff]  }
  0x17   :  { %639 = vmatpush1.bf16.msra.mxu0 %v886_v11  ;;  %v934_v3 = vld [vmem:[%s1382_s1 + $0x74] ss:$24 sps:$4 sm:$0xff]   ;;  %v932_v6 = vld [vmem:[%s1382_s1 + $0x70] ss:$24 sps:$4 sm:$0xff]   ;;  %v940_v7 = vld [vmem:[%s1382_s1 + $0xa4] ss:$24 sps:$4 sm:$0xff]  }
  0x18   :  { %640 = vmatprep.subr.bf16.mxu0 %v887_v12  ;;  %680 = vmatpush1.bf16.msra.mxu1 %v943_v33  ;;  %v995_v5 = vld [vmem:[%s1382_s1 + $0x27c] ss:$24 sps:$4 sm:$0xff]   ;;  %v997_v8 = vld [vmem:[%s1382_s1 + $0x278] ss:$24 sps:$4 sm:$0xff]   ;;  %v1001_v9 = vld [vmem:[%s1382_s1 + $0x2ac] ss:$24 sps:$4 sm:$0xff]  }
  0x19   :  { %681 = vmatprep.subr.bf16.mxu1 %v947_v34  ;;  %v938_v10 = vld [vmem:[%s1382_s1 + $0xa0] ss:$24 sps:$4 sm:$0xff]   ;;  %v946_v11 = vld [vmem:[%s1382_s1 + $0xd4] ss:$24 sps:$4 sm:$0xff]   ;;  %v944_v14 = vld [vmem:[%s1382_s1 + $0xd0] ss:$24 sps:$4 sm:$0xff]  }
  0x1a   :  { %v1003_v12 = vld [vmem:[%s1382_s1 + $0x2a8] ss:$24 sps:$4 sm:$0xff]   ;;  %v1007_v13 = vld [vmem:[%s1382_s1 + $0x2dc] ss:$24 sps:$4 sm:$0xff]  }
  0x1b   :  { %641 = vmatpush1.bf16.msra.mxu0 %v889_v16  ;;  %v952_v15 = vld [vmem:[%s1382_s1 + $0x104] ss:$24 sps:$4 sm:$0xff]   ;;  %v1009_v16 = vld [vmem:[%s1382_s1 + $0x2d8] ss:$24 sps:$4 sm:$0xff]   ;;  %v994_v30 = vld [vmem:[%s1382_s1 + $0x254] ss:$24 sps:$4 sm:$0xff]  }
  0x1c   :  { %642 = vmatprep.subr.bf16.mxu0 %v890_v18  ;;  %682 = vmatpush1.bf16.msra.mxu1 %v949_v37  ;;  %v950_v17 = vld [vmem:[%s1382_s1 + $0x100] ss:$24 sps:$4 sm:$0xff]   ;;  %v958_v18 = vld [vmem:[%s1382_s1 + $0x134] ss:$24 sps:$4 sm:$0xff]   ;;  %v964_v20 = vld [vmem:[%s1382_s1 + $0x164] ss:$24 sps:$4 sm:$0xff]  }
  0x1d   :  { %683 = vmatprep.subr.bf16.mxu1 %v953_v38  ;;  %v962_v21 = vld [vmem:[%s1382_s1 + $0x160] ss:$24 sps:$4 sm:$0xff]   ;;  %v976_v24 = vld [vmem:[%s1382_s1 + $0x1c4] ss:$24 sps:$4 sm:$0xff]   ;;  %v980_v27 = vld [vmem:[%s1382_s1 + $0x1f0] ss:$24 sps:$4 sm:$0xff]   ;;  %v118_v38 = vlaneseq }
  0x1e   :  { %v974_v25 = vld [vmem:[%s1382_s1 + $0x1c0] ss:$24 sps:$4 sm:$0xff]   ;;  %v1006_v34 = vld [vmem:[%s1382_s1 + $0x2b4] ss:$24 sps:$4 sm:$0xff]  }
  0x1f   :  { %643 = vmatpush1.bf16.msra.mxu0 %v892_v22  ;;  %v970_v22 = vld [vmem:[%s1382_s1 + $0x194] ss:$24 sps:$4 sm:$0xff]   ;;  %v986_v29 = vld [vmem:[%s1382_s1 + $0x220] ss:$24 sps:$4 sm:$0xff]  }
  0x20   :  { %644 = vmatprep.subr.bf16.mxu0 %v893_v23  ;;  %684 = vmatpush1.bf16.msra.mxu1 %v955_v41  ;;  %v968_v23 = vld [vmem:[%s1382_s1 + $0x190] ss:$24 sps:$4 sm:$0xff]   ;;  %v998_v33 = vld [vmem:[%s1382_s1 + $0x280] ss:$24 sps:$4 sm:$0xff]  }
  0x21   :  { %685 = vmatprep.subr.bf16.mxu1 %v959_v42  ;;  %v1010_v37 = vld [vmem:[%s1382_s1 + $0x2e0] ss:$24 sps:$4 sm:$0xff]  }
  0x22   :  { %v116_v41 = vld [vmem:[%s1384_s2] sm:$0x3f] }
  0x23   :  { %645 = vmatpush1.bf16.msra.mxu0 %v895_v26  ;;  %v982_v26 = vld [vmem:[%s1382_s1 + $0x1f4] ss:$24 sps:$4 sm:$0xff]  }
  0x24   :  { %646 = vmatprep.subr.bf16.mxu0 %v896_v28  ;;  %686 = vmatpush1.bf16.msra.mxu1 %v961_v45  ;;  %v988_v28 = vld [vmem:[%s1382_s1 + $0x224] ss:$24 sps:$4 sm:$0xff]  }
  0x25   :  { %687 = vmatprep.subr.bf16.mxu1 %v965_v46 }
  0x27   :  { %647 = vmatpush1.bf16.msra.mxu0 %v898_v31  ;;  %v992_v31 = vld [vmem:[%s1382_s1 + $0x250] ss:$24 sps:$4 sm:$0xff]  }
  0x28   :  { %648 = vmatprep.subr.bf16.mxu0 %v899_v32  ;;  %688 = vmatpush1.bf16.msra.mxu1 %v967_v49  ;;  %v1000_v32 = vld [vmem:[%s1382_s1 + $0x284] ss:$24 sps:$4 sm:$0xff]  }
  0x29   :  { %689 = vmatprep.subr.bf16.mxu1 %v971_v50 }
  0x2b   :  { %649 = vmatpush1.bf16.msra.mxu0 %v901_v35  ;;  %v1004_v35 = vld [vmem:[%s1382_s1 + $0x2b0] ss:$24 sps:$4 sm:$0xff]  }
  0x2c   :  { %650 = vmatprep.subr.bf16.mxu0 %v902_v36  ;;  %690 = vmatpush1.bf16.msra.mxu1 %v973_v53  ;;  %v1012_v36 = vld [vmem:[%s1382_s1 + $0x2e4] ss:$24 sps:$4 sm:$0xff]  }
  0x2d   :  { %691 = vmatprep.subr.bf16.mxu1 %v977_v55 }
  0x2f   :  { %651 = vmatpush1.bf16.msra.mxu0 %v904_v39  ;;  %v119_v39 = vshrl.u32 %v118_v38, 7 }
  0x30   :  { %652 = vmatprep.subr.bf16.mxu0 %v905_v40  ;;  %692 = vmatpush1.bf16.msra.mxu1 %v979_v59 }
  0x31   :  { %693 = vmatprep.subr.bf16.mxu1 %v983_v61  ;;  %v120_v40 = vsub.s32 0, %v119_v39  ;;  %v124_v42 = vsub.s32 1, %v119_v39  ;;  %v128_v53 = vsub.s32 2, %v119_v39 }
  0x33   :  { %653 = vmatpush1.bf16.msra.mxu0 %v907_v43  ;;  %v121_v43 = vrot.slane %v116_v41, %v120_v40  ;;  %v129_v55 = vrot.slane %v116_v41, %v128_v53 }
  0x34   :  { %654 = vmatprep.subr.bf16.mxu0 %v908_v44  ;;  %694 = vmatpush1.bf16.msra.mxu1 %v985_v0  ;;  %v125_v44 = vrot.slane %v116_v41, %v124_v42 }
  0x35   :  { %695 = vmatprep.subr.bf16.mxu1 %v989_v1  ;;  %v136_v1 = vsub.s32 4, %v119_v39 }
  0x37   :  { %655 = vmatpush1.bf16.msra.mxu0 %v910_v47 }
  0x38   :  { %656 = vmatprep.subr.bf16.mxu0 %v911_v48  ;;  %696 = vmatpush1.bf16.msra.mxu1 %v991_v4 }
  0x39   :  { %697 = vmatprep.subr.bf16.mxu1 %v995_v5 }
  0x3b   :  { %657 = vmatpush1.bf16.msra.mxu0 %v913_v51 }
  0x3c   :  { %658 = vmatprep.subr.bf16.mxu0 %v914_v52  ;;  %698 = vmatpush1.bf16.msra.mxu1 %v997_v8 }
  0x3d   :  { %699 = vmatprep.subr.bf16.mxu1 %v1001_v9 }
  0x3f   :  { %659 = vmatpush1.bf16.msra.mxu0 %v916_v54  ;;  %v132_v54 = vsub.s32 3, %v119_v39 }
  0x40   :  { %714 = vmatprep.subr.bf16.mxu0 %v922_v58  ;;  %700 = vmatpush1.bf16.msra.mxu1 %v1003_v12 }
  0x41   :  { %701 = vmatprep.subr.bf16.mxu1 %v1007_v13  ;;  %v133_v56 = vrot.slane %v116_v41, %v132_v54 }
  0x42   :  { %661 = vmatmul.mubr.bf16.vlgmr.msra.gmra.mrb[0].mxu0 %v1214_v60 }
  0x43   :  { %715 = vmatpush1.bf16.msra.mxu0 %v920_v62  ;;  %746 = vmatprep.mubr.bf16.mxu0 %v1090_v19  ;;  %v956_v19 = vld [vmem:[%s1382_s1 + $0x130] ss:$24 sps:$4 sm:$0xff]  }
  0x44   :  { %716 = vmatprep.subr.bf16.mxu0 %v928_v63  ;;  %702 = vmatpush1.bf16.msra.mxu1 %v1009_v16 }
  0x47   :  { %717 = vmatpush1.bf16.msra.mxu0 %v926_v2  ;;  %704 = vmatmul.mubr.bf16.vlgmr.msra.gmra.mrb[0].mxu1 %v1214_v60  ;;  %v140_v2 = vsub.s32 5, %v119_v39 }
  0x48   :  { %718 = vmatprep.subr.bf16.mxu0 %v934_v3  ;;  %v137_v3 = vrot.slane %v116_v41, %v136_v1 }
  0x49   :  { %v141_v4 = vrot.slane %v116_v41, %v140_v2 }
  0x4b   :  { %719 = vmatpush1.bf16.msra.mxu0 %v932_v6 }
  0x4c   :  { %720 = vmatprep.subr.bf16.mxu0 %v940_v7 }
  0x4f   :  { %721 = vmatpush1.bf16.msra.mxu0 %v938_v10 }
  0x50   :  { %722 = vmatprep.subr.bf16.mxu0 %v946_v11 }
  0x53   :  { %723 = vmatpush1.bf16.msra.mxu0 %v944_v14 }
  0x54   :  { %724 = vmatprep.subr.bf16.mxu0 %v952_v15 }
  0x57   :  { %725 = vmatpush1.bf16.msra.mxu0 %v950_v17 }
  0x58   :  { %726 = vmatprep.subr.bf16.mxu0 %v958_v18 }
  0x5b   :  { %727 = vmatpush1.bf16.msra.mxu0 %v956_v19 }
  0x5c   :  { %728 = vmatprep.subr.bf16.mxu0 %v964_v20 }
  0x5f   :  { %729 = vmatpush1.bf16.msra.mxu0 %v962_v21 }
  0x60   :  { %730 = vmatprep.subr.bf16.mxu0 %v970_v22 }
  0x63   :  { %731 = vmatpush1.bf16.msra.mxu0 %v968_v23 }
  0x64   :  { %732 = vmatprep.subr.bf16.mxu0 %v976_v24 }
  0x67   :  { %733 = vmatpush1.bf16.msra.mxu0 %v974_v25 }
  0x68   :  { %734 = vmatprep.subr.bf16.mxu0 %v982_v26 }
  0x6b   :  { %735 = vmatpush1.bf16.msra.mxu0 %v980_v27 }
  0x6c   :  { %736 = vmatprep.subr.bf16.mxu0 %v988_v28 }
  0x6f   :  { %737 = vmatpush1.bf16.msra.mxu0 %v986_v29 }
  0x70   :  { %738 = vmatprep.subr.bf16.mxu0 %v994_v30 }
  0x73   :  { %739 = vmatpush1.bf16.msra.mxu0 %v992_v31 }
  0x74   :  { %740 = vmatprep.subr.bf16.mxu0 %v1000_v32 }
  0x77   :  { %741 = vmatpush1.bf16.msra.mxu0 %v998_v33 }
  0x78   :  { %742 = vmatprep.subr.bf16.mxu0 %v1006_v34 }
  0x7b   :  { %743 = vmatpush1.bf16.msra.mxu0 %v1004_v35 }
  0x7c   :  { %744 = vmatprep.subr.bf16.mxu0 %v1012_v36 }
  0x7f   :  { %745 = vmatpush1.bf16.msra.mxu0 %v1010_v37 }
  0x82   :  { %747 = vmatmul.mubr.bf16.vlgmr.msra.gmra.mrb[4].mxu0 %v1214_v60 }
 0x115   :  { %v662_v45 = vpop.f32.mrb[0].mxu0 }
 0x116   :  { %v663_v46 = vadd.f32 %v662_v45, %v121_v43  ;;  %v664_v47 = vpop.f32.mrb[1].mxu0 }
 0x117   :  { %v665_v48 = vadd.f32 %v664_v47, %v125_v44  ;;  %v666_v49 = vpop.f32.mrb[2].mxu0 }
 0x118   :  { %757 = vst [vmem:[%s1385_s3] sm:$0xff] %v663_v46  ;;  %v667_v50 = vadd.f32 %v666_v49, %v121_v43  ;;  %v668_v51 = vpop.f32.mrb[3].mxu0 }
 0x119   :  { %758 = vst [vmem:[%s1385_s3 + $0x8] sm:$0xff] %v665_v48  ;;  %v669_v52 = vadd.f32 %v668_v51, %v125_v44 }
 0x11a   :  { %763 = vst [vmem:[%s1385_s3 + $0x30] sm:$0xff] %v667_v50  ;;  %v705_v57 = vpop.f32.mrb[0].mxu1 }
 0x11b   :  { %764 = vst [vmem:[%s1385_s3 + $0x38] sm:$0xff] %v669_v52  ;;  %v706_v58 = vadd.f32 %v705_v57, %v129_v55  ;;  %v707_v59 = vpop.f32.mrb[1].mxu1 }
 0x11c   :  { %v708_v60 = vadd.f32 %v707_v59, %v133_v56  ;;  %v709_v61 = vpop.f32.mrb[2].mxu1 }
 0x11d   :  { %759 = vst [vmem:[%s1385_s3 + $0x10] sm:$0xff] %v706_v58  ;;  %v710_v62 = vadd.f32 %v709_v61, %v129_v55  ;;  %v711_v63 = vpop.f32.mrb[3].mxu1 }
 0x11e   :  { %760 = vst [vmem:[%s1385_s3 + $0x18] sm:$0xff] %v708_v60  ;;  %v712_v0 = vadd.f32 %v711_v63, %v133_v56 }
 0x11f   :  { %765 = vst [vmem:[%s1385_s3 + $0x40] sm:$0xff] %v710_v62 }
 0x120   :  { %766 = vst [vmem:[%s1385_s3 + $0x48] sm:$0xff] %v712_v0 }
 0x155   :  { %v748_v5 = vpop.f32.mrb[4].mxu0 }
 0x156   :  { %v749_v6 = vadd.f32 %v748_v5, %v137_v3  ;;  %v750_v7 = vpop.f32.mrb[5].mxu0 }
 0x157   :  { %v751_v8 = vadd.f32 %v750_v7, %v141_v4  ;;  %v752_v9 = vpop.f32.mrb[6].mxu0 }
 0x158   :  { %761 = vst [vmem:[%s1385_s3 + $0x20] sm:$0xff] %v749_v6  ;;  %v753_v10 = vadd.f32 %v752_v9, %v137_v3  ;;  %v754_v11 = vpop.f32.mrb[7].mxu0 }
 0x159   :  { %762 = vst [vmem:[%s1385_s3 + $0x28] sm:$0xff] %v751_v8  ;;  %v755_v12 = vadd.f32 %v754_v11, %v141_v4 }
 0x15a   :  { %767 = vst [vmem:[%s1385_s3 + $0x50] sm:$0xff] %v753_v10 }
 0x15b   :  { %768 = vst [vmem:[%s1385_s3 + $0x58] sm:$0xff] %v755_v12 }

// kernel: deepspeech2_forward.35
= control target key start
LH: loop header
LB: loop body
LE: loop exit
PB: predicated region body
PF: predicated region fallthrough
CT: control target
= control target key end

     0   :  { %v27_v5 = vlaneseq  ;;  %s431_s3 = inlined_call_operand.vmem [shape: bf16[256,128], index: 3, kind: input, shape index: {}]   ;;  %s432_s0 = inlined_call_operand.vmem [shape: f32[16,256], index: 0, kind: input, shape index: {}]   ;;  %s433_s1 = inlined_call_operand.vmem [shape: f32[1,256], index: 1, kind: input, shape index: {}]   ;;  %s434_s2 = inlined_call_operand.vmem [shape: f32[1,256], index: 2, kind: input, shape index: {}]   ;;  %s435_s4 = inlined_call_operand.vmem [shape: f32[1,128], index: 4, kind: input, shape index: {}]   ;;  %s436_s5 = inlined_call_operand.vmem [shape: f32[16,128], index: 5, kind: output, shape index: {}]  }
   0x1   :  { %v302_v0 = vld [vmem:[%s431_s3 + $0x40] sm:$0xff]   ;;  %v304_v2 = vld [vmem:[%s431_s3 + $0x48] sm:$0xff]   ;;  %v306_v4 = vld [vmem:[%s431_s3 + $0x50] sm:$0xff]  }
   0x2   :  { %v303_v1 = vld [vmem:[%s431_s3] sm:$0xff]   ;;  %280 = vmatprep.subr.bf16.mxu0 %v302_v0  ;;  %v305_v3 = vld [vmem:[%s431_s3 + $0x8] sm:$0xff]   ;;  %v307_v6 = vld [vmem:[%s431_s3 + $0x10] sm:$0xff]   ;;  %v28_v8 = vshrl.u32 %v27_v5, 7 }
   0x3   :  { %281 = vmatpush3.bf16.msra.mxu0 %v303_v1  ;;  %v308_v7 = vld [vmem:[%s431_s3 + $0x58] sm:$0xff]   ;;  %v310_v10 = vld [vmem:[%s431_s3 + $0x60] sm:$0xff]   ;;  %v312_v14 = vld [vmem:[%s431_s3 + $0x68] sm:$0xff]  }
   0x4   :  { %282 = vmatprep.subr.bf16.mxu0 %v304_v2  ;;  %v309_v9 = vld [vmem:[%s431_s3 + $0x18] sm:$0xff]   ;;  %v33_v11 = vsub.s32 1, %v28_v8  ;;  %v311_v12 = vld [vmem:[%s431_s3 + $0x20] sm:$0xff]   ;;  %v29_v13 = vsub.s32 0, %v28_v8  ;;  %v22_v15 = vld [vmem:[%s432_s0 + $0x8] sm:$0xff] }
   0x5   :  { %v24_v16 = vld [vmem:[%s432_s0 + $0x18] sm:$0xff]  ;;  %v25_v17 = vld [vmem:[%s433_s1] sm:$0x3]  ;;  %v313_v22 = vld [vmem:[%s431_s3 + $0x28] sm:$0xff]  }
   0x6   :  { %v34_v18 = vrot.slane %v25_v17, %v33_v11  ;;  %v41_v19 = vld [vmem:[%s434_s2] sm:$0x3]  ;;  %v30_v20 = vrot.slane %v25_v17, %v29_v13  ;;  %v23_v26 = vld [vmem:[%s432_s0 + $0x10] sm:$0xff]  ;;  %v316_v35 = vld [vmem:[%s431_s3 + $0x78] sm:$0xff]  }
   0x7   :  { %283 = vmatpush3.bf16.msra.mxu0 %v305_v3  ;;  %v50_v21 = vrot.slane %v41_v19, %v33_v11  ;;  %v21_v25 = vld [vmem:[%s432_s0] sm:$0xff]  ;;  %v314_v27 = vld [vmem:[%s431_s3 + $0x70] sm:$0xff]   ;;  %v46_v30 = vrot.slane %v41_v19, %v29_v13  ;;  %v317_v38 = vld [vmem:[%s431_s3 + $0x38] sm:$0xff]  }
   0x8   :  { %284 = vmatprep.subr.bf16.mxu0 %v306_v4  ;;  %v38_v23 = vmul.f32 %v34_v18, %v22_v15  ;;  %v40_v24 = vmul.f32 %v34_v18, %v24_v16  ;;  %v37_v31 = vmul.f32 %v30_v20, %v21_v25  ;;  %v39_v32 = vmul.f32 %v30_v20, %v23_v26  ;;  %v315_v33 = vld [vmem:[%s431_s3 + $0x30] sm:$0xff]   ;;  %v263_v41 = vld [vmem:[%s435_s4] ss:$0 sm:$0xff] }
   0xa   :  { %v54_v28 = vadd.f32 %v50_v21, %v38_v23  ;;  %v56_v29 = vadd.f32 %v50_v21, %v40_v24  ;;  %v53_v36 = vadd.f32 %v46_v30, %v37_v31  ;;  %v55_v37 = vadd.f32 %v46_v30, %v39_v32 }
   0xb   :  { %285 = vmatpush3.bf16.msra.mxu0 %v307_v6 }
   0xc   :  { %286 = vmatprep.subr.bf16.mxu0 %v308_v7  ;;  %v58_v34 = vpack.c.bf16 %v56_v29, %v54_v28  ;;  %v57_v39 = vpack.c.bf16 %v55_v37, %v53_v36 }
   0xe   :  { %226 = vmatprep.mubr.bf16.mxu0 %v58_v34 }
   0xf   :  { %287 = vmatpush3.bf16.msra.mxu0 %v309_v9 }
  0x10   :  { %288 = vmatprep.subr.bf16.mxu0 %v310_v10 }
  0x13   :  { %289 = vmatpush3.bf16.msra.mxu0 %v311_v12 }
  0x14   :  { %290 = vmatprep.subr.bf16.mxu0 %v312_v14 }
  0x17   :  { %291 = vmatpush3.bf16.msra.mxu0 %v313_v22 }
  0x18   :  { %292 = vmatprep.subr.bf16.mxu0 %v314_v27 }
  0x1b   :  { %293 = vmatpush3.bf16.msra.mxu0 %v315_v33 }
  0x1c   :  { %294 = vmatprep.subr.bf16.mxu0 %v316_v35 }
  0x1f   :  { %295 = vmatpush3.bf16.msra.mxu0 %v317_v38 }
  0x22   :  { %227 = vmatmul.mubr.bf16.vlgmr.msra.gmra.mrb[0].mxu0 %v57_v39 }
  0xf5   :  { %v296_v40 = vpop.f32.mrb[0].mxu0 }
  0xf6   :  { %v297_v42 = vpop.f32.mrb[1].mxu0 }
  0xf7   :  { %v298_v43 = vadd.f32 %v297_v42, %v296_v40  ;;  %v299_v44 = vpop.f32.mrb[2].mxu0 }
  0xf8   :  { %v300_v45 = vpop.f32.mrb[3].mxu0 }
  0xf9   :  { %v229_v46 = vadd.f32 %v298_v43, %v263_v41  ;;  %v301_v47 = vadd.f32 %v300_v45, %v299_v44 }
  0xfb   :  { %235 = vmax.xlane.f32.xlu0 %v229_v46  ;;  %v232_v48 = vadd.f32 %v301_v47, %v263_v41 }
  0xff   :  { %237 = vmax.xlane.f32.xlu0 %v232_v48 }
 0x188   :  { %v236_v49 = vpop.xlane.xlu0 %235 }
 0x189   :  { %v239_v50 = vsub.f32 %v229_v46, %v236_v49 }
 0x18b   :  { %v241_v51 = vmul.f32 1.442695, %v239_v50 }
 0x18c   :  { %v238_v52 = vpop.xlane.xlu0 %237 }
 0x18d   :  { %v240_v53 = vsub.f32 %v232_v48, %v238_v52  ;;  %318 = vpow2.f32 %v241_v51 }
 0x18f   :  { %v243_v54 = vmul.f32 1.442695, %v240_v53 }
 0x191   :  { %320 = vpow2.f32 %v243_v54 }
 0x197   :  { %v319_v55 = vpop.eup %318 }
 0x198   :  { %245 = vadd.xlane.f32.xlu1 %v319_v55 }
 0x19b   :  { %v321_v56 = vpop.eup %320 }
 0x19c   :  { %247 = vadd.xlane.f32.xlu1 %v321_v56 }
 0x225   :  { %v246_v57 = vpop.xlane.xlu1 %245 }
 0x226   :  { %322 = vlog2.f32 %v246_v57 }
 0x229   :  { %v248_v58 = vpop.xlane.xlu1 %247 }
 0x22a   :  { %324 = vlog2.f32 %v248_v58 }
 0x230   :  { %v323_v59 = vpop.eup %322 }
 0x231   :  { %v250_v60 = vmul.f32 0.6931472, %v323_v59 }
 0x233   :  { %v253_v61 = vadd.f32 %v250_v60, %v236_v49 }
 0x234   :  { %v325_v62 = vpop.eup %324 }
 0x235   :  { %v255_v63 = vsub.f32 %v229_v46, %v253_v61  ;;  %v252_v0 = vmul.f32 0.6931472, %v325_v62 }
 0x237   :  { %257 = vst [vmem:[%s436_s5] sm:$0xff] %v255_v63  ;;  %v254_v1 = vadd.f32 %v252_v0, %v238_v52 }
 0x239   :  { %v256_v2 = vsub.f32 %v232_v48, %v254_v1 }
 0x23b   :  { %258 = vst [vmem:[%s436_s5 + $0x8] sm:$0xff] %v256_v2 }

</bundles_post_ra>
